<compile_context>
chip_gen: v5e
topology: v5e:2x2
jax: 0.10.0
libtpu: 0.0.40
codegen_flags: <defaults>
</compile_context>

<pallas_src>
import jax
import jax.numpy as jnp
from jax.experimental import pallas as pl
from jax.experimental.pallas import tpu as pltpu


# ----------------------------- Pallas kernels ------------------------------


def _conv3x3_relu_kernel(x_ref, w_ref, b_ref, o_ref):
    """Fused 3x3 same-conv (as 9 accumulating GEMMs) + bias + ReLU.

    x_ref: [1, B, H+2, W+2, C]   f32   (one siamese branch per grid step)
    w_ref: [9, C, Cout]          bf16  (tap index = kh*3 + kw)
    b_ref: [1, Cout]             f32
    o_ref: [1, B*H*W, Cout]      bf16
    """
    _, B, Hp, Wp, C = x_ref.shape
    H, W = Hp - 2, Wp - 2
    Cout = w_ref.shape[-1]

    acc = jnp.zeros((B * H * W, Cout), jnp.float32)
    # In-kernel im2col: 9 shifted windows of the padded input, each used as a
    # [B*H*W, C] GEMM operand (minor dim unchanged by the reshape -> cheap).
    for kh in range(3):
        for kw in range(3):
            patch = x_ref[0, :, kh:kh + H, kw:kw + W, :]          # [B, H, W, C]
            patch = patch.reshape(B * H * W, C)                   # [B*H*W, C]
            acc = acc + jnp.dot(
                patch.astype(jnp.bfloat16),                       # bf16 MXU operand
                w_ref[kh * 3 + kw],                               # [C, Cout] bf16
                preferred_element_type=jnp.float32,               # f32 accumulate
            )
    y = jnp.maximum(acc + b_ref[...], 0.0)                        # f32 epilogue
    o_ref[0] = y.astype(o_ref.dtype)


def _fc_kernel(x_ref, w_ref, b_ref, o_ref):
    """Fully-connected head: o = x @ w + b (bf16 MXU operands, f32 accumulate)."""
    y = jnp.dot(x_ref[...], w_ref[...], preferred_element_type=jnp.float32)
    o_ref[...] = (y + b_ref[...]).astype(o_ref.dtype)


# ------------------------------ Forward pass --------------------------------


def siamese_forward(x1, x2, params):
    """x1, x2: [B, C, H, W] (PyTorch NCHW). Returns (emb1, emb2), each [B, emb]."""
    B, C, H, W = x1.shape
    cout = params["conv_w"].shape[-1]
    emb = params["fc_w"].shape[-1]

    # Stack both branches: shared weights DMA'd once; branches -> grid axis.
    xs = jnp.stack([x1, x2], axis=0)                       # [2, B, C, H, W]
    xs = jnp.transpose(xs, (0, 1, 3, 4, 2))                # NHWC: [2, B, H, W, C]
    xs = jnp.pad(xs, ((0, 0), (0, 0), (1, 1), (1, 1), (0, 0)))  # pad=1 spatially

    conv_w = params["conv_w"].astype(jnp.bfloat16)         # [9, C, Cout]
    fc_w = params["fc_w"].astype(jnp.bfloat16)             # [H*W*Cout, emb]
    conv_b = params["conv_b"].reshape(1, cout)             # f32
    fc_b = params["fc_b"].reshape(1, emb)                  # f32

    # --- Conv 3x3 + bias + ReLU, both branches in one launch -----------------
    conv_out = pl.pallas_call(
        _conv3x3_relu_kernel,
        out_shape=jax.ShapeDtypeStruct((2, B * H * W, cout), jnp.bfloat16),
        grid=(2,),  # branch axis; "parallel" -> split across TCs on v7x
        in_specs=[
            pl.BlockSpec((1, B, H + 2, W + 2, C), lambda s: (s, 0, 0, 0, 0)),
            pl.BlockSpec((9, C, cout), lambda s: (0, 0, 0)),
            pl.BlockSpec((1, cout), lambda s: (0, 0)),
        ],
        out_specs=pl.BlockSpec((1, B * H * W, cout), lambda s: (s, 0, 0)),
        compiler_params=pltpu.CompilerParams(
            dimension_semantics=("parallel",)),
    )(xs, conv_w, conv_b)

    # Flatten to (h, w, c) features. Trailing-dim collapse of a row-major HBM
    # array => free bitcast, no relayout copy.
    feat = conv_out.reshape(2 * B, H * W * cout)           # [2*B, 2048] bf16

    # --- FC head, both branches stacked (M = 2*B) ----------------------------
    # NOTE: shapes here are tiny; single full-array block. When scaled up,
    # tile M with a grid and set vmem_limit_bytes (v7x has only 64 MiB VMEM).
    out = pl.pallas_call(
        _fc_kernel,
        out_shape=jax.ShapeDtypeStruct((2 * B, emb), jnp.float32),
        grid=(),
        in_specs=[
            pl.BlockSpec((2 * B, H * W * cout), lambda: (0, 0)),
            pl.BlockSpec((H * W * cout, emb), lambda: (0, 0)),
            pl.BlockSpec((1, emb), lambda: (0, 0)),
        ],
        out_specs=pl.BlockSpec((2 * B, emb), lambda: (0, 0)),
    )(feat, fc_w, fc_b)

    return out[:B], out[B:]


# --------------------------------- Params -----------------------------------


def init_params(c_in=4, c_out=8, h=16, w=16, emb_dim=32):
    k = jax.random.PRNGKey(42)
    k1, k2, k3, k4 = jax.random.split(k, 4)
    conv_w = jax.random.normal(k1, (9, c_in, c_out), jnp.float32) * 0.1
    conv_b = jax.random.normal(k2, (c_out,), jnp.float32) * 0.1
    fc_w = jax.random.normal(k3, (h * w * c_out, emb_dim), jnp.float32) * 0.02
    fc_b = jax.random.normal(k4, (emb_dim,), jnp.float32) * 0.02
    return {"conv_w": conv_w, "conv_b": conv_b, "fc_w": fc_w, "fc_b": fc_b}


# ---------------------------------- Main -------------------------------------


if __name__ == "__main__":
    B, C, H, W = 2, 4, 16, 16
    C_OUT, EMB = 8, 32

    key = jax.random.PRNGKey(0)
    k1, k2 = jax.random.split(key)
    x1 = jax.random.normal(k1, (B, C, H, W), jnp.float32)
    x2 = jax.random.normal(k2, (B, C, H, W), jnp.float32)

    params = init_params(c_in=C, c_out=C_OUT, h=H, w=W, emb_dim=EMB)

    out1, out2 = jax.jit(siamese_forward)(x1, x2, params)
    jax.block_until_ready((out1, out2))

    assert out1.shape == (B, EMB) and out2.shape == (B, EMB)
    assert bool(jnp.all(jnp.isfinite(out1))) and bool(jnp.all(jnp.isfinite(out2)))
    print("KERNEL_OK")
</pallas_src>

<mosaic_0001>
module attributes {stable_mosaic.version = 11 : i64} {
  func.func @_conv3x3_relu_kernel(%arg0: i32, %arg1: memref<1x2x18x18x4xf32, #tpu.memory_space<vmem>>, %arg2: memref<9x4x8xbf16, #tpu.memory_space<vmem>>, %arg3: memref<1x8xf32, #tpu.memory_space<vmem>>, %arg4: memref<1x512x8xbf16, #tpu.memory_space<vmem>>) attributes {dimension_semantics = [#tpu.dimension_semantics<parallel>], iteration_bounds = array<i64: 2>, scalar_prefetch = 0 : i64, scratch_operands = 0 : i64, tpu.core_type = #tpu.core_type<tc>, window_params = [{transform_indices = @transform_0, window_bounds = array<i64: 1, 2, 18, 18, 4>}, {pipeline_mode = #tpu.pipeline_mode<synchronous>, transform_indices = @transform_1, window_bounds = array<i64: 9, 4, 8>}, {pipeline_mode = #tpu.pipeline_mode<synchronous>, transform_indices = @transform_2, window_bounds = array<i64: 1, 8>}, {transform_indices = @transform_3, window_bounds = array<i64: 1, 512, 8>}]} {
    %cst = arith.constant 0.000000e+00 : f32
    %0 = vector.broadcast %cst : f32 to vector<512x8xf32>
    %c0 = arith.constant 0 : index
    %c0_0 = arith.constant 0 : index
    %c0_1 = arith.constant 0 : index
    %c0_2 = arith.constant 0 : index
    %c0_3 = arith.constant 0 : index
    %1 = vector.load %arg1[%c0, %c0_0, %c0_1, %c0_2, %c0_3] : memref<1x2x18x18x4xf32, #tpu.memory_space<vmem>>, vector<1x2x16x16x4xf32>
    %2 = vector.shape_cast %1 : vector<1x2x16x16x4xf32> to vector<2x16x16x4xf32>
    %3 = vector.shape_cast %2 : vector<2x16x16x4xf32> to vector<512x4xf32>
    %4 = arith.truncf %3 : vector<512x4xf32> to vector<512x4xbf16>
    %c0_4 = arith.constant 0 : index
    %c0_5 = arith.constant 0 : index
    %c0_6 = arith.constant 0 : index
    %5 = vector.load %arg2[%c0_4, %c0_5, %c0_6] : memref<9x4x8xbf16, #tpu.memory_space<vmem>>, vector<1x4x8xbf16>
    %6 = vector.shape_cast %5 : vector<1x4x8xbf16> to vector<4x8xbf16>
    %cst_7 = arith.constant dense<0.000000e+00> : vector<512x8xf32>
    %7 = tpu.matmul %4, %6, %cst_7 {dimension_numbers = #tpu.dot_dimension_numbers<[1], [0], [0], [1], [0, 0, 1, 1], [], []>} : vector<512x4xbf16>, vector<4x8xbf16>, vector<512x8xf32> -> vector<512x8xf32>
    %8 = arith.addf %0, %7 : vector<512x8xf32>
    %c0_8 = arith.constant 0 : index
    %c0_9 = arith.constant 0 : index
    %c0_10 = arith.constant 0 : index
    %c1 = arith.constant 1 : index
    %c0_11 = arith.constant 0 : index
    %9 = vector.load %arg1[%c0_8, %c0_9, %c0_10, %c1, %c0_11] : memref<1x2x18x18x4xf32, #tpu.memory_space<vmem>>, vector<1x2x16x16x4xf32>
    %10 = vector.shape_cast %9 : vector<1x2x16x16x4xf32> to vector<2x16x16x4xf32>
    %11 = vector.shape_cast %10 : vector<2x16x16x4xf32> to vector<512x4xf32>
    %12 = arith.truncf %11 : vector<512x4xf32> to vector<512x4xbf16>
    %c1_12 = arith.constant 1 : index
    %c0_13 = arith.constant 0 : index
    %c0_14 = arith.constant 0 : index
    %13 = vector.load %arg2[%c1_12, %c0_13, %c0_14] : memref<9x4x8xbf16, #tpu.memory_space<vmem>>, vector<1x4x8xbf16>
    %14 = vector.shape_cast %13 : vector<1x4x8xbf16> to vector<4x8xbf16>
    %cst_15 = arith.constant dense<0.000000e+00> : vector<512x8xf32>
    %15 = tpu.matmul %12, %14, %cst_15 {dimension_numbers = #tpu.dot_dimension_numbers<[1], [0], [0], [1], [0, 0, 1, 1], [], []>} : vector<512x4xbf16>, vector<4x8xbf16>, vector<512x8xf32> -> vector<512x8xf32>
    %16 = arith.addf %8, %15 : vector<512x8xf32>
    %c0_16 = arith.constant 0 : index
    %c0_17 = arith.constant 0 : index
    %c0_18 = arith.constant 0 : index
    %c2 = arith.constant 2 : index
    %c0_19 = arith.constant 0 : index
    %17 = vector.load %arg1[%c0_16, %c0_17, %c0_18, %c2, %c0_19] : memref<1x2x18x18x4xf32, #tpu.memory_space<vmem>>, vector<1x2x16x16x4xf32>
    %18 = vector.shape_cast %17 : vector<1x2x16x16x4xf32> to vector<2x16x16x4xf32>
    %19 = vector.shape_cast %18 : vector<2x16x16x4xf32> to vector<512x4xf32>
    %20 = arith.truncf %19 : vector<512x4xf32> to vector<512x4xbf16>
    %c2_20 = arith.constant 2 : index
    %c0_21 = arith.constant 0 : index
    %c0_22 = arith.constant 0 : index
    %21 = vector.load %arg2[%c2_20, %c0_21, %c0_22] : memref<9x4x8xbf16, #tpu.memory_space<vmem>>, vector<1x4x8xbf16>
    %22 = vector.shape_cast %21 : vector<1x4x8xbf16> to vector<4x8xbf16>
    %cst_23 = arith.constant dense<0.000000e+00> : vector<512x8xf32>
    %23 = tpu.matmul %20, %22, %cst_23 {dimension_numbers = #tpu.dot_dimension_numbers<[1], [0], [0], [1], [0, 0, 1, 1], [], []>} : vector<512x4xbf16>, vector<4x8xbf16>, vector<512x8xf32> -> vector<512x8xf32>
    %24 = arith.addf %16, %23 : vector<512x8xf32>
    %c0_24 = arith.constant 0 : index
    %c0_25 = arith.constant 0 : index
    %c1_26 = arith.constant 1 : index
    %c0_27 = arith.constant 0 : index
    %c0_28 = arith.constant 0 : index
    %25 = vector.load %arg1[%c0_24, %c0_25, %c1_26, %c0_27, %c0_28] : memref<1x2x18x18x4xf32, #tpu.memory_space<vmem>>, vector<1x2x16x16x4xf32>
    %26 = vector.shape_cast %25 : vector<1x2x16x16x4xf32> to vector<2x16x16x4xf32>
    %27 = vector.shape_cast %26 : vector<2x16x16x4xf32> to vector<512x4xf32>
    %28 = arith.truncf %27 : vector<512x4xf32> to vector<512x4xbf16>
    %c3 = arith.constant 3 : index
    %c0_29 = arith.constant 0 : index
    %c0_30 = arith.constant 0 : index
    %29 = vector.load %arg2[%c3, %c0_29, %c0_30] : memref<9x4x8xbf16, #tpu.memory_space<vmem>>, vector<1x4x8xbf16>
    %30 = vector.shape_cast %29 : vector<1x4x8xbf16> to vector<4x8xbf16>
    %cst_31 = arith.constant dense<0.000000e+00> : vector<512x8xf32>
    %31 = tpu.matmul %28, %30, %cst_31 {dimension_numbers = #tpu.dot_dimension_numbers<[1], [0], [0], [1], [0, 0, 1, 1], [], []>} : vector<512x4xbf16>, vector<4x8xbf16>, vector<512x8xf32> -> vector<512x8xf32>
    %32 = arith.addf %24, %31 : vector<512x8xf32>
    %c0_32 = arith.constant 0 : index
    %c0_33 = arith.constant 0 : index
    %c1_34 = arith.constant 1 : index
    %c1_35 = arith.constant 1 : index
    %c0_36 = arith.constant 0 : index
    %33 = vector.load %arg1[%c0_32, %c0_33, %c1_34, %c1_35, %c0_36] : memref<1x2x18x18x4xf32, #tpu.memory_space<vmem>>, vector<1x2x16x16x4xf32>
    %34 = vector.shape_cast %33 : vector<1x2x16x16x4xf32> to vector<2x16x16x4xf32>
    %35 = vector.shape_cast %34 : vector<2x16x16x4xf32> to vector<512x4xf32>
    %36 = arith.truncf %35 : vector<512x4xf32> to vector<512x4xbf16>
    %c4 = arith.constant 4 : index
    %c0_37 = arith.constant 0 : index
    %c0_38 = arith.constant 0 : index
    %37 = vector.load %arg2[%c4, %c0_37, %c0_38] : memref<9x4x8xbf16, #tpu.memory_space<vmem>>, vector<1x4x8xbf16>
    %38 = vector.shape_cast %37 : vector<1x4x8xbf16> to vector<4x8xbf16>
    %cst_39 = arith.constant dense<0.000000e+00> : vector<512x8xf32>
    %39 = tpu.matmul %36, %38, %cst_39 {dimension_numbers = #tpu.dot_dimension_numbers<[1], [0], [0], [1], [0, 0, 1, 1], [], []>} : vector<512x4xbf16>, vector<4x8xbf16>, vector<512x8xf32> -> vector<512x8xf32>
    %40 = arith.addf %32, %39 : vector<512x8xf32>
    %c0_40 = arith.constant 0 : index
    %c0_41 = arith.constant 0 : index
    %c1_42 = arith.constant 1 : index
    %c2_43 = arith.constant 2 : index
    %c0_44 = arith.constant 0 : index
    %41 = vector.load %arg1[%c0_40, %c0_41, %c1_42, %c2_43, %c0_44] : memref<1x2x18x18x4xf32, #tpu.memory_space<vmem>>, vector<1x2x16x16x4xf32>
    %42 = vector.shape_cast %41 : vector<1x2x16x16x4xf32> to vector<2x16x16x4xf32>
    %43 = vector.shape_cast %42 : vector<2x16x16x4xf32> to vector<512x4xf32>
    %44 = arith.truncf %43 : vector<512x4xf32> to vector<512x4xbf16>
    %c5 = arith.constant 5 : index
    %c0_45 = arith.constant 0 : index
    %c0_46 = arith.constant 0 : index
    %45 = vector.load %arg2[%c5, %c0_45, %c0_46] : memref<9x4x8xbf16, #tpu.memory_space<vmem>>, vector<1x4x8xbf16>
    %46 = vector.shape_cast %45 : vector<1x4x8xbf16> to vector<4x8xbf16>
    %cst_47 = arith.constant dense<0.000000e+00> : vector<512x8xf32>
    %47 = tpu.matmul %44, %46, %cst_47 {dimension_numbers = #tpu.dot_dimension_numbers<[1], [0], [0], [1], [0, 0, 1, 1], [], []>} : vector<512x4xbf16>, vector<4x8xbf16>, vector<512x8xf32> -> vector<512x8xf32>
    %48 = arith.addf %40, %47 : vector<512x8xf32>
    %c0_48 = arith.constant 0 : index
    %c0_49 = arith.constant 0 : index
    %c2_50 = arith.constant 2 : index
    %c0_51 = arith.constant 0 : index
    %c0_52 = arith.constant 0 : index
    %49 = vector.load %arg1[%c0_48, %c0_49, %c2_50, %c0_51, %c0_52] : memref<1x2x18x18x4xf32, #tpu.memory_space<vmem>>, vector<1x2x16x16x4xf32>
    %50 = vector.shape_cast %49 : vector<1x2x16x16x4xf32> to vector<2x16x16x4xf32>
    %51 = vector.shape_cast %50 : vector<2x16x16x4xf32> to vector<512x4xf32>
    %52 = arith.truncf %51 : vector<512x4xf32> to vector<512x4xbf16>
    %c6 = arith.constant 6 : index
    %c0_53 = arith.constant 0 : index
    %c0_54 = arith.constant 0 : index
    %53 = vector.load %arg2[%c6, %c0_53, %c0_54] : memref<9x4x8xbf16, #tpu.memory_space<vmem>>, vector<1x4x8xbf16>
    %54 = vector.shape_cast %53 : vector<1x4x8xbf16> to vector<4x8xbf16>
    %cst_55 = arith.constant dense<0.000000e+00> : vector<512x8xf32>
    %55 = tpu.matmul %52, %54, %cst_55 {dimension_numbers = #tpu.dot_dimension_numbers<[1], [0], [0], [1], [0, 0, 1, 1], [], []>} : vector<512x4xbf16>, vector<4x8xbf16>, vector<512x8xf32> -> vector<512x8xf32>
    %56 = arith.addf %48, %55 : vector<512x8xf32>
    %c0_56 = arith.constant 0 : index
    %c0_57 = arith.constant 0 : index
    %c2_58 = arith.constant 2 : index
    %c1_59 = arith.constant 1 : index
    %c0_60 = arith.constant 0 : index
    %57 = vector.load %arg1[%c0_56, %c0_57, %c2_58, %c1_59, %c0_60] : memref<1x2x18x18x4xf32, #tpu.memory_space<vmem>>, vector<1x2x16x16x4xf32>
    %58 = vector.shape_cast %57 : vector<1x2x16x16x4xf32> to vector<2x16x16x4xf32>
    %59 = vector.shape_cast %58 : vector<2x16x16x4xf32> to vector<512x4xf32>
    %60 = arith.truncf %59 : vector<512x4xf32> to vector<512x4xbf16>
    %c7 = arith.constant 7 : index
    %c0_61 = arith.constant 0 : index
    %c0_62 = arith.constant 0 : index
    %61 = vector.load %arg2[%c7, %c0_61, %c0_62] : memref<9x4x8xbf16, #tpu.memory_space<vmem>>, vector<1x4x8xbf16>
    %62 = vector.shape_cast %61 : vector<1x4x8xbf16> to vector<4x8xbf16>
    %cst_63 = arith.constant dense<0.000000e+00> : vector<512x8xf32>
    %63 = tpu.matmul %60, %62, %cst_63 {dimension_numbers = #tpu.dot_dimension_numbers<[1], [0], [0], [1], [0, 0, 1, 1], [], []>} : vector<512x4xbf16>, vector<4x8xbf16>, vector<512x8xf32> -> vector<512x8xf32>
    %64 = arith.addf %56, %63 : vector<512x8xf32>
    %c0_64 = arith.constant 0 : index
    %c0_65 = arith.constant 0 : index
    %c2_66 = arith.constant 2 : index
    %c2_67 = arith.constant 2 : index
    %c0_68 = arith.constant 0 : index
    %65 = vector.load %arg1[%c0_64, %c0_65, %c2_66, %c2_67, %c0_68] : memref<1x2x18x18x4xf32, #tpu.memory_space<vmem>>, vector<1x2x16x16x4xf32>
    %66 = vector.shape_cast %65 : vector<1x2x16x16x4xf32> to vector<2x16x16x4xf32>
    %67 = vector.shape_cast %66 : vector<2x16x16x4xf32> to vector<512x4xf32>
    %68 = arith.truncf %67 : vector<512x4xf32> to vector<512x4xbf16>
    %c8 = arith.constant 8 : index
    %c0_69 = arith.constant 0 : index
    %c0_70 = arith.constant 0 : index
    %69 = vector.load %arg2[%c8, %c0_69, %c0_70] : memref<9x4x8xbf16, #tpu.memory_space<vmem>>, vector<1x4x8xbf16>
    %70 = vector.shape_cast %69 : vector<1x4x8xbf16> to vector<4x8xbf16>
    %cst_71 = arith.constant dense<0.000000e+00> : vector<512x8xf32>
    %71 = tpu.matmul %68, %70, %cst_71 {dimension_numbers = #tpu.dot_dimension_numbers<[1], [0], [0], [1], [0, 0, 1, 1], [], []>} : vector<512x4xbf16>, vector<4x8xbf16>, vector<512x8xf32> -> vector<512x8xf32>
    %72 = arith.addf %64, %71 : vector<512x8xf32>
    %c0_72 = arith.constant 0 : index
    %c0_73 = arith.constant 0 : index
    %73 = vector.load %arg3[%c0_72, %c0_73] : memref<1x8xf32, #tpu.memory_space<vmem>>, vector<1x8xf32>
    %74 = vector.broadcast %73 : vector<1x8xf32> to vector<512x8xf32>
    %75 = arith.addf %72, %74 : vector<512x8xf32>
    %cst_74 = arith.constant 0.000000e+00 : f32
    %76 = vector.broadcast %cst_74 : f32 to vector<512x8xf32>
    %77 = arith.maximumf %75, %76 : vector<512x8xf32>
    %78 = arith.truncf %77 : vector<512x8xf32> to vector<512x8xbf16>
    %c0_75 = arith.constant 0 : index
    %c0_76 = arith.constant 0 : index
    %c0_77 = arith.constant 0 : index
    %79 = vector.load %arg4[%c0_75, %c0_76, %c0_77] : memref<1x512x8xbf16, #tpu.memory_space<vmem>>, vector<1x512x8xbf16>
    %80 = vector.shape_cast %79 : vector<1x512x8xbf16> to vector<512x8xbf16>
    %81 = vector.shape_cast %78 : vector<512x8xbf16> to vector<1x512x8xbf16>
    tpu.vector_store %arg4[%c0_75, %c0_76, %c0_77], %81 {strides = array<i32>} : memref<1x512x8xbf16, #tpu.memory_space<vmem>>, vector<1x512x8xbf16>,
    return
  }
  func.func @transform_0(%arg0: i32) -> (i32, i32, i32, i32, i32) {
    %c0_i32 = arith.constant 0 : i32
    %c0_i32_0 = arith.constant 0 : i32
    %c0_i32_1 = arith.constant 0 : i32
    %c0_i32_2 = arith.constant 0 : i32
    %c0_i32_3 = arith.constant 0 : i32
    return %arg0, %c0_i32, %c0_i32_0, %c0_i32_1, %c0_i32_2 : i32, i32, i32, i32, i32
  }
  func.func @transform_1(%arg0: i32) -> (i32, i32, i32) {
    %c0_i32 = arith.constant 0 : i32
    %c0_i32_0 = arith.constant 0 : i32
    %c0_i32_1 = arith.constant 0 : i32
    %c0_i32_2 = arith.constant 0 : i32
    return %c0_i32, %c0_i32_0, %c0_i32_1 : i32, i32, i32
  }
  func.func @transform_2(%arg0: i32) -> (i32, i32) {
    %c0_i32 = arith.constant 0 : i32
    %c0_i32_0 = arith.constant 0 : i32
    %c0_i32_1 = arith.constant 0 : i32
    return %c0_i32, %c0_i32_0 : i32, i32
  }
  func.func @transform_3(%arg0: i32) -> (i32, i32, i32) {
    %c0_i32 = arith.constant 0 : i32
    %c0_i32_0 = arith.constant 0 : i32
    %c0_i32_1 = arith.constant 0 : i32
    return %arg0, %c0_i32, %c0_i32_0 : i32, i32, i32
  }
}

module attributes {stable_mosaic.version = 11 : i64} {
  func.func @_fc_kernel(%arg0: memref<4x2048xbf16, #tpu.memory_space<vmem>>, %arg1: memref<2048x32xbf16, #tpu.memory_space<vmem>>, %arg2: memref<1x32xf32, #tpu.memory_space<vmem>>, %arg3: memref<4x32xf32, #tpu.memory_space<vmem>>) attributes {dimension_semantics = [], scalar_prefetch = 0 : i64, scratch_operands = 0 : i64, tpu.core_type = #tpu.core_type<tc>} {
    %c0 = arith.constant 0 : index
    %c0_0 = arith.constant 0 : index
    %0 = vector.load %arg0[%c0, %c0_0] : memref<4x2048xbf16, #tpu.memory_space<vmem>>, vector<4x2048xbf16>
    %c0_1 = arith.constant 0 : index
    %c0_2 = arith.constant 0 : index
    %1 = vector.load %arg1[%c0_1, %c0_2] : memref<2048x32xbf16, #tpu.memory_space<vmem>>, vector<2048x32xbf16>
    %cst = arith.constant dense<0.000000e+00> : vector<4x32xf32>
    %2 = tpu.matmul %0, %1, %cst {dimension_numbers = #tpu.dot_dimension_numbers<[1], [0], [0], [1], [0, 0, 1, 1], [], []>} : vector<4x2048xbf16>, vector<2048x32xbf16>, vector<4x32xf32> -> vector<4x32xf32>
    %c0_3 = arith.constant 0 : index
    %c0_4 = arith.constant 0 : index
    %3 = vector.load %arg2[%c0_3, %c0_4] : memref<1x32xf32, #tpu.memory_space<vmem>>, vector<1x32xf32>
    %4 = vector.broadcast %3 : vector<1x32xf32> to vector<4x32xf32>
    %5 = arith.addf %2, %4 : vector<4x32xf32>
    %c0_5 = arith.constant 0 : index
    %c0_6 = arith.constant 0 : index
    %6 = vector.load %arg3[%c0_5, %c0_6] : memref<4x32xf32, #tpu.memory_space<vmem>>, vector<4x32xf32>
    tpu.vector_store %arg3[%c0_5, %c0_6], %5 {strides = array<i32>} : memref<4x32xf32, #tpu.memory_space<vmem>>, vector<4x32xf32>,
    return
  }
}

</mosaic_0001>

<bundles_post_ra>
// kernel: siamese_forward.3
= control target key start
LH: loop header
LB: loop body
LE: loop exit
PB: predicated region body
PF: predicated region fallthrough
CT: control target
= control target key end

     0   :  { %vm1295_vm0 = vcmask 257024   ;;  %s2364_s1 = inlined_call_operand.vmem [shape: bf16[2048,32], index: 1, kind: input, shape index: {}]   ;;  %s2365_s0 = inlined_call_operand.vmem [shape: bf16[4,2048], index: 0, kind: input, shape index: {}]   ;;  %s2366_s2 = inlined_call_operand.vmem [shape: f32[1,32], index: 2, kind: input, shape index: {}]   ;;  %s2367_s3 = inlined_call_operand.vmem [shape: f32[4,32], index: 3, kind: output, shape index: {}]  }
   0x1   :  { %v1820_v0 = vld [vmem:[%s2364_s1 + $0x38] sm:$0xff]  ;;  %v1819_v4 = vld [vmem:[%s2364_s1 + $0x30] sm:$0xff]  ;;  %v1818_v8 = vld [vmem:[%s2364_s1 + $0x28] sm:$0xff] }
   0x2   :  { %v1828_v1 = vld [vmem:[%s2364_s1 + $0x78] sm:$0xff]  ;;  %1087 = vmatpush.bf16.msra.mxu0 %v1820_v0  ;;  %v1827_v5 = vld [vmem:[%s2364_s1 + $0x70] sm:$0xff]  ;;  %v1826_v9 = vld [vmem:[%s2364_s1 + $0x68] sm:$0xff] }
   0x3   :  { %v1836_v2 = vld [vmem:[%s2364_s1 + $0xb8] sm:$0xff]  ;;  %1100 = vmatpush.bf16.msra.mxu1 %v1828_v1  ;;  %v1835_v6 = vld [vmem:[%s2364_s1 + $0xb0] sm:$0xff]  ;;  %v1834_v10 = vld [vmem:[%s2364_s1 + $0xa8] sm:$0xff] }
   0x4   :  { %v1844_v3 = vld [vmem:[%s2364_s1 + $0xf8] sm:$0xff]  ;;  %1113 = vmatpush.bf16.msra.mxu2 %v1836_v2  ;;  %v1843_v7 = vld [vmem:[%s2364_s1 + $0xf0] sm:$0xff]  ;;  %v1842_v11 = vld [vmem:[%s2364_s1 + $0xe8] sm:$0xff] }
   0x5   :  { %1126 = vmatpush.bf16.msra.mxu3 %v1844_v3  ;;  %v1817_v12 = vld [vmem:[%s2364_s1 + $0x20] sm:$0xff]  ;;  %v1816_v16 = vld [vmem:[%s2364_s1 + $0x18] sm:$0xff]  ;;  %v1815_v21 = vld [vmem:[%s2364_s1 + $0x10] sm:$0xff] }
   0x6   :  { %1088 = vmatpush.bf16.msra.mxu0 %v1819_v4  ;;  %v1825_v13 = vld [vmem:[%s2364_s1 + $0x60] sm:$0xff]  ;;  %v1824_v17 = vld [vmem:[%s2364_s1 + $0x58] sm:$0xff]  ;;  %v1823_v22 = vld [vmem:[%s2364_s1 + $0x50] sm:$0xff] }
   0x7   :  { %1101 = vmatpush.bf16.msra.mxu1 %v1827_v5  ;;  %v1833_v14 = vld [vmem:[%s2364_s1 + $0xa0] sm:$0xff]  ;;  %v1832_v18 = vld [vmem:[%s2364_s1 + $0x98] sm:$0xff]  ;;  %v1831_v23 = vld [vmem:[%s2364_s1 + $0x90] sm:$0xff] }
   0x8   :  { %1114 = vmatpush.bf16.msra.mxu2 %v1835_v6  ;;  %v1841_v15 = vld [vmem:[%s2364_s1 + $0xe0] sm:$0xff]  ;;  %v1840_v19 = vld [vmem:[%s2364_s1 + $0xd8] sm:$0xff]  ;;  %v1839_v24 = vld [vmem:[%s2364_s1 + $0xd0] sm:$0xff] }
   0x9   :  { %1127 = vmatpush.bf16.msra.mxu3 %v1843_v7  ;;  %v14_v20 = vld [vmem:[%s2365_s0] sm:$0xff]  ;;  %v1814_v25 = vld [vmem:[%s2364_s1 + $0x8] sm:$0xff]  ;;  %v16_v31 = vld [vmem:[%s2365_s0 + $0x10] sm:$0xff] }
   0xa   :  { %1089 = vmatpush.bf16.msra.mxu0 %v1818_v8  ;;  %279 = vst [vmem:[#allocation1] ss:$4 sm:$0xff] %v14_v20  ;;  %v1822_v26 = vld [vmem:[%s2364_s1 + $0x48] sm:$0xff]  ;;  %v1813_v29 = vld [vmem:[%s2364_s1] sm:$0xff]  ;;  %v1852_v38 = vld [vmem:[%s2364_s1 + $0x138] sm:$0xff] }
   0xb   :  { %1102 = vmatpush.bf16.msra.mxu1 %v1826_v9  ;;  %v1830_v27 = vld [vmem:[%s2364_s1 + $0x88] sm:$0xff]  ;;  %v1821_v30 = vld [vmem:[%s2364_s1 + $0x40] sm:$0xff]  ;;  %v1860_v39 = vld [vmem:[%s2364_s1 + $0x178] sm:$0xff] }
   0xc   :  { %1115 = vmatpush.bf16.msra.mxu2 %v1834_v10  ;;  %v1838_v28 = vld [vmem:[%s2364_s1 + $0xc8] sm:$0xff]  ;;  %v1829_v36 = vld [vmem:[%s2364_s1 + $0x80] sm:$0xff]  ;;  %v1868_v40 = vld [vmem:[%s2364_s1 + $0x1b8] sm:$0xff] }
   0xd   :  { %1128 = vmatpush.bf16.msra.mxu3 %v1842_v11  ;;  %v1837_v37 = vld [vmem:[%s2364_s1 + $0xc0] sm:$0xff]  ;;  %v1876_v41 = vld [vmem:[%s2364_s1 + $0x1f8] sm:$0xff]  ;;  %v15_v42 = vld [vmem:[%s2365_s0 + $0x8] sm:$0xff] }
   0xe   :  { %1090 = vmatpush.bf16.msra.mxu0 %v1817_v12  ;;  %282 = vst [vmem:[#allocation1 + $0x20] ss:$4 sm:$0xff] %v15_v42  ;;  %v1851_v43 = vld [vmem:[%s2364_s1 + $0x130] sm:$0xff]  ;;  %v1850_v47 = vld [vmem:[%s2364_s1 + $0x128] sm:$0xff]  ;;  %v17_v54 = vld [vmem:[%s2365_s0 + $0x18] sm:$0xff] }
   0xf   :  { %1103 = vmatpush.bf16.msra.mxu1 %v1825_v13  ;;  %v1859_v44 = vld [vmem:[%s2364_s1 + $0x170] sm:$0xff]  ;;  %v1858_v48 = vld [vmem:[%s2364_s1 + $0x168] sm:$0xff]  ;;  %v1849_v56 = vld [vmem:[%s2364_s1 + $0x120] sm:$0xff] }
  0x10   :  { %1116 = vmatpush.bf16.msra.mxu2 %v1833_v14  ;;  %v1867_v45 = vld [vmem:[%s2364_s1 + $0x1b0] sm:$0xff]  ;;  %v1866_v49 = vld [vmem:[%s2364_s1 + $0x1a8] sm:$0xff]  ;;  %v1857_v57 = vld [vmem:[%s2364_s1 + $0x160] sm:$0xff] }
  0x11   :  { %1129 = vmatpush.bf16.msra.mxu3 %v1841_v15  ;;  %v285_v32 = vld.sshfl [vmem:[#allocation1 + $0x10] sm:$0xff pattern:$0x73625140]  ;;  %v283_v33 = vld.sshfl [vmem:[#allocation1] sm:$0xff pattern:$0x73625140] }
  0x12   :  { %1091 = vmatpush.bf16.msra.mxu0 %v1816_v16  ;;  %v286_v34 = vld.sshfl [vmem:[#allocation1 + $0x18] sm:$0xff pattern:$0x73625140]  ;;  %v284_v35 = vld.sshfl [vmem:[#allocation1 + $0x8] sm:$0xff pattern:$0x73625140] }
  0x13   :  { %1104 = vmatpush.bf16.msra.mxu1 %v1824_v17  ;;  %292 = vst [vmem:[#allocation1] ss:$4 sm:$0xff] %v16_v31  ;;  %v1875_v46 = vld [vmem:[%s2364_s1 + $0x1f0] sm:$0xff]  ;;  %v1874_v50 = vld [vmem:[%s2364_s1 + $0x1e8] sm:$0xff]  ;;  %v1865_v58 = vld [vmem:[%s2364_s1 + $0x1a0] sm:$0xff] }
  0x14   :  { %1117 = vmatpush.bf16.msra.mxu2 %v1832_v18  ;;  %v1873_v59 = vld [vmem:[%s2364_s1 + $0x1e0] sm:$0xff]  ;;  %v1848_v60 = vld [vmem:[%s2364_s1 + $0x118] sm:$0xff]  ;;  %v1847_v0 = vld [vmem:[%s2364_s1 + $0x110] sm:$0xff] }
  0x15   :  { %1130 = vmatpush.bf16.msra.mxu3 %v1840_v19  ;;  %v289_v51 = vld.sshfl [vmem:[#allocation1 + $0x30] sm:$0xff pattern:$0x73625140]  ;;  %v287_v52 = vld.sshfl [vmem:[#allocation1 + $0x20] sm:$0xff pattern:$0x73625140] }
  0x16   :  { %1092 = vmatpush.bf16.msra.mxu0 %v1815_v21  ;;  %v290_v53 = vld.sshfl [vmem:[#allocation1 + $0x38] sm:$0xff pattern:$0x73625140]  ;;  %v288_v55 = vld.sshfl [vmem:[#allocation1 + $0x28] sm:$0xff pattern:$0x73625140] }
  0x17   :  { %1105 = vmatpush.bf16.msra.mxu1 %v1823_v22  ;;  %294 = vst [vmem:[#allocation1 + $0x20] ss:$4 sm:$0xff] %v17_v54  ;;  %v1856_v61 = vld [vmem:[%s2364_s1 + $0x158] sm:$0xff]  ;;  %v1855_v1 = vld [vmem:[%s2364_s1 + $0x150] sm:$0xff]  ;;  %v1846_v4 = vld [vmem:[%s2364_s1 + $0x108] sm:$0xff] }
  0x18   :  { %1118 = vmatpush.bf16.msra.mxu2 %v1831_v23  ;;  %v1864_v62 = vld [vmem:[%s2364_s1 + $0x198] sm:$0xff]  ;;  %v1863_v2 = vld [vmem:[%s2364_s1 + $0x190] sm:$0xff]  ;;  %v1854_v5 = vld [vmem:[%s2364_s1 + $0x148] sm:$0xff] }
  0x19   :  { %1131 = vmatpush.bf16.msra.mxu3 %v1839_v24  ;;  %v1872_v63 = vld [vmem:[%s2364_s1 + $0x1d8] sm:$0xff]  ;;  %v1871_v3 = vld [vmem:[%s2364_s1 + $0x1d0] sm:$0xff]  ;;  %v1862_v6 = vld [vmem:[%s2364_s1 + $0x188] sm:$0xff] }
  0x1a   :  { %1093 = vmatpush.bf16.msra.mxu0 %v1814_v25  ;;  %v1870_v7 = vld [vmem:[%s2364_s1 + $0x1c8] sm:$0xff]  ;;  %v1845_v8 = vld [vmem:[%s2364_s1 + $0x100] sm:$0xff]  ;;  %v1884_v12 = vld [vmem:[%s2364_s1 + $0x238] sm:$0xff] }
  0x1b   :  { %1106 = vmatpush.bf16.msra.mxu1 %v1822_v26  ;;  %v1853_v9 = vld [vmem:[%s2364_s1 + $0x140] sm:$0xff]  ;;  %v1892_v13 = vld [vmem:[%s2364_s1 + $0x278] sm:$0xff]  ;;  %v1883_v16 = vld [vmem:[%s2364_s1 + $0x230] sm:$0xff] }
  0x1c   :  { %1119 = vmatpush.bf16.msra.mxu2 %v1830_v27  ;;  %v1861_v10 = vld [vmem:[%s2364_s1 + $0x180] sm:$0xff]  ;;  %v1900_v14 = vld [vmem:[%s2364_s1 + $0x2b8] sm:$0xff]  ;;  %v1891_v17 = vld [vmem:[%s2364_s1 + $0x270] sm:$0xff] }
  0x1d   :  { %1132 = vmatpush.bf16.msra.mxu3 %v1838_v28  ;;  %v1869_v11 = vld [vmem:[%s2364_s1 + $0x1c0] sm:$0xff]  ;;  %v1908_v15 = vld [vmem:[%s2364_s1 + $0x2f8] sm:$0xff]  ;;  %v1899_v18 = vld [vmem:[%s2364_s1 + $0x2b0] sm:$0xff] }
  0x1e   :  { %1094 = vmatpush.bf16.msra.mxu0 %v1813_v29  ;;  %v1907_v19 = vld [vmem:[%s2364_s1 + $0x2f0] sm:$0xff]  ;;  %v1882_v20 = vld [vmem:[%s2364_s1 + $0x228] sm:$0xff]  ;;  %v1881_v24 = vld [vmem:[%s2364_s1 + $0x220] sm:$0xff] }
  0x1f   :  { %1107 = vmatpush.bf16.msra.mxu1 %v1821_v30  ;;  %v1890_v21 = vld [vmem:[%s2364_s1 + $0x268] sm:$0xff]  ;;  %v1889_v25 = vld [vmem:[%s2364_s1 + $0x260] sm:$0xff]  ;;  %v1880_v28 = vld [vmem:[%s2364_s1 + $0x218] sm:$0xff] }
  0x20   :  { %1120 = vmatpush.bf16.msra.mxu2 %v1829_v36  ;;  %v1898_v22 = vld [vmem:[%s2364_s1 + $0x2a8] sm:$0xff]  ;;  %v1897_v26 = vld [vmem:[%s2364_s1 + $0x2a0] sm:$0xff]  ;;  %v1888_v29 = vld [vmem:[%s2364_s1 + $0x258] sm:$0xff] }
  0x21   :  { %1133 = vmatpush.bf16.msra.mxu3 %v1837_v37  ;;  %1095 = vmatmul.bf16.vlgmr.msra.gmra.mxu0 %v283_v33  ;;  %v1906_v23 = vld [vmem:[%s2364_s1 + $0x2e8] sm:$0xff]  ;;  %v1905_v27 = vld [vmem:[%s2364_s1 + $0x2e0] sm:$0xff]  ;;  %v1896_v30 = vld [vmem:[%s2364_s1 + $0x298] sm:$0xff] }
  0x22   :  { %1139 = vmatpush.bf16.msrb.mxu0 %v1852_v38  ;;  %1108 = vmatmul.bf16.vlgmr.msra.gmra.mxu1 %v284_v35  ;;  %v1904_v31 = vld [vmem:[%s2364_s1 + $0x2d8] sm:$0xff]  ;;  %v1887_v33 = vld [vmem:[%s2364_s1 + $0x250] sm:$0xff]  ;;  %v1878_v36 = vld [vmem:[%s2364_s1 + $0x208] sm:$0xff] }
  0x23   :  { %1152 = vmatpush.bf16.msrb.mxu1 %v1860_v39  ;;  %1121 = vmatmul.bf16.vlgmr.msra.gmra.mxu2 %v285_v32  ;;  %v1879_v32 = vld [vmem:[%s2364_s1 + $0x210] sm:$0xff]  ;;  %v1886_v37 = vld [vmem:[%s2364_s1 + $0x248] sm:$0xff]  ;;  %v1893_v42 = vld [vmem:[%s2364_s1 + $0x280] sm:$0xff] }
  0x24   :  { %1165 = vmatpush.bf16.msrb.mxu2 %v1868_v40  ;;  %1134 = vmatmul.bf16.vlgmr.msra.gmra.mxu3 %v286_v34  ;;  %v1895_v34 = vld [vmem:[%s2364_s1 + $0x290] sm:$0xff]  ;;  %v1894_v38 = vld [vmem:[%s2364_s1 + $0x288] sm:$0xff]  ;;  %v1877_v40 = vld [vmem:[%s2364_s1 + $0x200] sm:$0xff] }
  0x25   :  { %1178 = vmatpush.bf16.msrb.mxu3 %v1876_v41  ;;  %v1903_v35 = vld [vmem:[%s2364_s1 + $0x2d0] sm:$0xff]  ;;  %v1902_v39 = vld [vmem:[%s2364_s1 + $0x2c8] sm:$0xff]  ;;  %v1885_v41 = vld [vmem:[%s2364_s1 + $0x240] sm:$0xff] }
  0x26   :  { %1140 = vmatpush.bf16.msrb.mxu0 %v1851_v43  ;;  %v1901_v43 = vld [vmem:[%s2364_s1 + $0x2c0] sm:$0xff]  ;;  %v1931_v54 = vld [vmem:[%s2364_s1 + $0x3b0] sm:$0xff] }
  0x27   :  { %1153 = vmatpush.bf16.msrb.mxu1 %v1859_v44  ;;  %v1916_v44 = vld [vmem:[%s2364_s1 + $0x338] sm:$0xff] }
  0x28   :  { %1166 = vmatpush.bf16.msrb.mxu2 %v1867_v45  ;;  %v1924_v45 = vld [vmem:[%s2364_s1 + $0x378] sm:$0xff] }
  0x29   :  { %1179 = vmatpush.bf16.msrb.mxu3 %v1875_v46  ;;  %v1932_v46 = vld [vmem:[%s2364_s1 + $0x3b8] sm:$0xff] }
  0x2a   :  { %1141 = vmatpush.bf16.msrb.mxu0 %v1850_v47  ;;  %v1940_v47 = vld [vmem:[%s2364_s1 + $0x3f8] sm:$0xff] }
  0x2b   :  { %1154 = vmatpush.bf16.msrb.mxu1 %v1858_v48  ;;  %v295_v48 = vld.sshfl [vmem:[#allocation1] sm:$0xff pattern:$0x73625140] }
  0x2c   :  { %1167 = vmatpush.bf16.msrb.mxu2 %v1866_v49  ;;  %v297_v49 = vld.sshfl [vmem:[#allocation1 + $0x10] sm:$0xff pattern:$0x73625140] }
  0x2d   :  { %1180 = vmatpush.bf16.msrb.mxu3 %v1874_v50  ;;  %v296_v50 = vld.sshfl [vmem:[#allocation1 + $0x8] sm:$0xff pattern:$0x73625140] }
  0x2e   :  { %1142 = vmatpush.bf16.msrb.mxu0 %v1849_v56  ;;  %v1914_v56 = vld [vmem:[%s2364_s1 + $0x328] sm:$0xff] }
  0x2f   :  { %1155 = vmatpush.bf16.msrb.mxu1 %v1857_v57  ;;  %v1922_v57 = vld [vmem:[%s2364_s1 + $0x368] sm:$0xff] }
  0x30   :  { %1168 = vmatpush.bf16.msrb.mxu2 %v1865_v58  ;;  %v1930_v58 = vld [vmem:[%s2364_s1 + $0x3a8] sm:$0xff] }
  0x31   :  { %1181 = vmatpush.bf16.msrb.mxu3 %v1873_v59  ;;  %v1938_v59 = vld [vmem:[%s2364_s1 + $0x3e8] sm:$0xff] }
  0x32   :  { %1143 = vmatpush.bf16.msrb.mxu0 %v1848_v60  ;;  %v1913_v60 = vld [vmem:[%s2364_s1 + $0x320] sm:$0xff] }
  0x33   :  { %1156 = vmatpush.bf16.msrb.mxu1 %v1856_v61  ;;  %v1921_v61 = vld [vmem:[%s2364_s1 + $0x360] sm:$0xff] }
  0x34   :  { %1169 = vmatpush.bf16.msrb.mxu2 %v1864_v62  ;;  %v1929_v62 = vld [vmem:[%s2364_s1 + $0x3a0] sm:$0xff] }
  0x35   :  { %1182 = vmatpush.bf16.msrb.mxu3 %v1872_v63  ;;  %v1937_v63 = vld [vmem:[%s2364_s1 + $0x3e0] sm:$0xff] }
  0x36   :  { %1144 = vmatpush.bf16.msrb.mxu0 %v1847_v0  ;;  %v1912_v0 = vld [vmem:[%s2364_s1 + $0x318] sm:$0xff] }
  0x37   :  { %1157 = vmatpush.bf16.msrb.mxu1 %v1855_v1  ;;  %v1920_v1 = vld [vmem:[%s2364_s1 + $0x358] sm:$0xff] }
  0x38   :  { %1170 = vmatpush.bf16.msrb.mxu2 %v1863_v2  ;;  %v1928_v2 = vld [vmem:[%s2364_s1 + $0x398] sm:$0xff] }
  0x39   :  { %1183 = vmatpush.bf16.msrb.mxu3 %v1871_v3  ;;  %v1936_v3 = vld [vmem:[%s2364_s1 + $0x3d8] sm:$0xff] }
  0x3a   :  { %1145 = vmatpush.bf16.msrb.mxu0 %v1846_v4  ;;  %v1911_v4 = vld [vmem:[%s2364_s1 + $0x310] sm:$0xff] }
  0x3b   :  { %1158 = vmatpush.bf16.msrb.mxu1 %v1854_v5  ;;  %v1919_v5 = vld [vmem:[%s2364_s1 + $0x350] sm:$0xff] }
  0x3c   :  { %1171 = vmatpush.bf16.msrb.mxu2 %v1862_v6  ;;  %v1927_v6 = vld [vmem:[%s2364_s1 + $0x390] sm:$0xff] }
  0x3d   :  { %1184 = vmatpush.bf16.msrb.mxu3 %v1870_v7  ;;  %v1935_v7 = vld [vmem:[%s2364_s1 + $0x3d0] sm:$0xff] }
  0x3e   :  { %1146 = vmatpush.bf16.msrb.mxu0 %v1845_v8  ;;  %v1910_v8 = vld [vmem:[%s2364_s1 + $0x308] sm:$0xff] }
  0x3f   :  { %1159 = vmatpush.bf16.msrb.mxu1 %v1853_v9  ;;  %v1918_v9 = vld [vmem:[%s2364_s1 + $0x348] sm:$0xff] }
  0x40   :  { %1172 = vmatpush.bf16.msrb.mxu2 %v1861_v10  ;;  %v1926_v10 = vld [vmem:[%s2364_s1 + $0x388] sm:$0xff] }
  0x41   :  { %1185 = vmatpush.bf16.msrb.mxu3 %v1869_v11  ;;  %1147 = vmatmul.bf16.vlgmr.msrb.gmra.mxu0 %v287_v52  ;;  %v1915_v52 = vld [vmem:[%s2364_s1 + $0x330] sm:$0xff]  ;;  %v1934_v11 = vld [vmem:[%s2364_s1 + $0x3c8] sm:$0xff] }
  0x42   :  { %1191 = vmatpush.bf16.msra.mxu0 %v1884_v12  ;;  %1160 = vmatmul.bf16.vlgmr.msrb.gmra.mxu1 %v288_v55  ;;  %v1939_v55 = vld [vmem:[%s2364_s1 + $0x3f0] sm:$0xff]  ;;  %v1909_v12 = vld [vmem:[%s2364_s1 + $0x300] sm:$0xff] }
  0x43   :  { %1204 = vmatpush.bf16.msra.mxu1 %v1892_v13  ;;  %1173 = vmatmul.bf16.vlgmr.msrb.gmra.mxu2 %v289_v51  ;;  %v298_v51 = vld.sshfl [vmem:[#allocation1 + $0x18] sm:$0xff pattern:$0x73625140]  ;;  %v1917_v13 = vld [vmem:[%s2364_s1 + $0x340] sm:$0xff] }
  0x44   :  { %1217 = vmatpush.bf16.msra.mxu2 %v1900_v14  ;;  %1186 = vmatmul.bf16.vlgmr.msrb.gmra.mxu3 %v290_v53  ;;  %v1923_v53 = vld [vmem:[%s2364_s1 + $0x370] sm:$0xff]  ;;  %v1925_v14 = vld [vmem:[%s2364_s1 + $0x380] sm:$0xff] }
  0x45   :  { %1230 = vmatpush.bf16.msra.mxu3 %v1908_v15  ;;  %v1933_v15 = vld [vmem:[%s2364_s1 + $0x3c0] sm:$0xff] }
  0x46   :  { %1192 = vmatpush.bf16.msra.mxu0 %v1883_v16  ;;  %v299_v16 = vld.sshfl [vmem:[#allocation1 + $0x20] sm:$0xff pattern:$0x73625140] }
  0x47   :  { %1205 = vmatpush.bf16.msra.mxu1 %v1891_v17  ;;  %v300_v17 = vld.sshfl [vmem:[#allocation1 + $0x28] sm:$0xff pattern:$0x73625140] }
  0x48   :  { %1218 = vmatpush.bf16.msra.mxu2 %v1899_v18  ;;  %v301_v18 = vld.sshfl [vmem:[#allocation1 + $0x30] sm:$0xff pattern:$0x73625140] }
  0x49   :  { %1231 = vmatpush.bf16.msra.mxu3 %v1907_v19  ;;  %v302_v19 = vld.sshfl [vmem:[#allocation1 + $0x38] sm:$0xff pattern:$0x73625140] }
  0x4a   :  { %1193 = vmatpush.bf16.msra.mxu0 %v1882_v20  ;;  %v1941_v20 = vld [vmem:[%s2366_s2] ss:$0 sm:$0xff] }
  0x4b   :  { %1206 = vmatpush.bf16.msra.mxu1 %v1890_v21 }
  0x4c   :  { %1219 = vmatpush.bf16.msra.mxu2 %v1898_v22 }
  0x4d   :  { %1232 = vmatpush.bf16.msra.mxu3 %v1906_v23 }
  0x4e   :  { %1194 = vmatpush.bf16.msra.mxu0 %v1881_v24 }
  0x4f   :  { %1207 = vmatpush.bf16.msra.mxu1 %v1889_v25 }
  0x50   :  { %1220 = vmatpush.bf16.msra.mxu2 %v1897_v26 }
  0x51   :  { %1233 = vmatpush.bf16.msra.mxu3 %v1905_v27 }
  0x52   :  { %1195 = vmatpush.bf16.msra.mxu0 %v1880_v28 }
  0x53   :  { %1208 = vmatpush.bf16.msra.mxu1 %v1888_v29 }
  0x54   :  { %1221 = vmatpush.bf16.msra.mxu2 %v1896_v30 }
  0x55   :  { %1234 = vmatpush.bf16.msra.mxu3 %v1904_v31 }
  0x56   :  { %1196 = vmatpush.bf16.msra.mxu0 %v1879_v32 }
  0x57   :  { %1209 = vmatpush.bf16.msra.mxu1 %v1887_v33 }
  0x58   :  { %1222 = vmatpush.bf16.msra.mxu2 %v1895_v34 }
  0x59   :  { %1235 = vmatpush.bf16.msra.mxu3 %v1903_v35 }
  0x5a   :  { %1197 = vmatpush.bf16.msra.mxu0 %v1878_v36 }
  0x5b   :  { %1210 = vmatpush.bf16.msra.mxu1 %v1886_v37 }
  0x5c   :  { %1223 = vmatpush.bf16.msra.mxu2 %v1894_v38 }
  0x5d   :  { %1236 = vmatpush.bf16.msra.mxu3 %v1902_v39 }
  0x5e   :  { %1198 = vmatpush.bf16.msra.mxu0 %v1877_v40 }
  0x5f   :  { %1211 = vmatpush.bf16.msra.mxu1 %v1885_v41 }
  0x60   :  { %1224 = vmatpush.bf16.msra.mxu2 %v1893_v42 }
  0x61   :  { %1237 = vmatpush.bf16.msra.mxu3 %v1901_v43  ;;  %1199 = vmatmul.bf16.vlgmr.msra.gmra.mxu0 %v295_v48 }
  0x62   :  { %1243 = vmatpush.bf16.msrb.mxu0 %v1916_v44  ;;  %1212 = vmatmul.bf16.vlgmr.msra.gmra.mxu1 %v296_v50 }
  0x63   :  { %1256 = vmatpush.bf16.msrb.mxu1 %v1924_v45  ;;  %1225 = vmatmul.bf16.vlgmr.msra.gmra.mxu2 %v297_v49 }
  0x64   :  { %1269 = vmatpush.bf16.msrb.mxu2 %v1932_v46  ;;  %1238 = vmatmul.bf16.vlgmr.msra.gmra.mxu3 %v298_v51 }
  0x65   :  { %1282 = vmatpush.bf16.msrb.mxu3 %v1940_v47 }
  0x66   :  { %1244 = vmatpush.bf16.msrb.mxu0 %v1915_v52 }
  0x67   :  { %1257 = vmatpush.bf16.msrb.mxu1 %v1923_v53 }
  0x68   :  { %1270 = vmatpush.bf16.msrb.mxu2 %v1931_v54 }
  0x69   :  { %1283 = vmatpush.bf16.msrb.mxu3 %v1939_v55 }
  0x6a   :  { %1245 = vmatpush.bf16.msrb.mxu0 %v1914_v56 }
  0x6b   :  { %1258 = vmatpush.bf16.msrb.mxu1 %v1922_v57 }
  0x6c   :  { %1271 = vmatpush.bf16.msrb.mxu2 %v1930_v58 }
  0x6d   :  { %1284 = vmatpush.bf16.msrb.mxu3 %v1938_v59 }
  0x6e   :  { %1246 = vmatpush.bf16.msrb.mxu0 %v1913_v60 }
  0x6f   :  { %1259 = vmatpush.bf16.msrb.mxu1 %v1921_v61 }
  0x70   :  { %1272 = vmatpush.bf16.msrb.mxu2 %v1929_v62 }
  0x71   :  { %1285 = vmatpush.bf16.msrb.mxu3 %v1937_v63 }
  0x72   :  { %1247 = vmatpush.bf16.msrb.mxu0 %v1912_v0 }
  0x73   :  { %1260 = vmatpush.bf16.msrb.mxu1 %v1920_v1 }
  0x74   :  { %1273 = vmatpush.bf16.msrb.mxu2 %v1928_v2 }
  0x75   :  { %1286 = vmatpush.bf16.msrb.mxu3 %v1936_v3 }
  0x76   :  { %1248 = vmatpush.bf16.msrb.mxu0 %v1911_v4 }
  0x77   :  { %1261 = vmatpush.bf16.msrb.mxu1 %v1919_v5 }
  0x78   :  { %1274 = vmatpush.bf16.msrb.mxu2 %v1927_v6 }
  0x79   :  { %1287 = vmatpush.bf16.msrb.mxu3 %v1935_v7 }
  0x7a   :  { %1249 = vmatpush.bf16.msrb.mxu0 %v1910_v8 }
  0x7b   :  { %1262 = vmatpush.bf16.msrb.mxu1 %v1918_v9 }
  0x7c   :  { %1275 = vmatpush.bf16.msrb.mxu2 %v1926_v10 }
  0x7d   :  { %1288 = vmatpush.bf16.msrb.mxu3 %v1934_v11 }
  0x7e   :  { %1250 = vmatpush.bf16.msrb.mxu0 %v1909_v12 }
  0x7f   :  { %1263 = vmatpush.bf16.msrb.mxu1 %v1917_v13 }
  0x80   :  { %1276 = vmatpush.bf16.msrb.mxu2 %v1925_v14 }
  0x81   :  { %1289 = vmatpush.bf16.msrb.mxu3 %v1933_v15  ;;  %1251 = vmatmul.bf16.vlgmr.msrb.gmra.mxu0 %v299_v16 }
  0x82   :  { %1264 = vmatmul.bf16.vlgmr.msrb.gmra.mxu1 %v300_v17 }
  0x83   :  { %1277 = vmatmul.bf16.vlgmr.msrb.gmra.mxu2 %v301_v18 }
  0x84   :  { %1290 = vmatmul.bf16.vlgmr.msrb.gmra.mxu3 %v302_v19 }
  0x9e   :  { %v1096_v21 = vpop.f32.mrf.mxu0 }
  0x9f   :  { %v1097_v22 = vadd.f32 %v1941_v20, %v1096_v21  ;;  %v1109_v23 = vpop.f32.mrf.mxu1 }
  0xa1   :  { %v1110_v24 = vadd.f32 %v1109_v23, %v1097_v22 }
  0xa6   :  { %v1122_v25 = vpop.f32.mrf.mxu2  ;;  %v1098_v28 = vpop.f32.mrf.mxu0 }
  0xa7   :  { %v1123_v26 = vadd.f32 %v1122_v25, %v1110_v24  ;;  %v1135_v27 = vpop.f32.mrf.mxu3  ;;  %v1111_v30 = vpop.f32.mrf.mxu1 }
  0xa9   :  { %v1136_v29 = vadd.f32 %v1135_v27, %v1123_v26 }
  0xae   :  { %v1124_v31 = vpop.f32.mrf.mxu2 }
  0xaf   :  { %v1137_v32 = vpop.f32.mrf.mxu3 }
  0xbe   :  { %v1148_v33 = vpop.f32.mrf.mxu0 }
  0xbf   :  { %v1161_v34 = vpop.f32.mrf.mxu1  ;;  %v1149_v43 = vadd.f32 %v1148_v33, %v1136_v29 }
  0xc1   :  { %v1162_v47 = vadd.f32 %v1161_v34, %v1149_v43 }
  0xc6   :  { %v1174_v35 = vpop.f32.mrf.mxu2  ;;  %v1150_v37 = vpop.f32.mrf.mxu0 }
  0xc7   :  { %v1187_v36 = vpop.f32.mrf.mxu3  ;;  %v1163_v38 = vpop.f32.mrf.mxu1  ;;  %v1175_v49 = vadd.f32 %v1174_v35, %v1162_v47 }
  0xc9   :  { %v1188_v52 = vadd.f32 %v1187_v36, %v1175_v49 }
  0xce   :  { %v1176_v39 = vpop.f32.mrf.mxu2 }
  0xcf   :  { %v1189_v40 = vpop.f32.mrf.mxu3 }
  0xde   :  { %v1200_v41 = vpop.f32.mrf.mxu0 }
  0xdf   :  { %v1213_v42 = vpop.f32.mrf.mxu1  ;;  %v1201_v53 = vadd.f32 %v1200_v41, %v1188_v52 }
  0xe1   :  { %v1214_v54 = vadd.f32 %v1213_v42, %v1201_v53 }
  0xe6   :  { %v1226_v44 = vpop.f32.mrf.mxu2  ;;  %v1202_v46 = vpop.f32.mrf.mxu0 }
  0xe7   :  { %v1239_v45 = vpop.f32.mrf.mxu3  ;;  %v1215_v48 = vpop.f32.mrf.mxu1  ;;  %v1227_v55 = vadd.f32 %v1226_v44, %v1214_v54 }
  0xe9   :  { %v1240_v56 = vadd.f32 %v1239_v45, %v1227_v55 }
  0xee   :  { %v1228_v50 = vpop.f32.mrf.mxu2 }
  0xef   :  { %v1241_v51 = vpop.f32.mrf.mxu3 }
  0xfe   :  { %v1252_v57 = vpop.f32.mrf.mxu0 }
  0xff   :  { %v1265_v58 = vpop.f32.mrf.mxu1  ;;  %v1253_v59 = vadd.f32 %v1252_v57, %v1240_v56 }
 0x101   :  { %v1266_v60 = vadd.f32 %v1265_v58, %v1253_v59 }
 0x106   :  { %v1278_v61 = vpop.f32.mrf.mxu2  ;;  %v1254_v0 = vpop.f32.mrf.mxu0 }
 0x107   :  { %v1291_v62 = vpop.f32.mrf.mxu3  ;;  %v1279_v63 = vadd.f32 %v1278_v61, %v1266_v60  ;;  %v1267_v1 = vpop.f32.mrf.mxu1 }
 0x109   :  { %v1292_v2 = vadd.f32 %v1291_v62, %v1279_v63 }
 0x10b   :  { %1296 = vst.msk [vmem:[%s2367_s3] sm:$0xf] %vm1295_vm0, %v1292_v2 }
 0x10e   :  { %v1280_v3 = vpop.f32.mrf.mxu2 }
 0x10f   :  { %v1293_v4 = vpop.f32.mrf.mxu3 }

// kernel: siamese_forward.2
= control target key start
LH: loop header
LB: loop body
LE: loop exit
PB: predicated region body
PF: predicated region fallthrough
CT: control target
= control target key end

     0   :  { %s4967_s12 = smov 0   ;;  %s6387_s0 = inlined_call_operand.vmem [shape: f32[2,2,18,18,4], index: 0, kind: input, shape index: {}]   ;;  %s6388_s1 = inlined_call_operand.vmem [shape: bf16[9,4,8], index: 1, kind: input, shape index: {}]   ;;  %s6389_s2 = inlined_call_operand.vmem [shape: f32[1,8], index: 2, kind: input, shape index: {}]   ;;  %s6390_s3 = inlined_call_operand.vmem [shape: bf16[2,512,8], index: 3, kind: output, shape index: {}]  }
   0x1 LB: > { %s4233_s13 = sadd.s32 4294967295, %s4945_s12   ;;  %p4237_p0 = scmp.ge.s32.totalorder %s4945_s12, 1  ;;  %s4945_s12 = sphi %s4967_s12, %s13_s12  }
   0x2   : > { %p137_p1 = scmp.lt.s32.totalorder %s4945_s12, 3 }
   0x4   : > { %p138_p2 = pnand %p4237_p0, %p137_p1 }
   0x6   : > { %141 = sbr.rel (%p138_p2) target bundleno = 1310 (0x51e), region = 32 }
   0xb   : > { %v4241_v0 = vld [vmem:[%s6388_s1 + $0x2] sm:$0x3]  ;;  %vm464_vm0 = vcmask 1041408   ;;  %p161_p3 = scmp.lt.s32.totalorder %s4233_s13, 1  ;;  %v4306_v2 = vld [vmem:[%s6388_s1 + $0x4] sm:$0x3] }
   0xc   : > { %v466_v1 = vsel %vm464_vm0, %v4241_v0, 0  ;;  %v4403_v3 = vld [vmem:[%s6388_s1 + $0x6] sm:$0x3]  ;;  %v1100_v4 = vsel %vm464_vm0, %v4306_v2, 0  ;;  %v268_v6 = vld [vmem:[%s6388_s1] sm:$0x3] }
   0xd   : > { %4924 = vmatpush.bf16.msra.mxu1 %v466_v1  ;;  %4925 = vmatpush.bf16.msra.mxu2 %v466_v1  ;;  %s6490_s13 = smov (!%p161_p3, %s4233_s13), 1  ;;  %v1531_v5 = vsel %vm464_vm0, %v4403_v3, 0  ;;  %v734_v7 = vsel %vm464_vm0, %v268_v6, 0  ;;  %v4500_v8 = vld [vmem:[%s6388_s1 + $0x8] sm:$0x3]  ;;  %vm367_vm1 = vcmask 31744  }
   0xe   : > { %4926 = vmatpush.bf16.msra.mxu3 %v466_v1  ;;  %475 = vmatpush.bf16.msra.mxu0 %v466_v1  ;;  %s4927_s24 = smul.u32 864, %s6490_s13  ;;  %v1961_v9 = vsel %vm464_vm0, %v4500_v8, 0  ;;  %s4923_s11 = sshll.u32 %s6490_s13, 8  ;;  %vm4113_vm2 = vcmask 60416  }
   0xf   : > { %s5899_s16 = scalar_lea.vmem %s6390_s3, %s4923_s11 }
  0x10   : > { %s5001_s27 = scalar_lea.vmem %s6387_s0, %s4927_s24 }
  0x11   : > { %1109 = vmatpush.bf16.msrb.mxu2 %v1100_v4  ;;  %743 = vmatpush.bf16.msrb.mxu1 %v734_v7  ;;  %v285_v10 = vld [vmem:[%s5001_s27 + $0xc1] sm:$0xff]  ;;  %v286_v11 = vld [vmem:[%s5001_s27 + $0xc9] sm:$0xff]  ;;  %v301_v12 = vld [vmem:[%s5001_s27 + $0x1b1] sm:$0xff] }
  0x12   : > { %1540 = vmatpush.bf16.msrb.mxu3 %v1531_v5  ;;  %1970 = vmatpush.bf16.msrb.mxu0 %v1961_v9  ;;  %v5006_v13 = vpack.c.bf16 %v286_v11, %v285_v10  ;;  %v302_v14 = vld [vmem:[%s5001_s27 + $0x1b9] sm:$0xff]  ;;  %v317_v15 = vld [vmem:[%s5001_s27 + $0x271] sm:$0xff]  ;;  %v269_v19 = vld [vmem:[%s5001_s27 + $0x1] sm:$0xff] }
  0x13   : > { %v318_v16 = vld [vmem:[%s5001_s27 + $0x279] sm:$0xff]  ;;  %v349_v17 = vpack.c.bf16 %v302_v14, %v301_v12  ;;  %v270_v20 = vld [vmem:[%s5001_s27 + $0x9] sm:$0xff]  ;;  %v288_v23 = vld [vmem:[%s5001_s27 + $0xe1] sm:$0xff] }
  0x14   : > { %v357_v18 = vpack.c.bf16 %v318_v16, %v317_v15  ;;  %4250 = vmatmul.msk.bf16.vlgmr.msra.gmra.mxu1 %vm367_vm1, %v5006_v13  ;;  %v333_v21 = vpack.c.bf16 %v270_v20, %v269_v19  ;;  %v287_v22 = vld [vmem:[%s5001_s27 + $0xd9] sm:$0xff]  ;;  %v303_v24 = vld [vmem:[%s5001_s27 + $0x1c9] sm:$0xff]  ;;  %v304_v25 = vld [vmem:[%s5001_s27 + $0x1d1] sm:$0xff] }
  0x15   : > { %4258 = vmatmul.msk.bf16.vlgmr.msra.gmra.mxu2 %vm367_vm1, %v349_v17  ;;  %v319_v26 = vld [vmem:[%s5001_s27 + $0x289] sm:$0xff]  ;;  %v320_v27 = vld [vmem:[%s5001_s27 + $0x291] sm:$0xff]  ;;  %v271_v28 = vld [vmem:[%s5001_s27 + $0x19] sm:$0xff]  ;;  %v5026_v30 = vpack.c.bf16 %v288_v23, %v287_v22  ;;  %v350_v31 = vpack.c.bf16 %v304_v25, %v303_v24 }
  0x16   : > { %4266 = vmatmul.msk.bf16.vlgmr.msra.gmra.mxu3 %vm367_vm1, %v357_v18  ;;  %4242 = vmatmul.msk.bf16.vlgmr.msra.gmra.mxu0 %vm367_vm1, %v333_v21  ;;  %v272_v29 = vld [vmem:[%s5001_s27 + $0x21] sm:$0xff]  ;;  %v358_v32 = vpack.c.bf16 %v320_v27, %v319_v26  ;;  %v289_v34 = vld [vmem:[%s5001_s27 + $0xf1] sm:$0xff]  ;;  %v290_v35 = vld [vmem:[%s5001_s27 + $0xf9] sm:$0xff] }
  0x17   : > { %v5028_v33 = vpack.c.bf16 %v272_v29, %v271_v28  ;;  %v305_v36 = vld [vmem:[%s5001_s27 + $0x1e1] sm:$0xff]  ;;  %v306_v37 = vld [vmem:[%s5001_s27 + $0x1e9] sm:$0xff]  ;;  %v273_v40 = vld [vmem:[%s5001_s27 + $0x31] sm:$0xff]  ;;  %v5044_v42 = vpack.c.bf16 %v290_v35, %v289_v34 }
  0x18   : > { %v321_v38 = vld [vmem:[%s5001_s27 + $0x2a1] sm:$0xff]  ;;  %v322_v39 = vld [vmem:[%s5001_s27 + $0x2a9] sm:$0xff]  ;;  %v274_v41 = vld [vmem:[%s5001_s27 + $0x39] sm:$0xff]  ;;  %v351_v43 = vpack.c.bf16 %v306_v37, %v305_v36 }
  0x19   : > { %v359_v44 = vpack.c.bf16 %v322_v39, %v321_v38  ;;  %v5046_v45 = vpack.c.bf16 %v274_v41, %v273_v40  ;;  %v291_v46 = vld [vmem:[%s5001_s27 + $0x109] sm:$0xff]  ;;  %v292_v47 = vld [vmem:[%s5001_s27 + $0x111] sm:$0xff]  ;;  %v307_v48 = vld [vmem:[%s5001_s27 + $0x1f9] sm:$0xff] }
  0x1a   : > { %v308_v49 = vld [vmem:[%s5001_s27 + $0x201] sm:$0xff]  ;;  %v323_v50 = vld [vmem:[%s5001_s27 + $0x2b9] sm:$0xff]  ;;  %v275_v52 = vld [vmem:[%s5001_s27 + $0x49] sm:$0xff]  ;;  %v5062_v54 = vpack.c.bf16 %v292_v47, %v291_v46 }
  0x1b   : > { %v324_v51 = vld [vmem:[%s5001_s27 + $0x2c1] sm:$0xff]  ;;  %v276_v53 = vld [vmem:[%s5001_s27 + $0x51] sm:$0xff]  ;;  %v352_v55 = vpack.c.bf16 %v308_v49, %v307_v48  ;;  %v294_v59 = vld [vmem:[%s5001_s27 + $0x129] sm:$0xff] }
  0x1c   : > { %v360_v56 = vpack.c.bf16 %v324_v51, %v323_v50  ;;  %v5064_v57 = vpack.c.bf16 %v276_v53, %v275_v52  ;;  %v293_v58 = vld [vmem:[%s5001_s27 + $0x121] sm:$0xff]  ;;  %v309_v60 = vld [vmem:[%s5001_s27 + $0x211] sm:$0xff]  ;;  %v310_v61 = vld [vmem:[%s5001_s27 + $0x219] sm:$0xff] }
  0x1d   : > { %v325_v62 = vld [vmem:[%s5001_s27 + $0x2d1] sm:$0xff]  ;;  %v326_v63 = vld [vmem:[%s5001_s27 + $0x2d9] sm:$0xff]  ;;  %v277_v0 = vld [vmem:[%s5001_s27 + $0x61] sm:$0xff]  ;;  %v5080_v2 = vpack.c.bf16 %v294_v59, %v293_v58  ;;  %v353_v3 = vpack.c.bf16 %v310_v61, %v309_v60 }
  0x1e   : > { %v278_v1 = vld [vmem:[%s5001_s27 + $0x69] sm:$0xff]  ;;  %v361_v4 = vpack.c.bf16 %v326_v63, %v325_v62  ;;  %v295_v6 = vld [vmem:[%s5001_s27 + $0x139] sm:$0xff]  ;;  %v296_v7 = vld [vmem:[%s5001_s27 + $0x141] sm:$0xff] }
  0x1f   : > { %v5082_v5 = vpack.c.bf16 %v278_v1, %v277_v0  ;;  %v311_v8 = vld [vmem:[%s5001_s27 + $0x229] sm:$0xff]  ;;  %v312_v9 = vld [vmem:[%s5001_s27 + $0x231] sm:$0xff]  ;;  %v279_v12 = vld [vmem:[%s5001_s27 + $0x79] sm:$0xff]  ;;  %v5098_v15 = vpack.c.bf16 %v296_v7, %v295_v6 }
  0x20   : > { %v327_v10 = vld [vmem:[%s5001_s27 + $0x2e9] sm:$0xff]  ;;  %v328_v11 = vld [vmem:[%s5001_s27 + $0x2f1] sm:$0xff]  ;;  %v280_v14 = vld [vmem:[%s5001_s27 + $0x81] sm:$0xff]  ;;  %v354_v16 = vpack.c.bf16 %v312_v9, %v311_v8 }
  0x21   : > { %v362_v17 = vpack.c.bf16 %v328_v11, %v327_v10  ;;  %v5100_v18 = vpack.c.bf16 %v280_v14, %v279_v12  ;;  %v297_v19 = vld [vmem:[%s5001_s27 + $0x151] sm:$0xff]  ;;  %v298_v20 = vld [vmem:[%s5001_s27 + $0x159] sm:$0xff]  ;;  %v313_v21 = vld [vmem:[%s5001_s27 + $0x241] sm:$0xff] }
  0x22   : > { %v314_v22 = vld [vmem:[%s5001_s27 + $0x249] sm:$0xff]  ;;  %v329_v23 = vld [vmem:[%s5001_s27 + $0x301] sm:$0xff]  ;;  %v281_v25 = vld [vmem:[%s5001_s27 + $0x91] sm:$0xff]  ;;  %v5116_v27 = vpack.c.bf16 %v298_v20, %v297_v19 }
  0x23   : > { %v330_v24 = vld [vmem:[%s5001_s27 + $0x309] sm:$0xff]  ;;  %v282_v26 = vld [vmem:[%s5001_s27 + $0x99] sm:$0xff]  ;;  %v355_v28 = vpack.c.bf16 %v314_v22, %v313_v21  ;;  %v316_v46 = vld [vmem:[%s5001_s27 + $0x261] sm:$0xff] }
  0x24   : > { %4251 = vmatmul.msk.bf16.gmra.mxu1 %vm367_vm1, %v5026_v30  ;;  %v363_v29 = vpack.c.bf16 %v330_v24, %v329_v23  ;;  %v4791_v35 = vld [vmem:[%s6388_s1 + $0xe] sm:$0x3]  ;;  %v4597_v37 = vld [vmem:[%s6388_s1 + $0xa] sm:$0x3]  ;;  %v4888_v39 = vld [vmem:[%s6388_s1 + $0x10] sm:$0x3] }
  0x25   : > { %4259 = vmatmul.msk.bf16.gmra.mxu2 %vm367_vm1, %v350_v31  ;;  %v5118_v31 = vpack.c.bf16 %v282_v26, %v281_v25  ;;  %v3252_v36 = vsel %vm464_vm0, %v4791_v35, 0  ;;  %v2391_v38 = vsel %vm464_vm0, %v4597_v37, 0  ;;  %v3682_v40 = vsel %vm464_vm0, %v4888_v39, 0  ;;  %v299_v41 = vld [vmem:[%s5001_s27 + $0x169] sm:$0xff]  ;;  %v331_v47 = vld [vmem:[%s5001_s27 + $0x319] sm:$0xff]  ;;  %v332_v48 = vld [vmem:[%s5001_s27 + $0x321] sm:$0xff] }
  0x26   : > { %4267 = vmatmul.msk.bf16.gmra.mxu3 %vm367_vm1, %v358_v32  ;;  %4243 = vmatmul.msk.bf16.gmra.mxu0 %vm367_vm1, %v5028_v33  ;;  %v4694_v32 = vld [vmem:[%s6388_s1 + $0xc] sm:$0x3]  ;;  %v284_v50 = vld [vmem:[%s5001_s27 + $0xb1] sm:$0xff]  ;;  %v364_v53 = vpack.c.bf16 %v332_v48, %v331_v47  ;;  %v905_v59 = vld [vmem:[%s5001_s27 + $0x2] sm:$0xff] }
  0x27   : > { %v2822_v34 = vsel %vm464_vm0, %v4694_v32, 0  ;;  %3261 = vmatpush.bf16.msra.mxu3 %v3252_v36  ;;  %2400 = vmatpush.bf16.msra.mxu1 %v2391_v38  ;;  %v283_v49 = vld [vmem:[%s5001_s27 + $0xa9] sm:$0xff]  ;;  %v4339_v61 = vld [vmem:[%s5001_s27 + $0x18] sm:$0xff]  ;;  %v4340_v62 = vld [vmem:[%s5001_s27 + $0x20] sm:$0xff] }
  0x28   : > { %2831 = vmatpush.bf16.msra.mxu2 %v2822_v34  ;;  %3691 = vmatpush.bf16.msra.mxu0 %v3682_v40  ;;  %v173_v58 = vld [vmem:[%s5001_s27 + $0x8] sm:$0xff]  ;;  %v907_v10 = vld [vmem:[%s5001_s27 + $0x1a] sm:$0xff]  ;;  %v4341_v12 = vld [vmem:[%s5001_s27 + $0x30] sm:$0xff] }
  0x29   : > { %v906_v60 = vld [vmem:[%s5001_s27 + $0xa] sm:$0xff]  ;;  %v908_v11 = vld [vmem:[%s5001_s27 + $0x22] sm:$0xff]  ;;  %v4342_v14 = vld [vmem:[%s5001_s27 + $0x38] sm:$0xff] }
  0x2a   : > { %v969_v1 = vpack.c.bf16 %v906_v60, %v905_v59  ;;  %v970_v19 = vpack.c.bf16 %v908_v11, %v907_v10  ;;  %v1401_v20 = vpack.c.bf16 %v4342_v14, %v4341_v12  ;;  %v909_v26 = vld [vmem:[%s5001_s27 + $0x32] sm:$0xff]  ;;  %v4345_v47 = vld [vmem:[%s5001_s27 + $0x60] sm:$0xff]  ;;  %v4346_v48 = vld [vmem:[%s5001_s27 + $0x68] sm:$0xff] }
  0x2b   : > { %v4344_v32 = vld [vmem:[%s5001_s27 + $0x50] sm:$0xff] }
  0x34   : > { %4252 = vmatmul.msk.bf16.gmra.mxu1 %vm367_vm1, %v5044_v42 }
  0x35   : > { %4260 = vmatmul.msk.bf16.gmra.mxu2 %vm367_vm1, %v351_v43  ;;  %v300_v43 = vld [vmem:[%s5001_s27 + $0x171] sm:$0xff] }
  0x36   : > { %4268 = vmatmul.msk.bf16.gmra.mxu3 %vm367_vm1, %v359_v44  ;;  %4244 = vmatmul.msk.bf16.gmra.mxu0 %vm367_vm1, %v5046_v45  ;;  %v315_v44 = vld [vmem:[%s5001_s27 + $0x259] sm:$0xff]  ;;  %v5150_v51 = vpack.c.bf16 %v300_v43, %v299_v41 }
  0x37   : > { %v356_v52 = vpack.c.bf16 %v316_v46, %v315_v44  ;;  %v911_v44 = vld [vmem:[%s5001_s27 + $0x4a] sm:$0xff]  ;;  %v912_v46 = vld [vmem:[%s5001_s27 + $0x52] sm:$0xff] }
  0x44   : > { %4253 = vmatmul.msk.bf16.gmra.mxu1 %vm367_vm1, %v5062_v54 }
  0x45   : > { %4261 = vmatmul.msk.bf16.gmra.mxu2 %vm367_vm1, %v352_v55  ;;  %v5152_v55 = vpack.c.bf16 %v284_v50, %v283_v49 }
  0x46   : > { %4269 = vmatmul.msk.bf16.gmra.mxu3 %vm367_vm1, %v360_v56  ;;  %4245 = vmatmul.msk.bf16.gmra.mxu0 %vm367_vm1, %v5064_v57  ;;  %v172_v56 = vld [vmem:[%s5001_s27] sm:$0xff] }
  0x47   : > { %v236_v63 = vpack.c.bf16 %v173_v58, %v172_v56 }
  0x54   : > { %4254 = vmatmul.msk.bf16.gmra.mxu1 %vm367_vm1, %v5080_v2 }
  0x55   : > { %4262 = vmatmul.msk.bf16.gmra.mxu2 %vm367_vm1, %v353_v3  ;;  %v1400_v3 = vpack.c.bf16 %v4340_v62, %v4339_v61  ;;  %v913_v62 = vld [vmem:[%s5001_s27 + $0x62] sm:$0xff] }
  0x56   : > { %4270 = vmatmul.msk.bf16.gmra.mxu3 %vm367_vm1, %v361_v4  ;;  %4246 = vmatmul.msk.bf16.gmra.mxu0 %vm367_vm1, %v5082_v5 }
  0x64   : > { %4255 = vmatmul.msk.bf16.gmra.mxu1 %vm367_vm1, %v5098_v15 }
  0x65   : > { %4263 = vmatmul.msk.bf16.gmra.mxu2 %vm367_vm1, %v354_v16 }
  0x66   : > { %4271 = vmatmul.msk.bf16.gmra.mxu3 %vm367_vm1, %v362_v17  ;;  %4247 = vmatmul.msk.bf16.gmra.mxu0 %vm367_vm1, %v5100_v18 }
  0x74   : > { %4256 = vmatmul.msk.bf16.gmra.mxu1 %vm367_vm1, %v5116_v27 }
  0x75   : > { %4264 = vmatmul.msk.bf16.gmra.mxu2 %vm367_vm1, %v355_v28  ;;  %v910_v28 = vld [vmem:[%s5001_s27 + $0x3a] sm:$0xff] }
  0x76   : > { %4272 = vmatmul.msk.bf16.gmra.mxu3 %vm367_vm1, %v363_v29  ;;  %4248 = vmatmul.msk.bf16.gmra.mxu0 %vm367_vm1, %v5118_v31  ;;  %v4343_v29 = vld [vmem:[%s5001_s27 + $0x48] sm:$0xff]  ;;  %v971_v36 = vpack.c.bf16 %v910_v28, %v909_v26 }
  0x77   : > { %v1402_v37 = vpack.c.bf16 %v4344_v32, %v4343_v29  ;;  %v915_v32 = vld [vmem:[%s5001_s27 + $0x7a] sm:$0xff] }
  0x84   : > { %4257 = vmatmul.msk.bf16.gmra.mxu1 %vm367_vm1, %v5150_v51 }
  0x85   : > { %4265 = vmatmul.msk.bf16.gmra.mxu2 %vm367_vm1, %v356_v52  ;;  %v972_v52 = vpack.c.bf16 %v912_v46, %v911_v44  ;;  %v4350_v44 = vld [vmem:[%s5001_s27 + $0x98] sm:$0xff] }
  0x86   : > { %4273 = vmatmul.msk.bf16.gmra.mxu3 %vm367_vm1, %v364_v53  ;;  %4249 = vmatmul.msk.bf16.gmra.mxu0 %vm367_vm1, %v5152_v55  ;;  %v1403_v53 = vpack.c.bf16 %v4346_v48, %v4345_v47 }
  0x91   : > { %v5166_v0 = vpop.f32.mrf.mxu1 }
  0x93   : > { %v5168_v4 = vpop.f32.mrf.mxu0 }
  0x94   : > { %4274 = vmatmul.msk.bf16.vlgmr.msrb.gmra.mxu1 %vm367_vm1, %v236_v63  ;;  %v914_v63 = vld [vmem:[%s5001_s27 + $0x6a] sm:$0xff] }
  0x95   : > { %4307 = vmatmul.msk.bf16.vlgmr.msrb.gmra.mxu2 %vm367_vm1, %v969_v1  ;;  %v4347_v1 = vld [vmem:[%s5001_s27 + $0x78] sm:$0xff]  ;;  %v973_v12 = vpack.c.bf16 %v914_v63, %v913_v62 }
  0x96   : > { %4404 = vmatmul.msk.bf16.vlgmr.msrb.gmra.mxu3 %vm367_vm1, %v1400_v3  ;;  %4501 = vmatmul.msk.bf16.vlgmr.msrb.gmra.mxu0 %vm367_vm1, %v5028_v33 }
  0x98   : > { %v5175_v6 = vpop.f32.mrf.mxu2 }
  0x99   : > { %v5177_v7 = vpop.f32.mrf.mxu3  ;;  %v5179_v8 = vpop.f32.mrf.mxu1 }
  0x9a   : > { %6391 = vst [vmem:[#allocation2_spill] sm:$0xff] %v5177_v7 }
  0x9b   : > { %v5181_v9 = vpop.f32.mrf.mxu0 }
  0xa0   : > { %v5187_v16 = vpop.f32.mrf.mxu2 }
  0xa1   : > { %v5189_v17 = vpop.f32.mrf.mxu3  ;;  %v5191_v33 = vpop.f32.mrf.mxu1 }
  0xa2   : > { %6392 = vst [vmem:[#allocation3_spill] sm:$0xff] %v5189_v17 }
  0xa3   : > { %v5193_v21 = vpop.f32.mrf.mxu0 }
  0xa4   : > { %4275 = vmatmul.msk.bf16.gmra.mxu1 %vm367_vm1, %v1400_v3  ;;  %v4348_v3 = vld [vmem:[%s5001_s27 + $0x80] sm:$0xff] }
  0xa5   : > { %4308 = vmatmul.msk.bf16.gmra.mxu2 %vm367_vm1, %v970_v19  ;;  %v1404_v14 = vpack.c.bf16 %v4348_v3, %v4347_v1 }
  0xa6   : > { %4405 = vmatmul.msk.bf16.gmra.mxu3 %vm367_vm1, %v1401_v20  ;;  %4502 = vmatmul.msk.bf16.gmra.mxu0 %vm367_vm1, %v5046_v45 }
  0xa8   : > { %v5200_v22 = vpop.f32.mrf.mxu2 }
  0xa9   : > { %v5202_v23 = vpop.f32.mrf.mxu3  ;;  %v5204_v24 = vpop.f32.mrf.mxu1 }
  0xaa   : > { %6393 = vst [vmem:[#allocation4_spill] sm:$0xff] %v5202_v23 }
  0xab   : > { %v5206_v25 = vpop.f32.mrf.mxu0 }
  0xb0   : > { %v5212_v34 = vpop.f32.mrf.mxu2 }
  0xb1   : > { %v5214_v35 = vpop.f32.mrf.mxu3  ;;  %v5216_v45 = vpop.f32.mrf.mxu1 }
  0xb2   : > { %6394 = vst [vmem:[#allocation5_spill] sm:$0xff] %v5214_v35 }
  0xb3   : > { %v5218_v38 = vpop.f32.mrf.mxu0 }
  0xb4   : > { %4276 = vmatmul.msk.bf16.gmra.mxu1 %vm367_vm1, %v1401_v20 }
  0xb5   : > { %4309 = vmatmul.msk.bf16.gmra.mxu2 %vm367_vm1, %v971_v36  ;;  %v916_v36 = vld [vmem:[%s5001_s27 + $0x82] sm:$0xff] }
  0xb6   : > { %4406 = vmatmul.msk.bf16.gmra.mxu3 %vm367_vm1, %v1402_v37  ;;  %4503 = vmatmul.msk.bf16.gmra.mxu0 %vm367_vm1, %v5064_v57  ;;  %v974_v48 = vpack.c.bf16 %v916_v36, %v915_v32  ;;  %v918_v32 = vld [vmem:[%s5001_s27 + $0x9a] sm:$0xff]  ;;  %v4351_v36 = vld [vmem:[%s5001_s27 + $0xa8] sm:$0xff] }
  0xb8   : > { %v5225_v39 = vpop.f32.mrf.mxu2 }
  0xb9   : > { %v5227_v40 = vpop.f32.mrf.mxu3  ;;  %v5229_v41 = vpop.f32.mrf.mxu1 }
  0xba   : > { %6395 = vst [vmem:[#allocation6_spill] sm:$0xff] %v5227_v40 }
  0xbb   : > { %v5231_v43 = vpop.f32.mrf.mxu0 }
  0xc0   : > { %v5237_v49 = vpop.f32.mrf.mxu2 }
  0xc1   : > { %6396 = vst [vmem:[#allocation7_spill] sm:$0xff] %v5237_v49  ;;  %v5239_v50 = vpop.f32.mrf.mxu3  ;;  %v5241_v57 = vpop.f32.mrf.mxu1 }
  0xc2   : > { %6397 = vst [vmem:[#allocation8_spill] sm:$0xff] %v5239_v50 }
  0xc3   : > { %v5243_v56 = vpop.f32.mrf.mxu0 }
  0xc4   : > { %4277 = vmatmul.msk.bf16.gmra.mxu1 %vm367_vm1, %v1402_v37  ;;  %v4349_v37 = vld [vmem:[%s5001_s27 + $0x90] sm:$0xff] }
  0xc5   : > { %4310 = vmatmul.msk.bf16.gmra.mxu2 %vm367_vm1, %v972_v52  ;;  %v1405_v52 = vpack.c.bf16 %v4350_v44, %v4349_v37 }
  0xc6   : > { %4407 = vmatmul.msk.bf16.gmra.mxu3 %vm367_vm1, %v1403_v53  ;;  %4504 = vmatmul.msk.bf16.gmra.mxu0 %vm367_vm1, %v5082_v5 }
  0xc8   : > { %v5250_v58 = vpop.f32.mrf.mxu2 }
  0xc9   : > { %6398 = vst [vmem:[#allocation9_spill] sm:$0xff] %v5250_v58  ;;  %v5252_v59 = vpop.f32.mrf.mxu3  ;;  %v5254_v60 = vpop.f32.mrf.mxu1 }
  0xca   : > { %6399 = vst [vmem:[#allocation10_spill] sm:$0xff] %v5252_v59 }
  0xcb   : > { %v5256_v61 = vpop.f32.mrf.mxu0 }
  0xd0   : > { %v5262_v10 = vpop.f32.mrf.mxu2 }
  0xd1   : > { %6400 = vst [vmem:[#allocation11_spill] sm:$0xff] %v5262_v10  ;;  %v5264_v11 = vpop.f32.mrf.mxu3  ;;  %v5266_v5 = vpop.f32.mrf.mxu1 }
  0xd2   : > { %6401 = vst [vmem:[#allocation12_spill] sm:$0xff] %v5264_v11 }
  0xd3   : > { %v5268_v19 = vpop.f32.mrf.mxu0 }
  0xd4   : > { %4278 = vmatmul.msk.bf16.gmra.mxu1 %vm367_vm1, %v1403_v53 }
  0xd5   : > { %4311 = vmatmul.msk.bf16.gmra.mxu2 %vm367_vm1, %v973_v12  ;;  %v917_v12 = vld [vmem:[%s5001_s27 + $0x92] sm:$0xff] }
  0xd6   : > { %4408 = vmatmul.msk.bf16.gmra.mxu3 %vm367_vm1, %v1404_v14  ;;  %4505 = vmatmul.msk.bf16.gmra.mxu0 %vm367_vm1, %v5100_v18 }
  0xd8   : > { %v5275_v20 = vpop.f32.mrf.mxu2 }
  0xd9   : > { %6402 = vst [vmem:[#allocation13_spill] sm:$0xff] %v5275_v20  ;;  %v5277_v26 = vpop.f32.mrf.mxu3  ;;  %v5279_v28 = vpop.f32.mrf.mxu1 }
  0xda   : > { %6403 = vst [vmem:[#allocation14_spill] sm:$0xff] %v5277_v26 }
  0xdb   : > { %v5281_v29 = vpop.f32.mrf.mxu0 }
  0xe0   : > { %v5287_v46 = vpop.f32.mrf.mxu2 }
  0xe1   : > { %6404 = vst [vmem:[#allocation15_spill] sm:$0xff] %v5287_v46  ;;  %v5289_v47 = vpop.f32.mrf.mxu3  ;;  %v5291_v18 = vpop.f32.mrf.mxu1  ;;  %v4358_v46 = vld [vmem:[%s5001_s27 + $0xf8] sm:$0xff] }
  0xe2   : > { %6405 = vst [vmem:[#allocation16_spill] sm:$0xff] %v5289_v47 }
  0xe3   : > { %v5293_v53 = vpop.f32.mrf.mxu0 }
  0xe4   : > { %4279 = vmatmul.msk.bf16.gmra.mxu1 %vm367_vm1, %v1404_v14  ;;  %v4352_v14 = vld [vmem:[%s5001_s27 + $0xb0] sm:$0xff] }
  0xe5   : > { %4312 = vmatmul.msk.bf16.gmra.mxu2 %vm367_vm1, %v974_v48  ;;  %v975_v48 = vpack.c.bf16 %v918_v32, %v917_v12  ;;  %v919_v12 = vld [vmem:[%s5001_s27 + $0xaa] sm:$0xff]  ;;  %v920_v32 = vld [vmem:[%s5001_s27 + $0xb2] sm:$0xff] }
  0xe6   : > { %4409 = vmatmul.msk.bf16.gmra.mxu3 %vm367_vm1, %v1405_v52  ;;  %4506 = vmatmul.msk.bf16.gmra.mxu0 %vm367_vm1, %v5118_v31  ;;  %v976_v50 = vpack.c.bf16 %v920_v32, %v919_v12  ;;  %v921_v12 = vld [vmem:[%s5001_s27 + $0xc2] sm:$0xff]  ;;  %v922_v32 = vld [vmem:[%s5001_s27 + $0xca] sm:$0xff] }
  0xe8   : > { %v5300_v62 = vpop.f32.mrf.mxu2 }
  0xe9   : > { %6406 = vst [vmem:[#allocation17_spill] sm:$0xff] %v5300_v62  ;;  %v5302_v63 = vpop.f32.mrf.mxu3  ;;  %v5304_v1 = vpop.f32.mrf.mxu1  ;;  %v924_v62 = vld [vmem:[%s5001_s27 + $0xe2] sm:$0xff] }
  0xea   : > { %6407 = vst [vmem:[#allocation18_spill] sm:$0xff] %v5302_v63  ;;  %v1406_v63 = vpack.c.bf16 %v4352_v14, %v4351_v36  ;;  %v4353_v36 = vld [vmem:[%s5001_s27 + $0xc0] sm:$0xff] }
  0xeb   : > { %v5306_v3 = vpop.f32.mrf.mxu0 }
  0xf0   : > { %v5312_v37 = vpop.f32.mrf.mxu2 }
  0xf1   : > { %6408 = vst [vmem:[#allocation19_spill] sm:$0xff] %v5312_v37  ;;  %v5314_v44 = vpop.f32.mrf.mxu3  ;;  %v5316_v31 = vpop.f32.mrf.mxu1 }
  0xf2   : > { %6409 = vst [vmem:[#allocation20_spill] sm:$0xff] %v5314_v44 }
  0xf3   : > { %v5318_v47 = vpop.f32.mrf.mxu0 }
  0xf4   : > { %4280 = vmatmul.msk.bf16.gmra.mxu1 %vm367_vm1, %v1405_v52  ;;  %v4354_v52 = vld [vmem:[%s5001_s27 + $0xc8] sm:$0xff] }
  0xf5   : > { %4313 = vmatmul.msk.bf16.gmra.mxu2 %vm367_vm1, %v975_v48 }
  0xf6   : > { %4410 = vmatmul.msk.bf16.gmra.mxu3 %vm367_vm1, %v1406_v63  ;;  %4507 = vmatmul.msk.bf16.gmra.mxu0 %vm367_vm1, %v5152_v55 }
  0xf8   : > { %v5325_v26 = vpop.f32.mrf.mxu2 }
  0xf9   : > { %6410 = vst [vmem:[#allocation21_spill] sm:$0xff] %v5325_v26  ;;  %v5327_v11 = vpop.f32.mrf.mxu3  ;;  %v5329_v44 = vpop.f32.mrf.mxu1 }
  0xfa   : > { %6411 = vst [vmem:[#allocation22_spill] sm:$0xff] %v5327_v11  ;;  %v1407_v11 = vpack.c.bf16 %v4354_v52, %v4353_v36  ;;  %v4355_v36 = vld [vmem:[%s5001_s27 + $0xd8] sm:$0xff]  ;;  %v4356_v52 = vld [vmem:[%s5001_s27 + $0xe0] sm:$0xff] }
  0xfb   : > { %v5331_v59 = vpop.f32.mrf.mxu0 }
 0x100   : > { %v5337_v14 = vpop.f32.mrf.mxu2 }
 0x101   : > { %6412 = vst [vmem:[#allocation23_spill] sm:$0xff] %v5337_v14  ;;  %v5339_v48 = vpop.f32.mrf.mxu3  ;;  %v5341_v55 = vpop.f32.mrf.mxu1  ;;  %v977_v14 = vpack.c.bf16 %v922_v32, %v921_v12 }
 0x102   : > { %6413 = vst [vmem:[#allocation24_spill] sm:$0xff] %v5339_v48 }
 0x103   : > { %v5343_v40 = vpop.f32.mrf.mxu0 }
 0x104   : > { %4281 = vmatmul.msk.bf16.gmra.mxu1 %vm367_vm1, %v1406_v63 }
 0x105   : > { %4314 = vmatmul.msk.bf16.gmra.mxu2 %vm367_vm1, %v976_v50 }
 0x106   : > { %4411 = vmatmul.msk.bf16.gmra.mxu3 %vm367_vm1, %v1407_v11  ;;  %4508 = vmatmul.msk.bf16.gmra.mxu0 %vm367_vm1, %v5006_v13  ;;  %v1408_v13 = vpack.c.bf16 %v4356_v52, %v4355_v36  ;;  %v923_v52 = vld [vmem:[%s5001_s27 + $0xda] sm:$0xff] }
 0x107   : > { %v978_v49 = vpack.c.bf16 %v924_v62, %v923_v52 }
 0x108   : > { %v5350_v35 = vpop.f32.mrf.mxu2 }
 0x109   : > { %6414 = vst [vmem:[#allocation25_spill] sm:$0xff] %v5350_v35  ;;  %v5352_v23 = vpop.f32.mrf.mxu3  ;;  %v5354_v48 = vpop.f32.mrf.mxu1 }
 0x10a   : > { %6415 = vst [vmem:[#allocation26_spill] sm:$0xff] %v5352_v23 }
 0x10b   : > { %v5356_v17 = vpop.f32.mrf.mxu0 }
 0x110   : > { %v5362_v63 = vpop.f32.mrf.mxu2 }
 0x111   : > { %6416 = vst [vmem:[#allocation27_spill] sm:$0xff] %v5362_v63  ;;  %v5364_v50 = vpop.f32.mrf.mxu3  ;;  %v745_v7 = vpop.f32.mrf.mxu1 }
 0x112   : > { %6417 = vst [vmem:[#allocation28_spill] sm:$0xff] %v5364_v50  ;;  %v746_v23 = vadd.f32 %v745_v7, %v5168_v4 }
 0x113   : > { %v1972_v35 = vpop.f32.mrf.mxu0 }
 0x114   : > { %4282 = vmatmul.msk.bf16.gmra.mxu1 %vm367_vm1, %v1407_v11  ;;  %v4357_v11 = vld [vmem:[%s5001_s27 + $0xf0] sm:$0xff] }
 0x115   : > { %4315 = vmatmul.msk.bf16.gmra.mxu2 %vm367_vm1, %v977_v14  ;;  %v1409_v4 = vpack.c.bf16 %v4358_v46, %v4357_v11 }
 0x116   : > { %4412 = vmatmul.msk.bf16.gmra.mxu3 %vm367_vm1, %v1408_v13  ;;  %4509 = vmatmul.msk.bf16.gmra.mxu0 %vm367_vm1, %v5026_v30 }
 0x118   : > { %v1111_v50 = vpop.f32.mrf.mxu2 }
 0x119   : > { %v1542_v63 = vpop.f32.mrf.mxu3  ;;  %v1271_v26 = vadd.f32 %v1111_v50, %v746_v23  ;;  %v747_v12 = vpop.f32.mrf.mxu1 }
 0x11a   : > { %v748_v14 = vadd.f32 %v747_v12, %v5181_v9  ;;  %v4360_v12 = vld [vmem:[%s5001_s27 + $0x110] sm:$0xff] }
 0x11b   : > { %v1702_v32 = vadd.f32 %v1542_v63, %v1271_v26  ;;  %v1974_v36 = vpop.f32.mrf.mxu0  ;;  %v925_v63 = vld [vmem:[%s5001_s27 + $0xf2] sm:$0xff] }
 0x11d   : > { %v5373_v37 = vadd.f32 %v1972_v35, %v1702_v32 }
 0x120   : > { %v1113_v20 = vpop.f32.mrf.mxu2 }
 0x121   : > { %v1544_v10 = vpop.f32.mrf.mxu3  ;;  %v1272_v58 = vadd.f32 %v1113_v20, %v748_v14  ;;  %v750_v30 = vpop.f32.mrf.mxu1 }
 0x122   : > { %v751_v9 = vadd.f32 %v750_v30, %v5193_v21 }
 0x123   : > { %v1703_v7 = vadd.f32 %v1544_v10, %v1272_v58  ;;  %v1977_v23 = vpop.f32.mrf.mxu0 }
 0x124   : > { %4283 = vmatmul.msk.bf16.gmra.mxu1 %vm367_vm1, %v1408_v13  ;;  %v926_v13 = vld [vmem:[%s5001_s27 + $0xfa] sm:$0xff] }
 0x125   : > { %4316 = vmatmul.msk.bf16.gmra.mxu2 %vm367_vm1, %v978_v49  ;;  %v5382_v35 = vadd.f32 %v1974_v36, %v1703_v7  ;;  %v4359_v49 = vld [vmem:[%s5001_s27 + $0x108] sm:$0xff]  ;;  %v979_v14 = vpack.c.bf16 %v926_v13, %v925_v63  ;;  %v928_v13 = vld [vmem:[%s5001_s27 + $0x112] sm:$0xff] }
 0x126   : > { %4413 = vmatmul.msk.bf16.gmra.mxu3 %vm367_vm1, %v1409_v4  ;;  %4510 = vmatmul.msk.bf16.gmra.mxu0 %vm367_vm1, %v5044_v42  ;;  %v1410_v21 = vpack.c.bf16 %v4360_v12, %v4359_v49  ;;  %v927_v63 = vld [vmem:[%s5001_s27 + $0x10a] sm:$0xff]  ;;  %v4361_v49 = vld [vmem:[%s5001_s27 + $0x120] sm:$0xff] }
 0x127   : > { %v4362_v12 = vld [vmem:[%s5001_s27 + $0x128] sm:$0xff] }
 0x128   : > { %v1116_v20 = vpop.f32.mrf.mxu2 }
 0x129   : > { %v1547_v26 = vpop.f32.mrf.mxu3  ;;  %v1273_v58 = vadd.f32 %v1116_v20, %v751_v9  ;;  %v752_v10 = vpop.f32.mrf.mxu1 }
 0x12a   : > { %v753_v32 = vadd.f32 %v752_v10, %v5206_v25 }
 0x12b   : > { %v1704_v46 = vadd.f32 %v1547_v26, %v1273_v58  ;;  %v1979_v62 = vpop.f32.mrf.mxu0 }
 0x12d   : > { %v5388_v50 = vadd.f32 %v1977_v23, %v1704_v46 }
 0x130   : > { %v1118_v36 = vpop.f32.mrf.mxu2 }
 0x131   : > { %v1549_v52 = vpop.f32.mrf.mxu3  ;;  %v1274_v11 = vadd.f32 %v1118_v36, %v753_v32  ;;  %v755_v42 = vpop.f32.mrf.mxu1 }
 0x132   : > { %v756_v25 = vadd.f32 %v755_v42, %v5218_v38  ;;  %v1411_v38 = vpack.c.bf16 %v4362_v12, %v4361_v49  ;;  %v4364_v49 = vld [vmem:[%s5001_s27 + $0x140] sm:$0xff] }
 0x133   : > { %v1705_v30 = vadd.f32 %v1549_v52, %v1274_v11  ;;  %v1982_v7 = vpop.f32.mrf.mxu0  ;;  %v980_v11 = vpack.c.bf16 %v928_v13, %v927_v63  ;;  %v930_v63 = vld [vmem:[%s5001_s27 + $0x12a] sm:$0xff]  ;;  %v4363_v13 = vld [vmem:[%s5001_s27 + $0x138] sm:$0xff] }
 0x134   : > { %4284 = vmatmul.msk.bf16.gmra.mxu1 %vm367_vm1, %v1409_v4 }
 0x135   : > { %4317 = vmatmul.msk.bf16.gmra.mxu2 %vm367_vm1, %v979_v14  ;;  %v5397_v23 = vadd.f32 %v1979_v62, %v1705_v30 }
 0x136   : > { %4414 = vmatmul.msk.bf16.gmra.mxu3 %vm367_vm1, %v1410_v21  ;;  %4511 = vmatmul.msk.bf16.gmra.mxu0 %vm367_vm1, %v5062_v54 }
 0x138   : > { %v1121_v9 = vpop.f32.mrf.mxu2 }
 0x139   : > { %v1552_v20 = vpop.f32.mrf.mxu3  ;;  %v1275_v26 = vadd.f32 %v1121_v9, %v756_v25  ;;  %v757_v58 = vpop.f32.mrf.mxu1 }
 0x13a   : > { %v758_v62 = vadd.f32 %v757_v58, %v5231_v43 }
 0x13b   : > { %v1706_v10 = vadd.f32 %v1552_v20, %v1275_v26  ;;  %v1984_v46 = vpop.f32.mrf.mxu0 }
 0x13d   : > { %v5403_v4 = vadd.f32 %v1982_v7, %v1706_v10  ;;  %v929_v10 = vld [vmem:[%s5001_s27 + $0x122] sm:$0xff] }
 0x140   : > { %v1123_v32 = vpop.f32.mrf.mxu2 }
 0x141   : > { %v1554_v36 = vpop.f32.mrf.mxu3  ;;  %v1276_v52 = vadd.f32 %v1123_v32, %v758_v62  ;;  %v760_v54 = vpop.f32.mrf.mxu1 }
 0x142   : > { %v761_v43 = vadd.f32 %v760_v54, %v5243_v56  ;;  %v1412_v56 = vpack.c.bf16 %v4364_v49, %v4363_v13 }
 0x143   : > { %v1707_v42 = vadd.f32 %v1554_v36, %v1276_v52  ;;  %v1987_v14 = vpop.f32.mrf.mxu0  ;;  %v981_v36 = vpack.c.bf16 %v930_v63, %v929_v10  ;;  %v4365_v10 = vld [vmem:[%s5001_s27 + $0x150] sm:$0xff]  ;;  %v4366_v63 = vld [vmem:[%s5001_s27 + $0x158] sm:$0xff] }
 0x144   : > { %4285 = vmatmul.msk.bf16.gmra.mxu1 %vm367_vm1, %v1410_v21 }
 0x145   : > { %4318 = vmatmul.msk.bf16.gmra.mxu2 %vm367_vm1, %v980_v11  ;;  %v5412_v30 = vadd.f32 %v1984_v46, %v1707_v42 }
 0x146   : > { %4415 = vmatmul.msk.bf16.gmra.mxu3 %vm367_vm1, %v1411_v38  ;;  %4512 = vmatmul.msk.bf16.gmra.mxu0 %vm367_vm1, %v5080_v2 }
 0x148   : > { %v1126_v7 = vpop.f32.mrf.mxu2 }
 0x149   : > { %v1557_v25 = vpop.f32.mrf.mxu3  ;;  %v1277_v9 = vadd.f32 %v1126_v7, %v761_v43  ;;  %v762_v20 = vpop.f32.mrf.mxu1 }
 0x14a   : > { %v763_v46 = vadd.f32 %v762_v20, %v5256_v61  ;;  %v931_v20 = vld [vmem:[%s5001_s27 + $0x13a] sm:$0xff] }
 0x14b   : > { %v1708_v26 = vadd.f32 %v1557_v25, %v1277_v9  ;;  %v1989_v58 = vpop.f32.mrf.mxu0 }
 0x14d   : > { %v5418_v21 = vadd.f32 %v1987_v14, %v1708_v26  ;;  %v932_v26 = vld [vmem:[%s5001_s27 + $0x142] sm:$0xff] }
 0x150   : > { %v1128_v12 = vpop.f32.mrf.mxu2 }
 0x151   : > { %v1559_v62 = vpop.f32.mrf.mxu3  ;;  %v1278_v32 = vadd.f32 %v1128_v12, %v763_v46  ;;  %v765_v2 = vpop.f32.mrf.mxu1  ;;  %v982_v12 = vpack.c.bf16 %v932_v26, %v931_v20  ;;  %v4368_v20 = vld [vmem:[%s5001_s27 + $0x170] sm:$0xff] }
 0x152   : > { %v766_v61 = vadd.f32 %v765_v2, %v5268_v19  ;;  %v1413_v19 = vpack.c.bf16 %v4366_v63, %v4365_v10 }
 0x153   : > { %v1709_v52 = vadd.f32 %v1559_v62, %v1278_v32  ;;  %v1992_v54 = vpop.f32.mrf.mxu0 }
 0x154   : > { %4286 = vmatmul.msk.bf16.gmra.mxu1 %vm367_vm1, %v1411_v38 }
 0x155   : > { %4319 = vmatmul.msk.bf16.gmra.mxu2 %vm367_vm1, %v981_v36  ;;  %v5427_v11 = vadd.f32 %v1989_v58, %v1709_v52 }
 0x156   : > { %4416 = vmatmul.msk.bf16.gmra.mxu3 %vm367_vm1, %v1412_v56  ;;  %4513 = vmatmul.msk.bf16.gmra.mxu0 %vm367_vm1, %v5098_v15 }
 0x158   : > { %v1131_v42 = vpop.f32.mrf.mxu2 }
 0x159   : > { %v1562_v14 = vpop.f32.mrf.mxu3  ;;  %v1279_v43 = vadd.f32 %v1131_v42, %v766_v61  ;;  %v767_v7 = vpop.f32.mrf.mxu1 }
 0x15a   : > { %v768_v58 = vadd.f32 %v767_v7, %v5281_v29  ;;  %v934_v7 = vld [vmem:[%s5001_s27 + $0x15a] sm:$0xff] }
 0x15b   : > { %v1710_v25 = vadd.f32 %v1562_v14, %v1279_v43  ;;  %v1994_v9 = vpop.f32.mrf.mxu0  ;;  %v933_v43 = vld [vmem:[%s5001_s27 + $0x152] sm:$0xff] }
 0x15d   : > { %v5433_v38 = vadd.f32 %v1992_v54, %v1710_v25  ;;  %v4367_v25 = vld [vmem:[%s5001_s27 + $0x168] sm:$0xff] }
 0x160   : > { %v1133_v13 = vpop.f32.mrf.mxu2 }
 0x161   : > { %v1564_v49 = vpop.f32.mrf.mxu3  ;;  %v1280_v46 = vadd.f32 %v1133_v13, %v768_v58  ;;  %v770_v15 = vpop.f32.mrf.mxu1  ;;  %v983_v58 = vpack.c.bf16 %v934_v7, %v933_v43  ;;  %v4466_v43 = vld [vmem:[%s5001_s27 + $0x181] sm:$0xff]  ;;  %v4467_v7 = vld [vmem:[%s5001_s27 + $0x189] sm:$0xff] }
 0x162   : > { %v771_v29 = vadd.f32 %v770_v15, %v5293_v53  ;;  %v1414_v53 = vpack.c.bf16 %v4368_v20, %v4367_v25 }
 0x163   : > { %v1711_v62 = vadd.f32 %v1564_v49, %v1280_v46  ;;  %v1997_v32 = vpop.f32.mrf.mxu0 }
 0x164   : > { %4287 = vmatmul.msk.bf16.gmra.mxu1 %vm367_vm1, %v1412_v56 }
 0x165   : > { %4320 = vmatmul.msk.bf16.gmra.mxu2 %vm367_vm1, %v982_v12  ;;  %v5442_v2 = vadd.f32 %v1994_v9, %v1711_v62 }
 0x166   : > { %4417 = vmatmul.msk.bf16.gmra.mxu3 %vm367_vm1, %v1413_v19  ;;  %4514 = vmatmul.msk.bf16.gmra.mxu0 %vm367_vm1, %v5116_v27 }
 0x168   : > { %v1136_v36 = vpop.f32.mrf.mxu2 }
 0x169   : > { %v1567_v52 = vpop.f32.mrf.mxu3  ;;  %v1281_v54 = vadd.f32 %v1136_v36, %v771_v29  ;;  %v772_v61 = vpop.f32.mrf.mxu1  ;;  %v935_v36 = vld [vmem:[%s5001_s27 + $0x16a] sm:$0xff] }
 0x16a   : > { %v773_v9 = vadd.f32 %v772_v61, %v5306_v3  ;;  %v4369_v61 = vld [vmem:[%s5001_s27 + $0x180] sm:$0xff] }
 0x16b   : > { %v1712_v42 = vadd.f32 %v1567_v52, %v1281_v54  ;;  %v1999_v14 = vpop.f32.mrf.mxu0  ;;  %v936_v54 = vld [vmem:[%s5001_s27 + $0x172] sm:$0xff] }
 0x16d   : > { %v5448_v56 = vadd.f32 %v1997_v32, %v1712_v42  ;;  %v4370_v42 = vld [vmem:[%s5001_s27 + $0x188] sm:$0xff] }
 0x170   : > { %v1138_v26 = vpop.f32.mrf.mxu2 }
 0x171   : > { %v1569_v10 = vpop.f32.mrf.mxu3  ;;  %v1282_v63 = vadd.f32 %v1138_v26, %v773_v9  ;;  %v775_v27 = vpop.f32.mrf.mxu1  ;;  %v984_v9 = vpack.c.bf16 %v936_v54, %v935_v36  ;;  %v1415_v26 = vpack.c.bf16 %v4370_v42, %v4369_v61  ;;  %v938_v54 = vld [vmem:[%s5001_s27 + $0x1ba] sm:$0xff]  ;;  %v4372_v61 = vld [vmem:[%s5001_s27 + $0x1d0] sm:$0xff] }
 0x172   : > { %v776_v46 = vadd.f32 %v775_v27, %v5318_v47 }
 0x173   : > { %v1713_v13 = vadd.f32 %v1569_v10, %v1282_v63  ;;  %v2002_v49 = vpop.f32.mrf.mxu0  ;;  %v1845_v10 = vpack.c.bf16 %v4467_v7, %v4466_v43  ;;  %v4469_v43 = vld [vmem:[%s5001_s27 + $0x1d1] sm:$0xff] }
 0x174   : > { %4288 = vmatmul.msk.bf16.gmra.mxu1 %vm367_vm1, %v1413_v19 }
 0x175   : > { %4321 = vmatmul.msk.bf16.gmra.mxu2 %vm367_vm1, %v983_v58  ;;  %v5457_v3 = vadd.f32 %v1999_v14, %v1713_v13 }
 0x176   : > { %4418 = vmatmul.msk.bf16.gmra.mxu3 %vm367_vm1, %v1414_v53  ;;  %4515 = vmatmul.msk.bf16.gmra.mxu0 %vm367_vm1, %v5150_v51 }
 0x178   : > { %v1141_v15 = vpop.f32.mrf.mxu2 }
 0x179   : > { %v1572_v12 = vpop.f32.mrf.mxu3  ;;  %v1283_v62 = vadd.f32 %v1141_v15, %v776_v46  ;;  %v777_v32 = vpop.f32.mrf.mxu1 }
 0x17a   : > { %v778_v14 = vadd.f32 %v777_v32, %v5331_v59  ;;  %v205_v32 = vld [vmem:[%s5001_s27 + $0x1b8] sm:$0xff] }
 0x17b   : > { %v1714_v29 = vadd.f32 %v1572_v12, %v1283_v62  ;;  %v2004_v19 = vpop.f32.mrf.mxu0  ;;  %v204_v62 = vld [vmem:[%s5001_s27 + $0x1b0] sm:$0xff] }
 0x17d   : > { %v5463_v52 = vadd.f32 %v2002_v49, %v1714_v29  ;;  %v937_v29 = vld [vmem:[%s5001_s27 + $0x1b2] sm:$0xff] }
 0x180   : > { %v1143_v25 = vpop.f32.mrf.mxu2 }
 0x181   : > { %v1574_v51 = vpop.f32.mrf.mxu3  ;;  %v1284_v20 = vadd.f32 %v1143_v25, %v778_v14  ;;  %v780_v47 = vpop.f32.mrf.mxu1  ;;  %v4468_v14 = vld [vmem:[%s5001_s27 + $0x1c9] sm:$0xff]  ;;  %v252_v25 = vpack.c.bf16 %v205_v32, %v204_v62 }
 0x182   : > { %v781_v58 = vadd.f32 %v780_v47, %v5343_v40  ;;  %v985_v47 = vpack.c.bf16 %v938_v54, %v937_v29  ;;  %v939_v62 = vld [vmem:[%s5001_s27 + $0x1ca] sm:$0xff]  ;;  %v940_v29 = vld [vmem:[%s5001_s27 + $0x1d2] sm:$0xff]  ;;  %v4373_v54 = vld [vmem:[%s5001_s27 + $0x1e0] sm:$0xff] }
 0x183   : > { %v1715_v63 = vadd.f32 %v1574_v51, %v1284_v20  ;;  %v2007_v27 = vpop.f32.mrf.mxu0 }
 0x184   : > { %4289 = vmatmul.msk.bf16.gmra.mxu1 %vm367_vm1, %v1414_v53 }
 0x185   : > { %4322 = vmatmul.msk.bf16.gmra.mxu2 %vm367_vm1, %v984_v9  ;;  %v5474_v59 = vadd.f32 %v2004_v19, %v1715_v63  ;;  %v4371_v19 = vld [vmem:[%s5001_s27 + $0x1c8] sm:$0xff] }
 0x186   : > { %4419 = vmatmul.msk.bf16.gmra.mxu3 %vm367_vm1, %v1415_v26  ;;  %4516 = vmatmul.msk.bf16.gmra.mxu0 %vm367_vm1, %v1845_v10  ;;  %v1416_v9 = vpack.c.bf16 %v4372_v61, %v4371_v19  ;;  %v1846_v26 = vpack.c.bf16 %v4469_v43, %v4468_v14  ;;  %v4374_v19 = vld [vmem:[%s5001_s27 + $0x1e8] sm:$0xff] }
 0x187   : > { %v4470_v61 = vld [vmem:[%s5001_s27 + $0x1e1] sm:$0xff] }
 0x188   : > { %v1146_v13 = vpop.f32.mrf.mxu2 }
 0x189   : > { %v1577_v49 = vpop.f32.mrf.mxu3  ;;  %v1285_v46 = vadd.f32 %v1146_v13, %v781_v58  ;;  %v782_v15 = vpop.f32.mrf.mxu1 }
 0x18a   : > { %v783_v42 = vadd.f32 %v782_v15, %v5356_v17 }
 0x18b   : > { %v1716_v53 = vadd.f32 %v1577_v49, %v1285_v46  ;;  %v2009_v12 = vpop.f32.mrf.mxu0 }
 0x18d   : > { %v5481_v36 = vadd.f32 %v2007_v27, %v1716_v53 }
 0x190   : > { %v1148_v40 = vpop.f32.mrf.mxu2 }
 0x191   : > { %v1579_v7 = vpop.f32.mrf.mxu3  ;;  %v1286_v51 = vadd.f32 %v1148_v40, %v783_v42  ;;  %v785_v20 = vpop.f32.mrf.mxu1  ;;  %v4471_v42 = vld [vmem:[%s5001_s27 + $0x1e9] sm:$0xff] }
 0x192   : > { %v786_v27 = vadd.f32 %v785_v20, %v5166_v0 }
 0x193   : > { %v1717_v10 = vadd.f32 %v1579_v7, %v1286_v51  ;;  %v2012_v63 = vpop.f32.mrf.mxu0  ;;  %v986_v7 = vpack.c.bf16 %v940_v29, %v939_v62  ;;  %v1847_v51 = vpack.c.bf16 %v4471_v42, %v4470_v61  ;;  %v4375_v62 = vld [vmem:[%s5001_s27 + $0x1f8] sm:$0xff]  ;;  %v4376_v29 = vld [vmem:[%s5001_s27 + $0x200] sm:$0xff] }
 0x194   : > { %4290 = vmatmul.msk.bf16.gmra.mxu1 %vm367_vm1, %v252_v25  ;;  %v1417_v25 = vpack.c.bf16 %v4374_v19, %v4373_v54  ;;  %v4472_v54 = vld [vmem:[%s5001_s27 + $0x1f9] sm:$0xff]  ;;  %v4473_v19 = vld [vmem:[%s5001_s27 + $0x201] sm:$0xff] }
 0x195   : > { %4323 = vmatmul.msk.bf16.gmra.mxu2 %vm367_vm1, %v985_v47  ;;  %v5492_v17 = vadd.f32 %v2009_v12, %v1717_v10 }
 0x196   : > { %4420 = vmatmul.msk.bf16.gmra.mxu3 %vm367_vm1, %v1416_v9  ;;  %4517 = vmatmul.msk.bf16.gmra.mxu0 %vm367_vm1, %v1846_v26 }
 0x198   : > { %v1151_v58 = vpop.f32.mrf.mxu2 }
 0x199   : > { %v1582_v13 = vpop.f32.mrf.mxu3  ;;  %v1287_v49 = vadd.f32 %v1151_v58, %v786_v27  ;;  %v787_v46 = vpop.f32.mrf.mxu1 }
 0x19a   : > { %v788_v12 = vadd.f32 %v787_v46, %v5179_v8 }
 0x19b   : > { %v1718_v15 = vadd.f32 %v1582_v13, %v1287_v49  ;;  %v2014_v53 = vpop.f32.mrf.mxu0 }
 0x19d   : > { %v5497_v32 = vadd.f32 %v2012_v63, %v1718_v15  ;;  %v942_v15 = vld [vmem:[%s5001_s27 + $0x1ea] sm:$0xff] }
 0x1a0   : > { %v1153_v14 = vpop.f32.mrf.mxu2 }
 0x1a1   : > { %v1584_v43 = vpop.f32.mrf.mxu3  ;;  %v1288_v40 = vadd.f32 %v1153_v14, %v788_v12  ;;  %v790_v0 = vpop.f32.mrf.mxu1 }
 0x1a2   : > { %v791_v26 = vadd.f32 %v790_v0, %v5191_v33 }
 0x1a3   : > { %v1719_v20 = vadd.f32 %v1584_v43, %v1288_v40  ;;  %v2017_v47 = vpop.f32.mrf.mxu0  ;;  %v1418_v43 = vpack.c.bf16 %v4376_v29, %v4375_v62  ;;  %v1848_v40 = vpack.c.bf16 %v4473_v19, %v4472_v54  ;;  %v4474_v62 = vld [vmem:[%s5001_s27 + $0x211] sm:$0xff]  ;;  %v4475_v29 = vld [vmem:[%s5001_s27 + $0x219] sm:$0xff] }
 0x1a4   : > { %4291 = vmatmul.msk.bf16.gmra.mxu1 %vm367_vm1, %v1416_v9  ;;  %v941_v9 = vld [vmem:[%s5001_s27 + $0x1e2] sm:$0xff] }
 0x1a5   : > { %4324 = vmatmul.msk.bf16.gmra.mxu2 %vm367_vm1, %v986_v7  ;;  %v5508_v8 = vadd.f32 %v2014_v53, %v1719_v20  ;;  %v987_v14 = vpack.c.bf16 %v942_v15, %v941_v9  ;;  %v4377_v9 = vld [vmem:[%s5001_s27 + $0x210] sm:$0xff]  ;;  %v4378_v15 = vld [vmem:[%s5001_s27 + $0x218] sm:$0xff] }
 0x1a6   : > { %4421 = vmatmul.msk.bf16.gmra.mxu3 %vm367_vm1, %v1417_v25  ;;  %4518 = vmatmul.msk.bf16.gmra.mxu0 %vm367_vm1, %v1847_v51 }
 0x1a8   : > { %v1156_v10 = vpop.f32.mrf.mxu2 }
 0x1a9   : > { %v1587_v63 = vpop.f32.mrf.mxu3  ;;  %v1289_v27 = vadd.f32 %v1156_v10, %v791_v26  ;;  %v792_v58 = vpop.f32.mrf.mxu1 }
 0x1aa   : > { %v793_v53 = vadd.f32 %v792_v58, %v5204_v24 }
 0x1ab   : > { %v1720_v13 = vadd.f32 %v1587_v63, %v1289_v27  ;;  %v2019_v49 = vpop.f32.mrf.mxu0 }
 0x1ad   : > { %v5513_v46 = vadd.f32 %v2017_v47, %v1720_v13  ;;  %v944_v13 = vld [vmem:[%s5001_s27 + $0x202] sm:$0xff] }
 0x1b0   : > { %v1158_v12 = vpop.f32.mrf.mxu2 }
 0x1b1   : > { %v1589_v61 = vpop.f32.mrf.mxu3  ;;  %v1290_v42 = vadd.f32 %v1158_v12, %v793_v53  ;;  %v795_v33 = vpop.f32.mrf.mxu1 }
 0x1b2   : > { %v796_v51 = vadd.f32 %v795_v33, %v5216_v45 }
 0x1b3   : > { %v1721_v0 = vadd.f32 %v1589_v61, %v1290_v42  ;;  %v2022_v7 = vpop.f32.mrf.mxu0  ;;  %v1419_v61 = vpack.c.bf16 %v4378_v15, %v4377_v9  ;;  %v1849_v42 = vpack.c.bf16 %v4475_v29, %v4474_v62  ;;  %v4476_v9 = vld [vmem:[%s5001_s27 + $0x229] sm:$0xff]  ;;  %v4477_v15 = vld [vmem:[%s5001_s27 + $0x231] sm:$0xff] }
 0x1b4   : > { %4292 = vmatmul.msk.bf16.gmra.mxu1 %vm367_vm1, %v1417_v25  ;;  %v943_v25 = vld [vmem:[%s5001_s27 + $0x1fa] sm:$0xff] }
 0x1b5   : > { %4325 = vmatmul.msk.bf16.gmra.mxu2 %vm367_vm1, %v987_v14  ;;  %v5524_v24 = vadd.f32 %v2019_v49, %v1721_v0  ;;  %v988_v12 = vpack.c.bf16 %v944_v13, %v943_v25  ;;  %v4379_v25 = vld [vmem:[%s5001_s27 + $0x228] sm:$0xff]  ;;  %v4380_v13 = vld [vmem:[%s5001_s27 + $0x230] sm:$0xff] }
 0x1b6   : > { %4422 = vmatmul.msk.bf16.gmra.mxu3 %vm367_vm1, %v1418_v43  ;;  %4519 = vmatmul.msk.bf16.gmra.mxu0 %vm367_vm1, %v1848_v40 }
 0x1b8   : > { %v1161_v20 = vpop.f32.mrf.mxu2 }
 0x1b9   : > { %v1592_v47 = vpop.f32.mrf.mxu3  ;;  %v1291_v26 = vadd.f32 %v1161_v20, %v796_v51  ;;  %v797_v10 = vpop.f32.mrf.mxu1 }
 0x1ba   : > { %v798_v49 = vadd.f32 %v797_v10, %v5229_v41 }
 0x1bb   : > { %v1722_v63 = vadd.f32 %v1592_v47, %v1291_v26  ;;  %v2024_v27 = vpop.f32.mrf.mxu0 }
 0x1bd   : > { %v5529_v58 = vadd.f32 %v2022_v7, %v1722_v63  ;;  %v946_v63 = vld [vmem:[%s5001_s27 + $0x21a] sm:$0xff] }
 0x1c0   : > { %v1163_v53 = vpop.f32.mrf.mxu2 }
 0x1c1   : > { %v1594_v54 = vpop.f32.mrf.mxu3  ;;  %v1292_v19 = vadd.f32 %v1163_v53, %v798_v49  ;;  %v800_v45 = vpop.f32.mrf.mxu1 }
 0x1c2   : > { %v801_v40 = vadd.f32 %v800_v45, %v5241_v57 }
 0x1c3   : > { %v1723_v33 = vadd.f32 %v1594_v54, %v1292_v19  ;;  %v2027_v14 = vpop.f32.mrf.mxu0  ;;  %v1420_v54 = vpack.c.bf16 %v4380_v13, %v4379_v25  ;;  %v1850_v19 = vpack.c.bf16 %v4477_v15, %v4476_v9  ;;  %v4478_v25 = vld [vmem:[%s5001_s27 + $0x241] sm:$0xff]  ;;  %v4479_v13 = vld [vmem:[%s5001_s27 + $0x249] sm:$0xff] }
 0x1c4   : > { %4293 = vmatmul.msk.bf16.gmra.mxu1 %vm367_vm1, %v1418_v43  ;;  %v945_v43 = vld [vmem:[%s5001_s27 + $0x212] sm:$0xff] }
 0x1c5   : > { %4326 = vmatmul.msk.bf16.gmra.mxu2 %vm367_vm1, %v988_v12  ;;  %v5540_v41 = vadd.f32 %v2024_v27, %v1723_v33  ;;  %v989_v53 = vpack.c.bf16 %v946_v63, %v945_v43  ;;  %v4381_v43 = vld [vmem:[%s5001_s27 + $0x240] sm:$0xff]  ;;  %v4382_v63 = vld [vmem:[%s5001_s27 + $0x248] sm:$0xff] }
 0x1c6   : > { %4423 = vmatmul.msk.bf16.gmra.mxu3 %vm367_vm1, %v1419_v61  ;;  %4520 = vmatmul.msk.bf16.gmra.mxu0 %vm367_vm1, %v1849_v42 }
 0x1c8   : > { %v1166_v0 = vpop.f32.mrf.mxu2 }
 0x1c9   : > { %v1597_v7 = vpop.f32.mrf.mxu3  ;;  %v1293_v51 = vadd.f32 %v1166_v0, %v801_v40  ;;  %v802_v20 = vpop.f32.mrf.mxu1 }
 0x1ca   : > { %v803_v27 = vadd.f32 %v802_v20, %v5254_v60 }
 0x1cb   : > { %v1724_v47 = vadd.f32 %v1597_v7, %v1293_v51  ;;  %v2029_v26 = vpop.f32.mrf.mxu0 }
 0x1cd   : > { %v5545_v10 = vadd.f32 %v2027_v14, %v1724_v47  ;;  %v948_v47 = vld [vmem:[%s5001_s27 + $0x232] sm:$0xff] }
 0x1d0   : > { %v1168_v49 = vpop.f32.mrf.mxu2 }
 0x1d1   : > { %v1599_v62 = vpop.f32.mrf.mxu3  ;;  %v1294_v29 = vadd.f32 %v1168_v49, %v803_v27  ;;  %v805_v57 = vpop.f32.mrf.mxu1 }
 0x1d2   : > { %v806_v42 = vadd.f32 %v805_v57, %v5266_v5 }
 0x1d3   : > { %v1725_v45 = vadd.f32 %v1599_v62, %v1294_v29  ;;  %v2032_v12 = vpop.f32.mrf.mxu0  ;;  %v1421_v62 = vpack.c.bf16 %v4382_v63, %v4381_v43  ;;  %v1851_v29 = vpack.c.bf16 %v4479_v13, %v4478_v25  ;;  %v4480_v43 = vld [vmem:[%s5001_s27 + $0x259] sm:$0xff]  ;;  %v4481_v63 = vld [vmem:[%s5001_s27 + $0x261] sm:$0xff] }
 0x1d4   : > { %4294 = vmatmul.msk.bf16.gmra.mxu1 %vm367_vm1, %v1419_v61  ;;  %v947_v61 = vld [vmem:[%s5001_s27 + $0x22a] sm:$0xff] }
 0x1d5   : > { %4327 = vmatmul.msk.bf16.gmra.mxu2 %vm367_vm1, %v989_v53  ;;  %v5556_v60 = vadd.f32 %v2029_v26, %v1725_v45  ;;  %v990_v49 = vpack.c.bf16 %v948_v47, %v947_v61  ;;  %v4383_v61 = vld [vmem:[%s5001_s27 + $0x258] sm:$0xff]  ;;  %v4384_v47 = vld [vmem:[%s5001_s27 + $0x260] sm:$0xff] }
 0x1d6   : > { %4424 = vmatmul.msk.bf16.gmra.mxu3 %vm367_vm1, %v1420_v54  ;;  %4521 = vmatmul.msk.bf16.gmra.mxu0 %vm367_vm1, %v1850_v19 }
 0x1d8   : > { %v1171_v33 = vpop.f32.mrf.mxu2 }
 0x1d9   : > { %v1602_v14 = vpop.f32.mrf.mxu3  ;;  %v1295_v40 = vadd.f32 %v1171_v33, %v806_v42  ;;  %v807_v0 = vpop.f32.mrf.mxu1 }
 0x1da   : > { %v808_v26 = vadd.f32 %v807_v0, %v5279_v28 }
 0x1db   : > { %v1726_v7 = vadd.f32 %v1602_v14, %v1295_v40  ;;  %v2034_v51 = vpop.f32.mrf.mxu0 }
 0x1dd   : > { %v5561_v20 = vadd.f32 %v2032_v12, %v1726_v7  ;;  %v950_v7 = vld [vmem:[%s5001_s27 + $0x24a] sm:$0xff] }
 0x1e0   : > { %v1173_v27 = vpop.f32.mrf.mxu2 }
 0x1e1   : > { %v1604_v9 = vpop.f32.mrf.mxu3  ;;  %v1296_v15 = vadd.f32 %v1173_v27, %v808_v26  ;;  %v810_v5 = vpop.f32.mrf.mxu1 }
 0x1e2   : > { %v811_v19 = vadd.f32 %v810_v5, %v5291_v18 }
 0x1e3   : > { %v1727_v57 = vadd.f32 %v1604_v9, %v1296_v15  ;;  %v2037_v53 = vpop.f32.mrf.mxu0  ;;  %v1422_v9 = vpack.c.bf16 %v4384_v47, %v4383_v61  ;;  %v1852_v15 = vpack.c.bf16 %v4481_v63, %v4480_v43  ;;  %v4482_v61 = vld [vmem:[%s5001_s27 + $0x271] sm:$0xff]  ;;  %v4483_v47 = vld [vmem:[%s5001_s27 + $0x279] sm:$0xff] }
 0x1e4   : > { %4295 = vmatmul.msk.bf16.gmra.mxu1 %vm367_vm1, %v1420_v54  ;;  %v949_v54 = vld [vmem:[%s5001_s27 + $0x242] sm:$0xff] }
 0x1e5   : > { %4328 = vmatmul.msk.bf16.gmra.mxu2 %vm367_vm1, %v990_v49  ;;  %v5572_v28 = vadd.f32 %v2034_v51, %v1727_v57  ;;  %v991_v27 = vpack.c.bf16 %v950_v7, %v949_v54  ;;  %v4385_v54 = vld [vmem:[%s5001_s27 + $0x270] sm:$0xff]  ;;  %v4386_v7 = vld [vmem:[%s5001_s27 + $0x278] sm:$0xff] }
 0x1e6   : > { %4425 = vmatmul.msk.bf16.gmra.mxu3 %vm367_vm1, %v1421_v62  ;;  %4522 = vmatmul.msk.bf16.gmra.mxu0 %vm367_vm1, %v1851_v29 }
 0x1e8   : > { %v1176_v45 = vpop.f32.mrf.mxu2 }
 0x1e9   : > { %v1607_v12 = vpop.f32.mrf.mxu3  ;;  %v1297_v42 = vadd.f32 %v1176_v45, %v811_v19  ;;  %v812_v33 = vpop.f32.mrf.mxu1 }
 0x1ea   : > { %v813_v51 = vadd.f32 %v812_v33, %v5304_v1 }
 0x1eb   : > { %v1728_v14 = vadd.f32 %v1607_v12, %v1297_v42  ;;  %v2039_v40 = vpop.f32.mrf.mxu0 }
 0x1ed   : > { %v5577_v0 = vadd.f32 %v2037_v53, %v1728_v14  ;;  %v952_v14 = vld [vmem:[%s5001_s27 + $0x262] sm:$0xff] }
 0x1f0   : > { %v1178_v26 = vpop.f32.mrf.mxu2 }
 0x1f1   : > { %v1609_v25 = vpop.f32.mrf.mxu3  ;;  %v1298_v13 = vadd.f32 %v1178_v26, %v813_v51  ;;  %v815_v18 = vpop.f32.mrf.mxu1 }
 0x1f2   : > { %v816_v29 = vadd.f32 %v815_v18, %v5316_v31 }
 0x1f3   : > { %v1729_v5 = vadd.f32 %v1609_v25, %v1298_v13  ;;  %v2042_v49 = vpop.f32.mrf.mxu0  ;;  %v1423_v25 = vpack.c.bf16 %v4386_v7, %v4385_v54  ;;  %v1853_v13 = vpack.c.bf16 %v4483_v47, %v4482_v61  ;;  %v4484_v54 = vld [vmem:[%s5001_s27 + $0x289] sm:$0xff]  ;;  %v4485_v7 = vld [vmem:[%s5001_s27 + $0x291] sm:$0xff] }
 0x1f4   : > { %4296 = vmatmul.msk.bf16.gmra.mxu1 %vm367_vm1, %v1421_v62  ;;  %v951_v62 = vld [vmem:[%s5001_s27 + $0x25a] sm:$0xff] }
 0x1f5   : > { %4329 = vmatmul.msk.bf16.gmra.mxu2 %vm367_vm1, %v991_v27  ;;  %v5588_v1 = vadd.f32 %v2039_v40, %v1729_v5  ;;  %v992_v26 = vpack.c.bf16 %v952_v14, %v951_v62  ;;  %v4387_v62 = vld [vmem:[%s5001_s27 + $0x288] sm:$0xff]  ;;  %v4388_v14 = vld [vmem:[%s5001_s27 + $0x290] sm:$0xff] }
 0x1f6   : > { %4426 = vmatmul.msk.bf16.gmra.mxu3 %vm367_vm1, %v1422_v9  ;;  %4523 = vmatmul.msk.bf16.gmra.mxu0 %vm367_vm1, %v1852_v15 }
 0x1f8   : > { %v1181_v57 = vpop.f32.mrf.mxu2 }
 0x1f9   : > { %v1612_v53 = vpop.f32.mrf.mxu3  ;;  %v1299_v19 = vadd.f32 %v1181_v57, %v816_v29  ;;  %v817_v45 = vpop.f32.mrf.mxu1 }
 0x1fa   : > { %v818_v40 = vadd.f32 %v817_v45, %v5329_v44 }
 0x1fb   : > { %v1730_v12 = vadd.f32 %v1612_v53, %v1299_v19  ;;  %v2044_v42 = vpop.f32.mrf.mxu0 }
 0x1fd   : > { %v5593_v33 = vadd.f32 %v2042_v49, %v1730_v12  ;;  %v954_v12 = vld [vmem:[%s5001_s27 + $0x27a] sm:$0xff] }
 0x200   : > { %v1183_v51 = vpop.f32.mrf.mxu2 }
 0x201   : > { %v1614_v43 = vpop.f32.mrf.mxu3  ;;  %v1300_v63 = vadd.f32 %v1183_v51, %v818_v40  ;;  %v820_v31 = vpop.f32.mrf.mxu1 }
 0x202   : > { %v821_v15 = vadd.f32 %v820_v31, %v5341_v55 }
 0x203   : > { %v1731_v18 = vadd.f32 %v1614_v43, %v1300_v63  ;;  %v2047_v27 = vpop.f32.mrf.mxu0  ;;  %v1424_v43 = vpack.c.bf16 %v4388_v14, %v4387_v62  ;;  %v1854_v63 = vpack.c.bf16 %v4485_v7, %v4484_v54  ;;  %v4486_v62 = vld [vmem:[%s5001_s27 + $0x2a1] sm:$0xff]  ;;  %v4487_v14 = vld [vmem:[%s5001_s27 + $0x2a9] sm:$0xff] }
 0x204   : > { %4297 = vmatmul.msk.bf16.gmra.mxu1 %vm367_vm1, %v1422_v9  ;;  %v953_v9 = vld [vmem:[%s5001_s27 + $0x272] sm:$0xff] }
 0x205   : > { %4330 = vmatmul.msk.bf16.gmra.mxu2 %vm367_vm1, %v992_v26  ;;  %v5604_v44 = vadd.f32 %v2044_v42, %v1731_v18  ;;  %v993_v51 = vpack.c.bf16 %v954_v12, %v953_v9  ;;  %v4389_v9 = vld [vmem:[%s5001_s27 + $0x2a0] sm:$0xff]  ;;  %v4390_v12 = vld [vmem:[%s5001_s27 + $0x2a8] sm:$0xff] }
 0x206   : > { %4427 = vmatmul.msk.bf16.gmra.mxu3 %vm367_vm1, %v1423_v25  ;;  %4524 = vmatmul.msk.bf16.gmra.mxu0 %vm367_vm1, %v1853_v13 }
 0x208   : > { %v1186_v5 = vpop.f32.mrf.mxu2 }
 0x209   : > { %v1617_v49 = vpop.f32.mrf.mxu3  ;;  %v1301_v29 = vadd.f32 %v1186_v5, %v821_v15  ;;  %v822_v57 = vpop.f32.mrf.mxu1 }
 0x20a   : > { %v823_v42 = vadd.f32 %v822_v57, %v5354_v48 }
 0x20b   : > { %v1732_v53 = vadd.f32 %v1617_v49, %v1301_v29  ;;  %v2049_v19 = vpop.f32.mrf.mxu0 }
 0x20d   : > { %v5609_v45 = vadd.f32 %v2047_v27, %v1732_v53  ;;  %v956_v53 = vld [vmem:[%s5001_s27 + $0x292] sm:$0xff] }
 0x210   : > { %v1188_v40 = vpop.f32.mrf.mxu2 }
 0x211   : > { %v1619_v61 = vpop.f32.mrf.mxu3  ;;  %v1302_v47 = vadd.f32 %v1188_v40, %v823_v42  ;;  %v825_v55 = vpop.f32.mrf.mxu1 }
 0x212   : > { %v826_v13 = vadd.f32 %v825_v55, %v5175_v6 }
 0x213   : > { %v1733_v31 = vadd.f32 %v1619_v61, %v1302_v47  ;;  %v2052_v26 = vpop.f32.mrf.mxu0  ;;  %v1425_v61 = vpack.c.bf16 %v4390_v12, %v4389_v9  ;;  %v1855_v47 = vpack.c.bf16 %v4487_v14, %v4486_v62  ;;  %v4488_v9 = vld [vmem:[%s5001_s27 + $0x2b9] sm:$0xff]  ;;  %v4489_v12 = vld [vmem:[%s5001_s27 + $0x2c1] sm:$0xff] }
 0x214   : > { %4298 = vmatmul.msk.bf16.gmra.mxu1 %vm367_vm1, %v1423_v25  ;;  %v955_v25 = vld [vmem:[%s5001_s27 + $0x28a] sm:$0xff] }
 0x215   : > { %4331 = vmatmul.msk.bf16.gmra.mxu2 %vm367_vm1, %v993_v51  ;;  %v5620_v48 = vadd.f32 %v2049_v19, %v1733_v31  ;;  %v994_v40 = vpack.c.bf16 %v956_v53, %v955_v25  ;;  %v4391_v25 = vld [vmem:[%s5001_s27 + $0x2b8] sm:$0xff]  ;;  %v4392_v53 = vld [vmem:[%s5001_s27 + $0x2c0] sm:$0xff] }
 0x216   : > { %4428 = vmatmul.msk.bf16.gmra.mxu3 %vm367_vm1, %v1424_v43  ;;  %4525 = vmatmul.msk.bf16.gmra.mxu0 %vm367_vm1, %v1854_v63 }
 0x218   : > { %v1191_v18 = vpop.f32.mrf.mxu2 }
 0x219   : > { %v1622_v27 = vpop.f32.mrf.mxu3  ;;  %v1303_v15 = vadd.f32 %v1191_v18, %v826_v13  ;;  %v827_v5 = vpop.f32.mrf.mxu1 }
 0x21a   : > { %v828_v19 = vadd.f32 %v827_v5, %v5187_v16 }
 0x21b   : > { %v1734_v49 = vadd.f32 %v1622_v27, %v1303_v15  ;;  %v2054_v29 = vpop.f32.mrf.mxu0 }
 0x21d   : > { %v5625_v57 = vadd.f32 %v2052_v26, %v1734_v49  ;;  %v958_v49 = vld [vmem:[%s5001_s27 + $0x2aa] sm:$0xff] }
 0x220   : > { %v1193_v42 = vpop.f32.mrf.mxu2 }
 0x221   : > { %v1624_v54 = vpop.f32.mrf.mxu3  ;;  %v1304_v7 = vadd.f32 %v1193_v42, %v828_v19  ;;  %v830_v6 = vpop.f32.mrf.mxu1 }
 0x222   : > { %v831_v63 = vadd.f32 %v830_v6, %v5200_v22 }
 0x223   : > { %v1735_v55 = vadd.f32 %v1624_v54, %v1304_v7  ;;  %v2057_v51 = vpop.f32.mrf.mxu0  ;;  %v1426_v54 = vpack.c.bf16 %v4392_v53, %v4391_v25  ;;  %v1856_v7 = vpack.c.bf16 %v4489_v12, %v4488_v9  ;;  %v6418_v25 = vld [vmem:[#allocation7_spill] sm:$0xff]  ;;  %v4490_v53 = vld [vmem:[%s5001_s27 + $0x2d1] sm:$0xff] }
 0x224   : > { %4299 = vmatmul.msk.bf16.gmra.mxu1 %vm367_vm1, %v1424_v43  ;;  %v957_v43 = vld [vmem:[%s5001_s27 + $0x2a2] sm:$0xff] }
 0x225   : > { %4332 = vmatmul.msk.bf16.gmra.mxu2 %vm367_vm1, %v994_v40  ;;  %v5636_v16 = vadd.f32 %v2054_v29, %v1735_v55  ;;  %v995_v42 = vpack.c.bf16 %v958_v49, %v957_v43  ;;  %v4393_v43 = vld [vmem:[%s5001_s27 + $0x2d0] sm:$0xff]  ;;  %v4394_v49 = vld [vmem:[%s5001_s27 + $0x2d8] sm:$0xff] }
 0x226   : > { %4429 = vmatmul.msk.bf16.gmra.mxu3 %vm367_vm1, %v1425_v61  ;;  %4526 = vmatmul.msk.bf16.gmra.mxu0 %vm367_vm1, %v1855_v47 }
 0x228   : > { %v1196_v31 = vpop.f32.mrf.mxu2 }
 0x229   : > { %v1627_v26 = vpop.f32.mrf.mxu3  ;;  %v1305_v13 = vadd.f32 %v1196_v31, %v831_v63  ;;  %v832_v18 = vpop.f32.mrf.mxu1 }
 0x22a   : > { %v833_v29 = vadd.f32 %v832_v18, %v5212_v34 }
 0x22b   : > { %v1736_v27 = vadd.f32 %v1627_v26, %v1305_v13  ;;  %v2059_v15 = vpop.f32.mrf.mxu0 }
 0x22d   : > { %v5641_v5 = vadd.f32 %v2057_v51, %v1736_v27  ;;  %v960_v27 = vld [vmem:[%s5001_s27 + $0x2c2] sm:$0xff] }
 0x230   : > { %v1198_v19 = vpop.f32.mrf.mxu2 }
 0x231   : > { %v1629_v62 = vpop.f32.mrf.mxu3  ;;  %v1306_v14 = vadd.f32 %v1198_v19, %v833_v29  ;;  %v835_v22 = vpop.f32.mrf.mxu1  ;;  %v4491_v29 = vld [vmem:[%s5001_s27 + $0x2d9] sm:$0xff] }
 0x232   : > { %v836_v47 = vadd.f32 %v835_v22, %v5225_v39  ;;  %v1857_v22 = vpack.c.bf16 %v4491_v29, %v4490_v53  ;;  %v4492_v53 = vld [vmem:[%s5001_s27 + $0x2e9] sm:$0xff]  ;;  %v4493_v29 = vld [vmem:[%s5001_s27 + $0x2f1] sm:$0xff] }
 0x233   : > { %v1737_v6 = vadd.f32 %v1629_v62, %v1306_v14  ;;  %v2062_v40 = vpop.f32.mrf.mxu0  ;;  %v1427_v14 = vpack.c.bf16 %v4394_v49, %v4393_v43  ;;  %v962_v43 = vld [vmem:[%s5001_s27 + $0x2da] sm:$0xff]  ;;  %v4395_v49 = vld [vmem:[%s5001_s27 + $0x2e8] sm:$0xff] }
 0x234   : > { %4300 = vmatmul.msk.bf16.gmra.mxu1 %vm367_vm1, %v1425_v61  ;;  %v959_v61 = vld [vmem:[%s5001_s27 + $0x2ba] sm:$0xff] }
 0x235   : > { %4333 = vmatmul.msk.bf16.gmra.mxu2 %vm367_vm1, %v995_v42  ;;  %v5652_v34 = vadd.f32 %v2059_v15, %v1737_v6  ;;  %v996_v62 = vpack.c.bf16 %v960_v27, %v959_v61 }
 0x236   : > { %4430 = vmatmul.msk.bf16.gmra.mxu3 %vm367_vm1, %v1426_v54  ;;  %4527 = vmatmul.msk.bf16.gmra.mxu0 %vm367_vm1, %v1856_v7 }
 0x238   : > { %v1201_v55 = vpop.f32.mrf.mxu2 }
 0x239   : > { %v1632_v51 = vpop.f32.mrf.mxu3  ;;  %v1307_v63 = vadd.f32 %v1201_v55, %v836_v47  ;;  %v837_v31 = vpop.f32.mrf.mxu1 }
 0x23a   : > { %v838_v15 = vadd.f32 %v837_v31, %v6418_v25  ;;  %v4396_v25 = vld [vmem:[%s5001_s27 + $0x2f0] sm:$0xff] }
 0x23b   : > { %v1738_v26 = vadd.f32 %v1632_v51, %v1307_v63  ;;  %v2064_v13 = vpop.f32.mrf.mxu0 }
 0x23d   : > { %v5657_v18 = vadd.f32 %v2062_v40, %v1738_v26  ;;  %v6419_v40 = vld [vmem:[#allocation9_spill] sm:$0xff] }
 0x240   : > { %v1203_v9 = vpop.f32.mrf.mxu2 }
 0x241   : > { %v1634_v12 = vpop.f32.mrf.mxu3  ;;  %v1308_v19 = vadd.f32 %v1203_v9, %v838_v15  ;;  %v840_v39 = vpop.f32.mrf.mxu1  ;;  %v6420_v15 = vld [vmem:[#allocation11_spill] sm:$0xff] }
 0x242   : > { %v841_v47 = vadd.f32 %v840_v39, %v6419_v40 }
 0x243   : > { %v1739_v42 = vadd.f32 %v1634_v12, %v1308_v19  ;;  %v2067_v7 = vpop.f32.mrf.mxu0 }
 0x244   : > { %4301 = vmatmul.msk.bf16.gmra.mxu1 %vm367_vm1, %v1426_v54  ;;  %v961_v54 = vld [vmem:[%s5001_s27 + $0x2d2] sm:$0xff] }
 0x245   : > { %4334 = vmatmul.msk.bf16.gmra.mxu2 %vm367_vm1, %v996_v62  ;;  %v5668_v6 = vadd.f32 %v2064_v13, %v1739_v42  ;;  %v997_v62 = vpack.c.bf16 %v962_v43, %v961_v54  ;;  %v1858_v42 = vpack.c.bf16 %v4493_v29, %v4492_v53  ;;  %v4398_v53 = vld [vmem:[%s5001_s27 + $0x308] sm:$0xff] }
 0x246   : > { %4431 = vmatmul.msk.bf16.gmra.mxu3 %vm367_vm1, %v1427_v14  ;;  %4528 = vmatmul.msk.bf16.gmra.mxu0 %vm367_vm1, %v1857_v22  ;;  %v1428_v22 = vpack.c.bf16 %v4396_v25, %v4395_v49  ;;  %v6423_v29 = vld [vmem:[#allocation15_spill] sm:$0xff] }
 0x248   : > { %v1206_v55 = vpop.f32.mrf.mxu2 }
 0x249   : > { %v1637_v51 = vpop.f32.mrf.mxu3  ;;  %v1309_v63 = vadd.f32 %v1206_v55, %v841_v47  ;;  %v842_v31 = vpop.f32.mrf.mxu1  ;;  %v6421_v55 = vld [vmem:[#allocation13_spill] sm:$0xff] }
 0x24a   : > { %v843_v13 = vadd.f32 %v842_v31, %v6420_v15  ;;  %v964_v15 = vld [vmem:[%s5001_s27 + $0x2f2] sm:$0xff] }
 0x24b   : > { %v1740_v26 = vadd.f32 %v1637_v51, %v1309_v63  ;;  %v2069_v61 = vpop.f32.mrf.mxu0 }
 0x24d   : > { %v5673_v27 = vadd.f32 %v2067_v7, %v1740_v26 }
 0x250   : > { %v1208_v9 = vpop.f32.mrf.mxu2 }
 0x251   : > { %v1639_v12 = vpop.f32.mrf.mxu3  ;;  %v1310_v19 = vadd.f32 %v1208_v9, %v843_v13  ;;  %v845_v39 = vpop.f32.mrf.mxu1  ;;  %v4397_v13 = vld [vmem:[%s5001_s27 + $0x300] sm:$0xff] }
 0x252   : > { %v846_v51 = vadd.f32 %v845_v39, %v6421_v55  ;;  %v4494_v9 = vld [vmem:[%s5001_s27 + $0x301] sm:$0xff]  ;;  %v1429_v55 = vpack.c.bf16 %v4398_v53, %v4397_v13 }
 0x253   : > { %v1741_v40 = vadd.f32 %v1639_v12, %v1310_v19  ;;  %v2072_v47 = vpop.f32.mrf.mxu0  ;;  %v4495_v12 = vld [vmem:[%s5001_s27 + $0x309] sm:$0xff] }
 0x254   : > { %4302 = vmatmul.msk.bf16.gmra.mxu1 %vm367_vm1, %v1427_v14  ;;  %v963_v14 = vld [vmem:[%s5001_s27 + $0x2ea] sm:$0xff] }
 0x255   : > { %4335 = vmatmul.msk.bf16.gmra.mxu2 %vm367_vm1, %v997_v62  ;;  %v5684_v7 = vadd.f32 %v2069_v61, %v1741_v40  ;;  %v998_v40 = vpack.c.bf16 %v964_v15, %v963_v14 }
 0x256   : > { %4432 = vmatmul.msk.bf16.gmra.mxu3 %vm367_vm1, %v1428_v22  ;;  %4529 = vmatmul.msk.bf16.gmra.mxu0 %vm367_vm1, %v1858_v42 }
 0x258   : > { %v1211_v63 = vpop.f32.mrf.mxu2 }
 0x259   : > { %v1642_v31 = vpop.f32.mrf.mxu3  ;;  %v1311_v26 = vadd.f32 %v1211_v63, %v846_v51  ;;  %v847_v54 = vpop.f32.mrf.mxu1  ;;  %v1859_v51 = vpack.c.bf16 %v4495_v12, %v4494_v9  ;;  %v966_v9 = vld [vmem:[%s5001_s27 + $0x30a] sm:$0xff]  ;;  %v4399_v12 = vld [vmem:[%s5001_s27 + $0x318] sm:$0xff] }
 0x25a   : > { %v848_v61 = vadd.f32 %v847_v54, %v6423_v29 }
 0x25b   : > { %v1742_v43 = vadd.f32 %v1642_v31, %v1311_v26  ;;  %v2074_v49 = vpop.f32.mrf.mxu0  ;;  %v6425_v26 = vld [vmem:[#allocation17_spill] sm:$0xff] }
 0x25d   : > { %v5689_v25 = vadd.f32 %v2072_v47, %v1742_v43 }
 0x25f   : > { %6422 = vst [vmem:[#allocation7_spill] sm:$0xff] %v5689_v25 }
 0x260   : > { %v1213_v19 = vpop.f32.mrf.mxu2 }
 0x261   : > { %v1644_v62 = vpop.f32.mrf.mxu3  ;;  %v1312_v42 = vadd.f32 %v1213_v19, %v848_v61  ;;  %v850_v39 = vpop.f32.mrf.mxu1  ;;  %v4400_v19 = vld [vmem:[%s5001_s27 + $0x320] sm:$0xff] }
 0x262   : > { %v851_v54 = vadd.f32 %v850_v39, %v6425_v26  ;;  %v1430_v25 = vpack.c.bf16 %v4400_v19, %v4399_v12 }
 0x263   : > { %v1743_v63 = vadd.f32 %v1644_v62, %v1312_v42  ;;  %v2077_v31 = vpop.f32.mrf.mxu0  ;;  %v6427_v62 = vld [vmem:[#allocation19_spill] sm:$0xff]  ;;  %v4496_v42 = vld [vmem:[%s5001_s27 + $0x319] sm:$0xff] }
 0x264   : > { %4303 = vmatmul.msk.bf16.gmra.mxu1 %vm367_vm1, %v1428_v22  ;;  %v965_v22 = vld [vmem:[%s5001_s27 + $0x302] sm:$0xff] }
 0x265   : > { %4336 = vmatmul.msk.bf16.gmra.mxu2 %vm367_vm1, %v998_v40  ;;  %v5700_v47 = vadd.f32 %v2074_v49, %v1743_v63  ;;  %v4497_v40 = vld [vmem:[%s5001_s27 + $0x321] sm:$0xff]  ;;  %v999_v26 = vpack.c.bf16 %v966_v9, %v965_v22 }
 0x266   : > { %4433 = vmatmul.msk.bf16.gmra.mxu3 %vm367_vm1, %v1429_v55  ;;  %4530 = vmatmul.msk.bf16.gmra.mxu0 %vm367_vm1, %v1859_v51 }
 0x267   : > { %6424 = vst [vmem:[#allocation9_spill] sm:$0xff] %v5700_v47 }
 0x268   : > { %v1216_v43 = vpop.f32.mrf.mxu2 }
 0x269   : > { %v1647_v14 = vpop.f32.mrf.mxu3  ;;  %v1313_v15 = vadd.f32 %v1216_v43, %v851_v54  ;;  %v852_v13 = vpop.f32.mrf.mxu1  ;;  %v1860_v54 = vpack.c.bf16 %v4497_v40, %v4496_v42  ;;  %v4401_v42 = vld [vmem:[%s5001_s27 + $0x330] sm:$0xff]  ;;  %v4402_v40 = vld [vmem:[%s5001_s27 + $0x338] sm:$0xff] }
 0x26a   : > { %v853_v49 = vadd.f32 %v852_v13, %v6427_v62 }
 0x26b   : > { %v1744_v53 = vadd.f32 %v1647_v14, %v1313_v15  ;;  %v2079_v29 = vpop.f32.mrf.mxu0  ;;  %v6429_v15 = vld [vmem:[#allocation21_spill] sm:$0xff] }
 0x26d   : > { %v5705_v61 = vadd.f32 %v2077_v31, %v1744_v53 }
 0x26f   : > { %6426 = vst [vmem:[#allocation11_spill] sm:$0xff] %v5705_v61  ;;  %v1431_v61 = vpack.c.bf16 %v4402_v40, %v4401_v42  ;;  %v4533_v40 = vld [vmem:[%s5001_s27 + $0x1a] sm:$0xff] }
 0x270   : > { %v1218_v63 = vpop.f32.mrf.mxu2 }
 0x271   : > { %v1649_v51 = vpop.f32.mrf.mxu3  ;;  %v1314_v47 = vadd.f32 %v1218_v63, %v853_v49  ;;  %v855_v39 = vpop.f32.mrf.mxu1  ;;  %v968_v49 = vld [vmem:[%s5001_s27 + $0x322] sm:$0xff] }
 0x272   : > { %v856_v13 = vadd.f32 %v855_v39, %v6429_v15  ;;  %v6431_v63 = vld [vmem:[#allocation23_spill] sm:$0xff] }
 0x273   : > { %v1745_v43 = vadd.f32 %v1649_v51, %v1314_v47  ;;  %v2082_v14 = vpop.f32.mrf.mxu0  ;;  %v4498_v51 = vld [vmem:[%s5001_s27 + $0x331] sm:$0xff] }
 0x274   : > { %4304 = vmatmul.msk.bf16.gmra.mxu1 %vm367_vm1, %v1429_v55  ;;  %v967_v55 = vld [vmem:[%s5001_s27 + $0x31a] sm:$0xff] }
 0x275   : > { %4337 = vmatmul.msk.bf16.gmra.mxu2 %vm367_vm1, %v999_v26  ;;  %v5716_v31 = vadd.f32 %v2079_v29, %v1745_v43  ;;  %v4499_v26 = vld [vmem:[%s5001_s27 + $0x339] sm:$0xff]  ;;  %v1000_v15 = vpack.c.bf16 %v968_v49, %v967_v55 }
 0x276   : > { %4434 = vmatmul.msk.bf16.gmra.mxu3 %vm367_vm1, %v1430_v25  ;;  %4531 = vmatmul.msk.bf16.gmra.mxu0 %vm367_vm1, %v1860_v54 }
 0x277   : > { %6428 = vst [vmem:[#allocation13_spill] sm:$0xff] %v5716_v31 }
 0x278   : > { %v1221_v53 = vpop.f32.mrf.mxu2 }
 0x279   : > { %v1652_v47 = vpop.f32.mrf.mxu3  ;;  %v1315_v22 = vadd.f32 %v1221_v53, %v856_v13  ;;  %v857_v9 = vpop.f32.mrf.mxu1  ;;  %v1861_v13 = vpack.c.bf16 %v4499_v26, %v4498_v51  ;;  %v4728_v26 = vld [vmem:[%s5001_s27 + $0x39] sm:$0xff] }
 0x27a   : > { %v858_v29 = vadd.f32 %v857_v9, %v6431_v63  ;;  %v4534_v63 = vld [vmem:[%s5001_s27 + $0x22] sm:$0xff] }
 0x27b   : > { %v1746_v12 = vadd.f32 %v1652_v47, %v1315_v22  ;;  %v2084_v19 = vpop.f32.mrf.mxu0  ;;  %v6433_v22 = vld [vmem:[#allocation25_spill] sm:$0xff] }
 0x27d   : > { %v5721_v62 = vadd.f32 %v2082_v14, %v1746_v12 }
 0x27f   : > { %6430 = vst [vmem:[#allocation15_spill] sm:$0xff] %v5721_v62 }
 0x280   : > { %v1223_v43 = vpop.f32.mrf.mxu2 }
 0x281   : > { %v1654_v54 = vpop.f32.mrf.mxu3  ;;  %v1316_v31 = vadd.f32 %v1223_v43, %v858_v29  ;;  %v860_v39 = vpop.f32.mrf.mxu1  ;;  %v4630_v29 = vld [vmem:[%s5001_s27 + $0x30] sm:$0xff]  ;;  %v6435_v43 = vld [vmem:[#allocation27_spill] sm:$0xff] }
 0x282   : > { %v861_v9 = vadd.f32 %v860_v39, %v6433_v22  ;;  %v2260_v22 = vpack.c.bf16 %v4534_v63, %v4533_v40 }
 0x283   : > { %v1747_v53 = vadd.f32 %v1654_v54, %v1316_v31  ;;  %v2087_v14 = vpop.f32.mrf.mxu0 }
 0x284   : > { %4305 = vmatmul.msk.bf16.gmra.mxu1 %vm367_vm1, %v1430_v25 }
 0x285   : > { %4338 = vmatmul.msk.bf16.gmra.mxu2 %vm367_vm1, %v1000_v15  ;;  %v5732_v47 = vadd.f32 %v2084_v19, %v1747_v53  ;;  %v4727_v19 = vld [vmem:[%s5001_s27 + $0x31] sm:$0xff] }
 0x286   : > { %4435 = vmatmul.msk.bf16.gmra.mxu3 %vm367_vm1, %v1431_v61  ;;  %4532 = vmatmul.msk.bf16.gmra.mxu0 %vm367_vm1, %v1861_v13  ;;  %v4631_v61 = vld [vmem:[%s5001_s27 + $0x38] sm:$0xff] }
 0x287   : > { %6432 = vst [vmem:[#allocation17_spill] sm:$0xff] %v5732_v47  ;;  %v4824_v15 = vld [vmem:[%s5001_s27 + $0x32] sm:$0xff]  ;;  %v4825_v13 = vld [vmem:[%s5001_s27 + $0x3a] sm:$0xff] }
 0x288   : > { %v1226_v31 = vpop.f32.mrf.mxu2 }
 0x289   : > { %v1657_v12 = vpop.f32.mrf.mxu3  ;;  %v1317_v55 = vadd.f32 %v1226_v31, %v861_v9  ;;  %v862_v49 = vpop.f32.mrf.mxu1  ;;  %v2691_v31 = vpack.c.bf16 %v4631_v61, %v4630_v29 }
 0x28a   : > { %v863_v54 = vadd.f32 %v862_v49, %v6435_v43  ;;  %v4632_v43 = vld [vmem:[%s5001_s27 + $0x48] sm:$0xff] }
 0x28b   : > { %v1748_v25 = vadd.f32 %v1657_v12, %v1317_v55  ;;  %v2089_v42 = vpop.f32.mrf.mxu0  ;;  %v3121_v12 = vpack.c.bf16 %v4728_v26, %v4727_v19  ;;  %v3551_v55 = vpack.c.bf16 %v4825_v13, %v4824_v15  ;;  %v4633_v15 = vld [vmem:[%s5001_s27 + $0x50] sm:$0xff] }
 0x28c   : > { %v4729_v13 = vld [vmem:[%s5001_s27 + $0x49] sm:$0xff] }
 0x28d   : > { %v5739_v51 = vadd.f32 %v2087_v14, %v1748_v25  ;;  %v6437_v25 = vld [vmem:[#allocation2_spill] sm:$0xff] }
 0x28f   : > { %6434 = vst [vmem:[#allocation19_spill] sm:$0xff] %v5739_v51 }
 0x290   : > { %v1228_v39 = vpop.f32.mrf.mxu2 }
 0x291   : > { %v1659_v53 = vpop.f32.mrf.mxu3  ;;  %v1318_v47 = vadd.f32 %v1228_v39, %v863_v54  ;;  %v865_v9 = vpop.f32.mrf.mxu1  ;;  %v4730_v39 = vld [vmem:[%s5001_s27 + $0x51] sm:$0xff] }
 0x292   : > { %v866_v40 = vadd.f32 %v865_v9, %v6437_v25  ;;  %v2692_v25 = vpack.c.bf16 %v4633_v15, %v4632_v43  ;;  %v3122_v51 = vpack.c.bf16 %v4730_v39, %v4729_v13 }
 0x293   : > { %v1749_v62 = vadd.f32 %v1659_v53, %v1318_v47  ;;  %v2092_v14 = vpop.f32.mrf.mxu0  ;;  %v6439_v53 = vld [vmem:[#allocation3_spill] sm:$0xff] }
 0x294   : > { %4598 = vmatmul.msk.bf16.vlgmr.msra.gmra.mxu1 %vm367_vm1, %v2260_v22  ;;  %v4827_v22 = vld [vmem:[%s5001_s27 + $0x52] sm:$0xff] }
 0x295   : > { %4695 = vmatmul.msk.bf16.vlgmr.msra.gmra.mxu2 %vm367_vm1, %v2691_v31  ;;  %v5750_v49 = vadd.f32 %v2089_v42, %v1749_v62  ;;  %v4826_v42 = vld [vmem:[%s5001_s27 + $0x4a] sm:$0xff] }
 0x296   : > { %4792 = vmatmul.msk.bf16.vlgmr.msra.gmra.mxu3 %vm367_vm1, %v3121_v12  ;;  %4889 = vmatmul.msk.bf16.vlgmr.msra.gmra.mxu0 %vm367_vm1, %v3551_v55 }
 0x297   : > { %6436 = vst [vmem:[#allocation21_spill] sm:$0xff] %v5750_v49 }
 0x298   : > { %v1231_v63 = vpop.f32.mrf.mxu2 }
 0x299   : > { %v1662_v47 = vpop.f32.mrf.mxu3  ;;  %v1319_v29 = vadd.f32 %v1231_v63, %v866_v40  ;;  %v867_v61 = vpop.f32.mrf.mxu1  ;;  %v3552_v40 = vpack.c.bf16 %v4827_v22, %v4826_v42  ;;  %v4731_v42 = vld [vmem:[%s5001_s27 + $0x61] sm:$0xff]  ;;  %v6443_v22 = vld [vmem:[#allocation5_spill] sm:$0xff] }
 0x29a   : > { %v868_v62 = vadd.f32 %v867_v61, %v6439_v53 }
 0x29b   : > { %v1750_v19 = vadd.f32 %v1662_v47, %v1319_v29  ;;  %v2094_v26 = vpop.f32.mrf.mxu0  ;;  %v6441_v29 = vld [vmem:[#allocation4_spill] sm:$0xff] }
 0x29d   : > { %v5755_v54 = vadd.f32 %v2092_v14, %v1750_v19 }
 0x29f   : > { %6438 = vst [vmem:[#allocation23_spill] sm:$0xff] %v5755_v54 }
 0x2a0   : > { %v1233_v31 = vpop.f32.mrf.mxu2 }
 0x2a1   : > { %v1664_v12 = vpop.f32.mrf.mxu3  ;;  %v1320_v49 = vadd.f32 %v1233_v31, %v868_v62  ;;  %v870_v9 = vpop.f32.mrf.mxu1  ;;  %v4635_v62 = vld [vmem:[%s5001_s27 + $0x68] sm:$0xff] }
 0x2a2   : > { %v871_v61 = vadd.f32 %v870_v9, %v6441_v29  ;;  %v4828_v31 = vld [vmem:[%s5001_s27 + $0x62] sm:$0xff] }
 0x2a3   : > { %v1751_v63 = vadd.f32 %v1664_v12, %v1320_v49  ;;  %v2097_v47 = vpop.f32.mrf.mxu0  ;;  %v4829_v12 = vld [vmem:[%s5001_s27 + $0x6a] sm:$0xff] }
 0x2a4   : > { %4599 = vmatmul.msk.bf16.gmra.mxu1 %vm367_vm1, %v3551_v55  ;;  %v4634_v55 = vld [vmem:[%s5001_s27 + $0x60] sm:$0xff] }
 0x2a5   : > { %4696 = vmatmul.msk.bf16.gmra.mxu2 %vm367_vm1, %v2692_v25  ;;  %v5766_v14 = vadd.f32 %v2094_v26, %v1751_v63  ;;  %v2693_v29 = vpack.c.bf16 %v4635_v62, %v4634_v55 }
 0x2a6   : > { %4793 = vmatmul.msk.bf16.gmra.mxu3 %vm367_vm1, %v3122_v51  ;;  %4890 = vmatmul.msk.bf16.gmra.mxu0 %vm367_vm1, %v3552_v40  ;;  %v4732_v51 = vld [vmem:[%s5001_s27 + $0x69] sm:$0xff] }
 0x2a7   : > { %6440 = vst [vmem:[#allocation25_spill] sm:$0xff] %v5766_v14  ;;  %v3123_v54 = vpack.c.bf16 %v4732_v51, %v4731_v42 }
 0x2a8   : > { %v1236_v19 = vpop.f32.mrf.mxu2 }
 0x2a9   : > { %v1667_v49 = vpop.f32.mrf.mxu3  ;;  %v1321_v43 = vadd.f32 %v1236_v19, %v871_v61  ;;  %v872_v15 = vpop.f32.mrf.mxu1  ;;  %v3553_v61 = vpack.c.bf16 %v4829_v12, %v4828_v31  ;;  %v4733_v31 = vld [vmem:[%s5001_s27 + $0x79] sm:$0xff]  ;;  %v6447_v12 = vld [vmem:[#allocation8_spill] sm:$0xff] }
 0x2aa   : > { %v873_v26 = vadd.f32 %v872_v15, %v6443_v22 }
 0x2ab   : > { %v1752_v13 = vadd.f32 %v1667_v49, %v1321_v43  ;;  %v2099_v39 = vpop.f32.mrf.mxu0  ;;  %v6445_v43 = vld [vmem:[#allocation6_spill] sm:$0xff] }
 0x2ad   : > { %v5771_v53 = vadd.f32 %v2097_v47, %v1752_v13 }
 0x2af   : > { %6442 = vst [vmem:[#allocation27_spill] sm:$0xff] %v5771_v53 }
 0x2b0   : > { %v1238_v25 = vpop.f32.mrf.mxu2 }
 0x2b1   : > { %v1669_v63 = vpop.f32.mrf.mxu3  ;;  %v1322_v14 = vadd.f32 %v1238_v25, %v873_v26  ;;  %v875_v9 = vpop.f32.mrf.mxu1  ;;  %v4637_v26 = vld [vmem:[%s5001_s27 + $0x80] sm:$0xff] }
 0x2b2   : > { %v876_v15 = vadd.f32 %v875_v9, %v6445_v43  ;;  %v4830_v25 = vld [vmem:[%s5001_s27 + $0x7a] sm:$0xff] }
 0x2b3   : > { %v1753_v19 = vadd.f32 %v1669_v63, %v1322_v14  ;;  %v2102_v49 = vpop.f32.mrf.mxu0  ;;  %v4831_v63 = vld [vmem:[%s5001_s27 + $0x82] sm:$0xff] }
 0x2b4   : > { %4600 = vmatmul.msk.bf16.gmra.mxu1 %vm367_vm1, %v3552_v40  ;;  %v4636_v40 = vld [vmem:[%s5001_s27 + $0x78] sm:$0xff] }
 0x2b5   : > { %4697 = vmatmul.msk.bf16.gmra.mxu2 %vm367_vm1, %v2693_v29  ;;  %v5782_v47 = vadd.f32 %v2099_v39, %v1753_v19  ;;  %v2694_v43 = vpack.c.bf16 %v4637_v26, %v4636_v40 }
 0x2b6   : > { %4794 = vmatmul.msk.bf16.gmra.mxu3 %vm367_vm1, %v3123_v54  ;;  %4891 = vmatmul.msk.bf16.gmra.mxu0 %vm367_vm1, %v3553_v61  ;;  %v4734_v54 = vld [vmem:[%s5001_s27 + $0x81] sm:$0xff] }
 0x2b7   : > { %6444 = vst [vmem:[#allocation2_spill] sm:$0xff] %v5782_v47  ;;  %v3124_v53 = vpack.c.bf16 %v4734_v54, %v4733_v31 }
 0x2b8   : > { %v1241_v13 = vpop.f32.mrf.mxu2 }
 0x2b9   : > { %v1672_v14 = vpop.f32.mrf.mxu3  ;;  %v1323_v55 = vadd.f32 %v1241_v13, %v876_v15  ;;  %v877_v62 = vpop.f32.mrf.mxu1  ;;  %v3554_v15 = vpack.c.bf16 %v4831_v63, %v4830_v25  ;;  %v4735_v25 = vld [vmem:[%s5001_s27 + $0x91] sm:$0xff] }
 0x2ba   : > { %v878_v39 = vadd.f32 %v877_v62, %v6447_v12  ;;  %v6451_v63 = vld [vmem:[#allocation12_spill] sm:$0xff] }
 0x2bb   : > { %v1754_v42 = vadd.f32 %v1672_v14, %v1323_v55  ;;  %v2104_v51 = vpop.f32.mrf.mxu0  ;;  %v6449_v55 = vld [vmem:[#allocation10_spill] sm:$0xff] }
 0x2bd   : > { %v5787_v22 = vadd.f32 %v2102_v49, %v1754_v42 }
 0x2bf   : > { %6446 = vst [vmem:[#allocation3_spill] sm:$0xff] %v5787_v22 }
 0x2c0   : > { %v1243_v29 = vpop.f32.mrf.mxu2 }
 0x2c1   : > { %v1674_v19 = vpop.f32.mrf.mxu3  ;;  %v1324_v47 = vadd.f32 %v1243_v29, %v878_v39  ;;  %v880_v9 = vpop.f32.mrf.mxu1  ;;  %v4639_v39 = vld [vmem:[%s5001_s27 + $0x98] sm:$0xff] }
 0x2c2   : > { %v881_v62 = vadd.f32 %v880_v9, %v6449_v55  ;;  %v4832_v29 = vld [vmem:[%s5001_s27 + $0x92] sm:$0xff] }
 0x2c3   : > { %v1755_v13 = vadd.f32 %v1674_v19, %v1324_v47  ;;  %v2107_v14 = vpop.f32.mrf.mxu0  ;;  %v4833_v19 = vld [vmem:[%s5001_s27 + $0x9a] sm:$0xff] }
 0x2c4   : > { %4601 = vmatmul.msk.bf16.gmra.mxu1 %vm367_vm1, %v3553_v61  ;;  %v4638_v61 = vld [vmem:[%s5001_s27 + $0x90] sm:$0xff] }
 0x2c5   : > { %4698 = vmatmul.msk.bf16.gmra.mxu2 %vm367_vm1, %v2694_v43  ;;  %v5798_v49 = vadd.f32 %v2104_v51, %v1755_v13  ;;  %v2695_v55 = vpack.c.bf16 %v4639_v39, %v4638_v61 }
 0x2c6   : > { %4795 = vmatmul.msk.bf16.gmra.mxu3 %vm367_vm1, %v3124_v53  ;;  %4892 = vmatmul.msk.bf16.gmra.mxu0 %vm367_vm1, %v3554_v15  ;;  %v4736_v53 = vld [vmem:[%s5001_s27 + $0x99] sm:$0xff] }
 0x2c7   : > { %6448 = vst [vmem:[#allocation4_spill] sm:$0xff] %v5798_v49  ;;  %v3125_v22 = vpack.c.bf16 %v4736_v53, %v4735_v25 }
 0x2c8   : > { %v1246_v42 = vpop.f32.mrf.mxu2 }
 0x2c9   : > { %v1677_v47 = vpop.f32.mrf.mxu3  ;;  %v1325_v40 = vadd.f32 %v1246_v42, %v881_v62  ;;  %v882_v26 = vpop.f32.mrf.mxu1  ;;  %v3555_v62 = vpack.c.bf16 %v4833_v19, %v4832_v29  ;;  %v4737_v29 = vld [vmem:[%s5001_s27 + $0xa9] sm:$0xff] }
 0x2ca   : > { %v883_v51 = vadd.f32 %v882_v26, %v6451_v63  ;;  %v6455_v19 = vld [vmem:[#allocation16_spill] sm:$0xff] }
 0x2cb   : > { %v1756_v31 = vadd.f32 %v1677_v47, %v1325_v40  ;;  %v2109_v54 = vpop.f32.mrf.mxu0  ;;  %v6453_v40 = vld [vmem:[#allocation14_spill] sm:$0xff] }
 0x2cd   : > { %v5803_v12 = vadd.f32 %v2107_v14, %v1756_v31 }
 0x2cf   : > { %6450 = vst [vmem:[#allocation5_spill] sm:$0xff] %v5803_v12 }
 0x2d0   : > { %v1248_v43 = vpop.f32.mrf.mxu2 }
 0x2d1   : > { %v1679_v13 = vpop.f32.mrf.mxu3  ;;  %v1326_v49 = vadd.f32 %v1248_v43, %v883_v51  ;;  %v885_v9 = vpop.f32.mrf.mxu1  ;;  %v4641_v51 = vld [vmem:[%s5001_s27 + $0xb0] sm:$0xff] }
 0x2d2   : > { %v886_v26 = vadd.f32 %v885_v9, %v6453_v40  ;;  %v4834_v43 = vld [vmem:[%s5001_s27 + $0xaa] sm:$0xff] }
 0x2d3   : > { %v1757_v42 = vadd.f32 %v1679_v13, %v1326_v49  ;;  %v2112_v47 = vpop.f32.mrf.mxu0  ;;  %v4835_v13 = vld [vmem:[%s5001_s27 + $0xb2] sm:$0xff] }
 0x2d4   : > { %4602 = vmatmul.msk.bf16.gmra.mxu1 %vm367_vm1, %v3554_v15  ;;  %v4640_v15 = vld [vmem:[%s5001_s27 + $0xa8] sm:$0xff] }
 0x2d5   : > { %4699 = vmatmul.msk.bf16.gmra.mxu2 %vm367_vm1, %v2695_v55  ;;  %v5814_v14 = vadd.f32 %v2109_v54, %v1757_v42  ;;  %v2696_v40 = vpack.c.bf16 %v4641_v51, %v4640_v15 }
 0x2d6   : > { %4796 = vmatmul.msk.bf16.gmra.mxu3 %vm367_vm1, %v3125_v22  ;;  %4893 = vmatmul.msk.bf16.gmra.mxu0 %vm367_vm1, %v3555_v62  ;;  %v4738_v22 = vld [vmem:[%s5001_s27 + $0xb1] sm:$0xff] }
 0x2d7   : > { %6452 = vst [vmem:[#allocation6_spill] sm:$0xff] %v5814_v14  ;;  %v3126_v12 = vpack.c.bf16 %v4738_v22, %v4737_v29 }
 0x2d8   : > { %v1251_v31 = vpop.f32.mrf.mxu2 }
 0x2d9   : > { %v1682_v49 = vpop.f32.mrf.mxu3  ;;  %v1327_v61 = vadd.f32 %v1251_v31, %v886_v26  ;;  %v887_v39 = vpop.f32.mrf.mxu1  ;;  %v3556_v26 = vpack.c.bf16 %v4835_v13, %v4834_v43  ;;  %v4739_v43 = vld [vmem:[%s5001_s27 + $0xc1] sm:$0xff]  ;;  %v6459_v13 = vld [vmem:[#allocation20_spill] sm:$0xff] }
 0x2da   : > { %v888_v54 = vadd.f32 %v887_v39, %v6455_v19 }
 0x2db   : > { %v1758_v25 = vadd.f32 %v1682_v49, %v1327_v61  ;;  %v2114_v53 = vpop.f32.mrf.mxu0  ;;  %v6457_v61 = vld [vmem:[#allocation18_spill] sm:$0xff] }
 0x2dd   : > { %v5819_v63 = vadd.f32 %v2112_v47, %v1758_v25 }
 0x2df   : > { %6454 = vst [vmem:[#allocation8_spill] sm:$0xff] %v5819_v63 }
 0x2e0   : > { %v1253_v55 = vpop.f32.mrf.mxu2 }
 0x2e1   : > { %v1684_v42 = vpop.f32.mrf.mxu3  ;;  %v1328_v14 = vadd.f32 %v1253_v55, %v888_v54  ;;  %v890_v9 = vpop.f32.mrf.mxu1  ;;  %v4643_v54 = vld [vmem:[%s5001_s27 + $0xc8] sm:$0xff] }
 0x2e2   : > { %v891_v39 = vadd.f32 %v890_v9, %v6457_v61  ;;  %v4836_v55 = vld [vmem:[%s5001_s27 + $0xc2] sm:$0xff] }
 0x2e3   : > { %v1759_v31 = vadd.f32 %v1684_v42, %v1328_v14  ;;  %v2117_v49 = vpop.f32.mrf.mxu0  ;;  %v4837_v42 = vld [vmem:[%s5001_s27 + $0xca] sm:$0xff] }
 0x2e4   : > { %4603 = vmatmul.msk.bf16.gmra.mxu1 %vm367_vm1, %v3555_v62  ;;  %v4642_v62 = vld [vmem:[%s5001_s27 + $0xc0] sm:$0xff] }
 0x2e5   : > { %4700 = vmatmul.msk.bf16.gmra.mxu2 %vm367_vm1, %v2696_v40  ;;  %v5830_v47 = vadd.f32 %v2114_v53, %v1759_v31  ;;  %v2697_v61 = vpack.c.bf16 %v4643_v54, %v4642_v62 }
 0x2e6   : > { %4797 = vmatmul.msk.bf16.gmra.mxu3 %vm367_vm1, %v3126_v12  ;;  %4894 = vmatmul.msk.bf16.gmra.mxu0 %vm367_vm1, %v3556_v26  ;;  %v4740_v12 = vld [vmem:[%s5001_s27 + $0xc9] sm:$0xff] }
 0x2e7   : > { %6456 = vst [vmem:[#allocation10_spill] sm:$0xff] %v5830_v47  ;;  %v3127_v63 = vpack.c.bf16 %v4740_v12, %v4739_v43 }
 0x2e8   : > { %v1256_v25 = vpop.f32.mrf.mxu2 }
 0x2e9   : > { %v1687_v14 = vpop.f32.mrf.mxu3  ;;  %v1329_v15 = vadd.f32 %v1256_v25, %v891_v39  ;;  %v892_v51 = vpop.f32.mrf.mxu1  ;;  %v3557_v39 = vpack.c.bf16 %v4837_v42, %v4836_v55  ;;  %v4741_v55 = vld [vmem:[%s5001_s27 + $0xd9] sm:$0xff]  ;;  %v6463_v42 = vld [vmem:[#allocation24_spill] sm:$0xff] }
 0x2ea   : > { %v893_v53 = vadd.f32 %v892_v51, %v6459_v13 }
 0x2eb   : > { %v1760_v29 = vadd.f32 %v1687_v14, %v1329_v15  ;;  %v2119_v22 = vpop.f32.mrf.mxu0  ;;  %v6461_v15 = vld [vmem:[#allocation22_spill] sm:$0xff] }
 0x2ed   : > { %v5835_v19 = vadd.f32 %v2117_v49, %v1760_v29 }
 0x2ef   : > { %6458 = vst [vmem:[#allocation12_spill] sm:$0xff] %v5835_v19 }
 0x2f0   : > { %v1258_v40 = vpop.f32.mrf.mxu2 }
 0x2f1   : > { %v1689_v31 = vpop.f32.mrf.mxu3  ;;  %v1330_v47 = vadd.f32 %v1258_v40, %v893_v53  ;;  %v895_v9 = vpop.f32.mrf.mxu1  ;;  %v4645_v53 = vld [vmem:[%s5001_s27 + $0xe0] sm:$0xff] }
 0x2f2   : > { %v896_v51 = vadd.f32 %v895_v9, %v6461_v15  ;;  %v4838_v40 = vld [vmem:[%s5001_s27 + $0xda] sm:$0xff] }
 0x2f3   : > { %v1761_v25 = vadd.f32 %v1689_v31, %v1330_v47  ;;  %v2122_v14 = vpop.f32.mrf.mxu0  ;;  %v4839_v31 = vld [vmem:[%s5001_s27 + $0xe2] sm:$0xff] }
 0x2f4   : > { %4604 = vmatmul.msk.bf16.gmra.mxu1 %vm367_vm1, %v3556_v26  ;;  %v4644_v26 = vld [vmem:[%s5001_s27 + $0xd8] sm:$0xff] }
 0x2f5   : > { %4701 = vmatmul.msk.bf16.gmra.mxu2 %vm367_vm1, %v2697_v61  ;;  %v5846_v49 = vadd.f32 %v2119_v22, %v1761_v25  ;;  %v2698_v15 = vpack.c.bf16 %v4645_v53, %v4644_v26 }
 0x2f6   : > { %4798 = vmatmul.msk.bf16.gmra.mxu3 %vm367_vm1, %v3127_v63  ;;  %4895 = vmatmul.msk.bf16.gmra.mxu0 %vm367_vm1, %v3557_v39  ;;  %v4742_v63 = vld [vmem:[%s5001_s27 + $0xe1] sm:$0xff] }
 0x2f7   : > { %6460 = vst [vmem:[#allocation14_spill] sm:$0xff] %v5846_v49  ;;  %v3128_v19 = vpack.c.bf16 %v4742_v63, %v4741_v55 }
 0x2f8   : > { %v1261_v29 = vpop.f32.mrf.mxu2 }
 0x2f9   : > { %v1692_v47 = vpop.f32.mrf.mxu3  ;;  %v1331_v62 = vadd.f32 %v1261_v29, %v896_v51  ;;  %v897_v54 = vpop.f32.mrf.mxu1  ;;  %v3558_v51 = vpack.c.bf16 %v4839_v31, %v4838_v40  ;;  %v4743_v40 = vld [vmem:[%s5001_s27 + $0xf1] sm:$0xff] }
 0x2fa   : > { %v898_v22 = vadd.f32 %v897_v54, %v6463_v42  ;;  %v6466_v31 = vld [vmem:[#allocation28_spill] sm:$0xff] }
 0x2fb   : > { %v1762_v43 = vadd.f32 %v1692_v47, %v1331_v62  ;;  %v2124_v12 = vpop.f32.mrf.mxu0  ;;  %v6465_v62 = vld [vmem:[#allocation26_spill] sm:$0xff] }
 0x2fd   : > { %v5851_v13 = vadd.f32 %v2122_v14, %v1762_v43 }
 0x2ff   : > { %6462 = vst [vmem:[#allocation16_spill] sm:$0xff] %v5851_v13 }
 0x300   : > { %v1263_v61 = vpop.f32.mrf.mxu2 }
 0x301   : > { %v1694_v25 = vpop.f32.mrf.mxu3  ;;  %v1332_v49 = vadd.f32 %v1263_v61, %v898_v22  ;;  %v900_v9 = vpop.f32.mrf.mxu1  ;;  %v4647_v22 = vld [vmem:[%s5001_s27 + $0xf8] sm:$0xff] }
 0x302   : > { %v901_v54 = vadd.f32 %v900_v9, %v6465_v62  ;;  %v4840_v61 = vld [vmem:[%s5001_s27 + $0xf2] sm:$0xff] }
 0x303   : > { %v1763_v29 = vadd.f32 %v1694_v25, %v1332_v49  ;;  %v2127_v47 = vpop.f32.mrf.mxu0  ;;  %v4841_v25 = vld [vmem:[%s5001_s27 + $0xfa] sm:$0xff] }
 0x304   : > { %4605 = vmatmul.msk.bf16.gmra.mxu1 %vm367_vm1, %v3557_v39  ;;  %v4646_v39 = vld [vmem:[%s5001_s27 + $0xf0] sm:$0xff] }
 0x305   : > { %4702 = vmatmul.msk.bf16.gmra.mxu2 %vm367_vm1, %v2698_v15  ;;  %v5862_v14 = vadd.f32 %v2124_v12, %v1763_v29  ;;  %v2699_v62 = vpack.c.bf16 %v4647_v22, %v4646_v39  ;;  %v5885_v22 = vld [vmem:[%s6389_s2] ss:$0 sm:$0xff] }
 0x306   : > { %4799 = vmatmul.msk.bf16.gmra.mxu3 %vm367_vm1, %v3128_v19  ;;  %4896 = vmatmul.msk.bf16.gmra.mxu0 %vm367_vm1, %v3558_v51  ;;  %v4744_v19 = vld [vmem:[%s5001_s27 + $0xf9] sm:$0xff] }
 0x307   : > { %6464 = vst [vmem:[#allocation18_spill] sm:$0xff] %v5862_v14  ;;  %v3129_v13 = vpack.c.bf16 %v4744_v19, %v4743_v40  ;;  %v4649_v19 = vld [vmem:[%s5001_s27 + $0x110] sm:$0xff] }
 0x308   : > { %v1266_v43 = vpop.f32.mrf.mxu2 }
 0x309   : > { %v1697_v49 = vpop.f32.mrf.mxu3  ;;  %v1333_v26 = vadd.f32 %v1266_v43, %v901_v54  ;;  %v902_v53 = vpop.f32.mrf.mxu1  ;;  %v3559_v54 = vpack.c.bf16 %v4841_v25, %v4840_v61  ;;  %v4842_v25 = vld [vmem:[%s5001_s27 + $0x10a] sm:$0xff] }
 0x30a   : > { %v903_v12 = vadd.f32 %v902_v53, %v6466_v31  ;;  %v4745_v31 = vld [vmem:[%s5001_s27 + $0x109] sm:$0xff] }
 0x30b   : > { %v1764_v55 = vadd.f32 %v1697_v49, %v1333_v26  ;;  %v2129_v63 = vpop.f32.mrf.mxu0 }
 0x30d   : > { %v5867_v42 = vadd.f32 %v2127_v47, %v1764_v55 }
 0x310   : > { %v1268_v15 = vpop.f32.mrf.mxu2 }
 0x311   : > { %v1699_v29 = vpop.f32.mrf.mxu3  ;;  %v1334_v14 = vadd.f32 %v1268_v15, %v903_v12  ;;  %v2402_v9 = vpop.f32.mrf.mxu1  ;;  %v4746_v12 = vld [vmem:[%s5001_s27 + $0x111] sm:$0xff] }
 0x312   : > { %v2562_v26 = vadd.f32 %v2402_v9, %v5373_v37  ;;  %v4843_v15 = vld [vmem:[%s5001_s27 + $0x112] sm:$0xff] }
 0x313   : > { %v1765_v43 = vadd.f32 %v1699_v29, %v1334_v14  ;;  %v3693_v49 = vpop.f32.mrf.mxu0 }
 0x314   : > { %4606 = vmatmul.msk.bf16.gmra.mxu1 %vm367_vm1, %v3558_v51 }
 0x315   : > { %4703 = vmatmul.msk.bf16.gmra.mxu2 %vm367_vm1, %v2699_v62  ;;  %v5878_v47 = vadd.f32 %v2129_v63, %v1765_v43  ;;  %v4648_v63 = vld [vmem:[%s5001_s27 + $0x108] sm:$0xff] }
 0x316   : > { %4800 = vmatmul.msk.bf16.gmra.mxu3 %vm367_vm1, %v3129_v13  ;;  %4897 = vmatmul.msk.bf16.gmra.mxu0 %vm367_vm1, %v3559_v54 }
 0x318   : > { %v2833_v14 = vpop.f32.mrf.mxu2 }
 0x319   : > { %v3263_v53 = vpop.f32.mrf.mxu3  ;;  %v2993_v55 = vadd.f32 %v2833_v14, %v2562_v26  ;;  %v2404_v39 = vpop.f32.mrf.mxu1  ;;  %v2700_v14 = vpack.c.bf16 %v4649_v19, %v4648_v63 }
 0x31a   : > { %v2563_v61 = vadd.f32 %v2404_v39, %v5382_v35 }
 0x31b   : > { %v3423_v51 = vadd.f32 %v3263_v53, %v2993_v55  ;;  %v3695_v13 = vpop.f32.mrf.mxu0  ;;  %v3130_v53 = vpack.c.bf16 %v4746_v12, %v4745_v31 }
 0x31d   : > { %v3853_v40 = vadd.f32 %v3693_v49, %v3423_v51  ;;  %v3560_v49 = vpack.c.bf16 %v4843_v15, %v4842_v25 }
 0x31f   : > { %v3921_v37 = vadd.f32 %v5885_v22, %v3853_v40 }
 0x320   : > { %v2835_v29 = vpop.f32.mrf.mxu2 }
 0x321   : > { %v3265_v9 = vpop.f32.mrf.mxu3  ;;  %v3985_v62 = vmax.f32 %v3921_v37, 0.0  ;;  %v2994_v43 = vadd.f32 %v2835_v29, %v2563_v61  ;;  %v2407_v26 = vpop.f32.mrf.mxu1  ;;  %v4650_v29 = vld [vmem:[%s5001_s27 + $0x120] sm:$0xff] }
 0x322   : > { %v2564_v63 = vadd.f32 %v2407_v26, %v5388_v50  ;;  %v4844_v26 = vld [vmem:[%s5001_s27 + $0x122] sm:$0xff] }
 0x323   : > { %v4049_v55 = vpack.c.bf16 %v3985_v62, %v3985_v62  ;;  %v3424_v51 = vadd.f32 %v3265_v9, %v2994_v43  ;;  %v3698_v35 = vpop.f32.mrf.mxu0  ;;  %v4651_v9 = vld [vmem:[%s5001_s27 + $0x128] sm:$0xff] }
 0x324   : > { %4607 = vmatmul.msk.bf16.gmra.mxu1 %vm367_vm1, %v3559_v54  ;;  %v4747_v62 = vld [vmem:[%s5001_s27 + $0x121] sm:$0xff]  ;;  %v4748_v43 = vld [vmem:[%s5001_s27 + $0x129] sm:$0xff] }
 0x325   : > { %4114 = vst.msk [vmem:[%s5899_s16] sm:$0xf] %vm4113_vm2, %v4049_v55  ;;  %v3854_v39 = vadd.f32 %v3695_v13, %v3424_v51  ;;  %4704 = vmatmul.msk.bf16.gmra.mxu2 %vm367_vm1, %v2700_v14 }
 0x326   : > { %4801 = vmatmul.msk.bf16.gmra.mxu3 %vm367_vm1, %v3130_v53  ;;  %4898 = vmatmul.msk.bf16.gmra.mxu0 %vm367_vm1, %v3560_v49  ;;  %v4845_v53 = vld [vmem:[%s5001_s27 + $0x12a] sm:$0xff] }
 0x327   : > { %v3922_v40 = vadd.f32 %v5885_v22, %v3854_v39 }
 0x328   : > { %v2838_v19 = vpop.f32.mrf.mxu2 }
 0x329   : > { %v3268_v54 = vpop.f32.mrf.mxu3  ;;  %v3986_v31 = vmax.f32 %v3922_v40, 0.0  ;;  %v2995_v13 = vadd.f32 %v2838_v19, %v2564_v63  ;;  %v2409_v12 = vpop.f32.mrf.mxu1  ;;  %v2701_v19 = vpack.c.bf16 %v4651_v9, %v4650_v29 }
 0x32a   : > { %v2565_v50 = vadd.f32 %v2409_v12, %v5397_v23 }
 0x32b   : > { %v4050_v37 = vpack.c.bf16 %v3986_v31, %v3986_v31  ;;  %v3425_v61 = vadd.f32 %v3268_v54, %v2995_v13  ;;  %v3700_v25 = vpop.f32.mrf.mxu0  ;;  %v3131_v54 = vpack.c.bf16 %v4748_v43, %v4747_v62  ;;  %v3561_v31 = vpack.c.bf16 %v4845_v53, %v4844_v26  ;;  %v4652_v26 = vld [vmem:[%s5001_s27 + $0x138] sm:$0xff]  ;;  %v4653_v53 = vld [vmem:[%s5001_s27 + $0x140] sm:$0xff] }
 0x32d   : > { %4115 = vst.msk [vmem:[%s5899_s16 + $0x4] sm:$0xf] %vm4113_vm2, %v4050_v37  ;;  %v3855_v15 = vadd.f32 %v3698_v35, %v3425_v61 }
 0x32f   : > { %v3923_v14 = vadd.f32 %v5885_v22, %v3855_v15 }
 0x330   : > { %v2840_v55 = vpop.f32.mrf.mxu2 }
 0x331   : > { %v3270_v51 = vpop.f32.mrf.mxu3  ;;  %v3987_v39 = vmax.f32 %v3923_v14, 0.0  ;;  %v2996_v40 = vadd.f32 %v2840_v55, %v2565_v50  ;;  %v2412_v63 = vpop.f32.mrf.mxu1  ;;  %v4749_v55 = vld [vmem:[%s5001_s27 + $0x139] sm:$0xff] }
 0x332   : > { %v2566_v12 = vadd.f32 %v2412_v63, %v5403_v4  ;;  %v4847_v63 = vld [vmem:[%s5001_s27 + $0x142] sm:$0xff] }
 0x333   : > { %v4051_v35 = vpack.c.bf16 %v3987_v39, %v3987_v39  ;;  %v3426_v13 = vadd.f32 %v3270_v51, %v2996_v40  ;;  %v3703_v37 = vpop.f32.mrf.mxu0  ;;  %v4750_v51 = vld [vmem:[%s5001_s27 + $0x141] sm:$0xff] }
 0x334   : > { %4608 = vmatmul.msk.bf16.gmra.mxu1 %vm367_vm1, %v3560_v49  ;;  %v4846_v40 = vld [vmem:[%s5001_s27 + $0x13a] sm:$0xff] }
 0x335   : > { %4116 = vst.msk [vmem:[%s5899_s16 + $0x8] sm:$0xf] %vm4113_vm2, %v4051_v35  ;;  %v3856_v61 = vadd.f32 %v3700_v25, %v3426_v13  ;;  %4705 = vmatmul.msk.bf16.gmra.mxu2 %vm367_vm1, %v2701_v19 }
 0x336   : > { %4802 = vmatmul.msk.bf16.gmra.mxu3 %vm367_vm1, %v3131_v54  ;;  %4899 = vmatmul.msk.bf16.gmra.mxu0 %vm367_vm1, %v3561_v31 }
 0x337   : > { %v3924_v23 = vadd.f32 %v5885_v22, %v3856_v61 }
 0x338   : > { %v2843_v15 = vpop.f32.mrf.mxu2 }
 0x339   : > { %v3273_v49 = vpop.f32.mrf.mxu3  ;;  %v3988_v29 = vmax.f32 %v3924_v23, 0.0  ;;  %v2997_v25 = vadd.f32 %v2843_v15, %v2566_v12  ;;  %v2414_v9 = vpop.f32.mrf.mxu1  ;;  %v2702_v23 = vpack.c.bf16 %v4653_v53, %v4652_v26  ;;  %v3132_v12 = vpack.c.bf16 %v4750_v51, %v4749_v55 }
 0x33a   : > { %v2567_v4 = vadd.f32 %v2414_v9, %v5412_v30  ;;  %v3562_v15 = vpack.c.bf16 %v4847_v63, %v4846_v40  ;;  %v4751_v40 = vld [vmem:[%s5001_s27 + $0x151] sm:$0xff]  ;;  %v4752_v63 = vld [vmem:[%s5001_s27 + $0x159] sm:$0xff] }
 0x33b   : > { %v4052_v62 = vpack.c.bf16 %v3988_v29, %v3988_v29  ;;  %v3427_v43 = vadd.f32 %v3273_v49, %v2997_v25  ;;  %v3705_v14 = vpop.f32.mrf.mxu0 }
 0x33d   : > { %4117 = vst.msk [vmem:[%s5899_s16 + $0xc] sm:$0xf] %vm4113_vm2, %v4052_v62  ;;  %v3857_v50 = vadd.f32 %v3703_v37, %v3427_v43 }
 0x33f   : > { %v3925_v39 = vadd.f32 %v5885_v22, %v3857_v50 }
 0x340   : > { %v2845_v19 = vpop.f32.mrf.mxu2 }
 0x341   : > { %v3275_v54 = vpop.f32.mrf.mxu3  ;;  %v3989_v35 = vmax.f32 %v3925_v39, 0.0  ;;  %v2998_v13 = vadd.f32 %v2845_v19, %v2567_v4  ;;  %v2417_v61 = vpop.f32.mrf.mxu1  ;;  %v4654_v39 = vld [vmem:[%s5001_s27 + $0x150] sm:$0xff]  ;;  %v4655_v4 = vld [vmem:[%s5001_s27 + $0x158] sm:$0xff] }
 0x342   : > { %v2568_v9 = vadd.f32 %v2417_v61, %v5418_v21 }
 0x343   : > { %v4053_v37 = vpack.c.bf16 %v3989_v35, %v3989_v35  ;;  %v3428_v49 = vadd.f32 %v3275_v54, %v2998_v13  ;;  %v3708_v29 = vpop.f32.mrf.mxu0  ;;  %v4848_v54 = vld [vmem:[%s5001_s27 + $0x152] sm:$0xff]  ;;  %v4849_v35 = vld [vmem:[%s5001_s27 + $0x15a] sm:$0xff] }
 0x344   : > { %4609 = vmatmul.msk.bf16.gmra.mxu1 %vm367_vm1, %v3561_v31 }
 0x345   : > { %4118 = vst.msk [vmem:[%s5899_s16 + $0x10] sm:$0xf] %vm4113_vm2, %v4053_v37  ;;  %v3858_v25 = vadd.f32 %v3705_v14, %v3428_v49  ;;  %4706 = vmatmul.msk.bf16.gmra.mxu2 %vm367_vm1, %v2702_v23  ;;  %v2703_v49 = vpack.c.bf16 %v4655_v4, %v4654_v39 }
 0x346   : > { %4803 = vmatmul.msk.bf16.gmra.mxu3 %vm367_vm1, %v3132_v12  ;;  %4900 = vmatmul.msk.bf16.gmra.mxu0 %vm367_vm1, %v3562_v15 }
 0x347   : > { %v3926_v30 = vadd.f32 %v5885_v22, %v3858_v25  ;;  %v3133_v25 = vpack.c.bf16 %v4752_v63, %v4751_v40  ;;  %v4656_v40 = vld [vmem:[%s5001_s27 + $0x168] sm:$0xff]  ;;  %v4657_v63 = vld [vmem:[%s5001_s27 + $0x170] sm:$0xff] }
 0x348   : > { %v2848_v62 = vpop.f32.mrf.mxu2 }
 0x349   : > { %v3278_v31 = vpop.f32.mrf.mxu3  ;;  %v3990_v43 = vmax.f32 %v3926_v30, 0.0  ;;  %v2999_v14 = vadd.f32 %v2848_v62, %v2568_v9  ;;  %v2419_v50 = vpop.f32.mrf.mxu1  ;;  %v3563_v30 = vpack.c.bf16 %v4849_v35, %v4848_v54  ;;  %v4850_v35 = vld [vmem:[%s5001_s27 + $0x16a] sm:$0xff] }
 0x34a   : > { %v2569_v21 = vadd.f32 %v2419_v50, %v5427_v11 }
 0x34b   : > { %v4054_v26 = vpack.c.bf16 %v3990_v43, %v3990_v43  ;;  %v3429_v53 = vadd.f32 %v3278_v31, %v2999_v14  ;;  %v3710_v55 = vpop.f32.mrf.mxu0 }
 0x34d   : > { %4119 = vst.msk [vmem:[%s5899_s16 + $0x14] sm:$0xf] %vm4113_vm2, %v4054_v26  ;;  %v3859_v51 = vadd.f32 %v3708_v29, %v3429_v53 }
 0x34f   : > { %v3927_v19 = vadd.f32 %v5885_v22, %v3859_v51 }
 0x350   : > { %v2850_v13 = vpop.f32.mrf.mxu2 }
 0x351   : > { %v3280_v61 = vpop.f32.mrf.mxu3  ;;  %v3991_v23 = vmax.f32 %v3927_v19, 0.0  ;;  %v3000_v12 = vadd.f32 %v2850_v13, %v2569_v21  ;;  %v2422_v37 = vpop.f32.mrf.mxu1  ;;  %v4753_v19 = vld [vmem:[%s5001_s27 + $0x169] sm:$0xff]  ;;  %v4754_v21 = vld [vmem:[%s5001_s27 + $0x171] sm:$0xff] }
 0x352   : > { %v2570_v43 = vadd.f32 %v2422_v37, %v5433_v38  ;;  %v4851_v13 = vld [vmem:[%s5001_s27 + $0x172] sm:$0xff] }
 0x353   : > { %v4055_v29 = vpack.c.bf16 %v3991_v23, %v3991_v23  ;;  %v3430_v9 = vadd.f32 %v3280_v61, %v3000_v12  ;;  %v3713_v62 = vpop.f32.mrf.mxu0 }
 0x354   : > { %4610 = vmatmul.msk.bf16.gmra.mxu1 %vm367_vm1, %v3562_v15 }
 0x355   : > { %4120 = vst.msk [vmem:[%s5899_s16 + $0x18] sm:$0xf] %vm4113_vm2, %v4055_v29  ;;  %v3860_v31 = vadd.f32 %v3710_v55, %v3430_v9  ;;  %4707 = vmatmul.msk.bf16.gmra.mxu2 %vm367_vm1, %v2703_v49  ;;  %v3134_v29 = vpack.c.bf16 %v4754_v21, %v4753_v19  ;;  %v3564_v9 = vpack.c.bf16 %v4851_v13, %v4850_v35  ;;  %v4755_v19 = vld [vmem:[%s5001_s27 + $0x181] sm:$0xff]  ;;  %v4756_v21 = vld [vmem:[%s5001_s27 + $0x189] sm:$0xff] }
 0x356   : > { %4804 = vmatmul.msk.bf16.gmra.mxu3 %vm367_vm1, %v3133_v25  ;;  %4901 = vmatmul.msk.bf16.gmra.mxu0 %vm367_vm1, %v3563_v30  ;;  %v2704_v25 = vpack.c.bf16 %v4657_v63, %v4656_v40  ;;  %v4658_v40 = vld [vmem:[%s5001_s27 + $0x180] sm:$0xff]  ;;  %v4659_v63 = vld [vmem:[%s5001_s27 + $0x188] sm:$0xff] }
 0x357   : > { %v3928_v11 = vadd.f32 %v5885_v22, %v3860_v31  ;;  %v4853_v35 = vld [vmem:[%s5001_s27 + $0x18a] sm:$0xff] }
 0x358   : > { %v2853_v14 = vpop.f32.mrf.mxu2 }
 0x359   : > { %v3283_v15 = vpop.f32.mrf.mxu3  ;;  %v3992_v50 = vmax.f32 %v3928_v11, 0.0  ;;  %v3001_v26 = vadd.f32 %v2853_v14, %v2570_v43  ;;  %v2424_v53 = vpop.f32.mrf.mxu1 }
 0x35a   : > { %v2571_v38 = vadd.f32 %v2424_v53, %v5442_v2 }
 0x35b   : > { %v4056_v55 = vpack.c.bf16 %v3992_v50, %v3992_v50  ;;  %v3431_v51 = vadd.f32 %v3283_v15, %v3001_v26  ;;  %v3715_v39 = vpop.f32.mrf.mxu0 }
 0x35d   : > { %4121 = vst.msk [vmem:[%s5899_s16 + $0x1c] sm:$0xf] %vm4113_vm2, %v4056_v55  ;;  %v3861_v4 = vadd.f32 %v3713_v62, %v3431_v51 }
 0x35f   : > { %v3929_v54 = vadd.f32 %v5885_v22, %v3861_v4 }
 0x360   : > { %v2855_v61 = vpop.f32.mrf.mxu2 }
 0x361   : > { %v3285_v23 = vpop.f32.mrf.mxu3  ;;  %v3993_v12 = vmax.f32 %v3929_v54, 0.0  ;;  %v3002_v37 = vadd.f32 %v2855_v61, %v2571_v38  ;;  %v2427_v49 = vpop.f32.mrf.mxu1  ;;  %v4852_v38 = vld [vmem:[%s5001_s27 + $0x182] sm:$0xff] }
 0x362   : > { %v2572_v14 = vadd.f32 %v2427_v49, %v5448_v56  ;;  %v2705_v49 = vpack.c.bf16 %v4659_v63, %v4658_v40  ;;  %v4757_v40 = vld [vmem:[%s5001_s27 + $0x199] sm:$0xff]  ;;  %v4758_v63 = vld [vmem:[%s5001_s27 + $0x1a1] sm:$0xff] }
 0x363   : > { %v4057_v62 = vpack.c.bf16 %v3993_v12, %v3993_v12  ;;  %v3432_v31 = vadd.f32 %v3285_v23, %v3002_v37  ;;  %v3718_v11 = vpop.f32.mrf.mxu0 }
 0x364   : > { %4611 = vmatmul.msk.bf16.gmra.mxu1 %vm367_vm1, %v3563_v30 }
 0x365   : > { %4122 = vst.msk [vmem:[%s5899_s16 + $0x20] sm:$0xf] %vm4113_vm2, %v4057_v62  ;;  %v3862_v43 = vadd.f32 %v3715_v39, %v3432_v31  ;;  %4708 = vmatmul.msk.bf16.gmra.mxu2 %vm367_vm1, %v2704_v25  ;;  %v3135_v25 = vpack.c.bf16 %v4756_v21, %v4755_v19  ;;  %v4854_v21 = vld [vmem:[%s5001_s27 + $0x19a] sm:$0xff] }
 0x366   : > { %4805 = vmatmul.msk.bf16.gmra.mxu3 %vm367_vm1, %v3134_v29  ;;  %4902 = vmatmul.msk.bf16.gmra.mxu0 %vm367_vm1, %v3564_v9  ;;  %v3565_v29 = vpack.c.bf16 %v4853_v35, %v4852_v38 }
 0x367   : > { %v3930_v2 = vadd.f32 %v5885_v22, %v3862_v43 }
 0x368   : > { %v2858_v15 = vpop.f32.mrf.mxu2 }
 0x369   : > { %v3288_v30 = vpop.f32.mrf.mxu3  ;;  %v3994_v50 = vmax.f32 %v3930_v2, 0.0  ;;  %v3003_v26 = vadd.f32 %v2858_v15, %v2572_v14  ;;  %v2429_v53 = vpop.f32.mrf.mxu1 }
 0x36a   : > { %v2573_v56 = vadd.f32 %v2429_v53, %v5457_v3 }
 0x36b   : > { %v4058_v55 = vpack.c.bf16 %v3994_v50, %v3994_v50  ;;  %v3433_v51 = vadd.f32 %v3288_v30, %v3003_v26  ;;  %v3720_v39 = vpop.f32.mrf.mxu0 }
 0x36d   : > { %4123 = vst.msk [vmem:[%s5899_s16 + $0x24] sm:$0xf] %vm4113_vm2, %v4058_v55  ;;  %v3863_v4 = vadd.f32 %v3718_v11, %v3433_v51 }
 0x36f   : > { %v3931_v54 = vadd.f32 %v5885_v22, %v3863_v4  ;;  %v4661_v4 = vld [vmem:[%s5001_s27 + $0x1a0] sm:$0xff] }
 0x370   : > { %v2860_v13 = vpop.f32.mrf.mxu2 }
 0x371   : > { %v3290_v61 = vpop.f32.mrf.mxu3  ;;  %v3995_v23 = vmax.f32 %v3931_v54, 0.0  ;;  %v3004_v12 = vadd.f32 %v2860_v13, %v2573_v56  ;;  %v2432_v37 = vpop.f32.mrf.mxu1  ;;  %v4855_v54 = vld [vmem:[%s5001_s27 + $0x1a2] sm:$0xff] }
 0x372   : > { %v2574_v2 = vadd.f32 %v2432_v37, %v5463_v52  ;;  %v3566_v37 = vpack.c.bf16 %v4855_v54, %v4854_v21 }
 0x373   : > { %v4059_v62 = vpack.c.bf16 %v3995_v23, %v3995_v23  ;;  %v3434_v31 = vadd.f32 %v3290_v61, %v3004_v12  ;;  %v3723_v11 = vpop.f32.mrf.mxu0  ;;  %v3136_v12 = vpack.c.bf16 %v4758_v63, %v4757_v40  ;;  %v4856_v63 = vld [vmem:[%s5001_s27 + $0x1e2] sm:$0xff] }
 0x374   : > { %4612 = vmatmul.msk.bf16.gmra.mxu1 %vm367_vm1, %v3564_v9 }
 0x375   : > { %4124 = vst.msk [vmem:[%s5899_s16 + $0x28] sm:$0xf] %vm4113_vm2, %v4059_v62  ;;  %v3864_v43 = vadd.f32 %v3720_v39, %v3434_v31  ;;  %4709 = vmatmul.msk.bf16.gmra.mxu2 %vm367_vm1, %v2705_v49  ;;  %v4660_v39 = vld [vmem:[%s5001_s27 + $0x198] sm:$0xff] }
 0x376   : > { %4806 = vmatmul.msk.bf16.gmra.mxu3 %vm367_vm1, %v3135_v25  ;;  %4903 = vmatmul.msk.bf16.gmra.mxu0 %vm367_vm1, %v3565_v29  ;;  %v2706_v23 = vpack.c.bf16 %v4661_v4, %v4660_v39  ;;  %v4759_v39 = vld [vmem:[%s5001_s27 + $0x1e1] sm:$0xff] }
 0x377   : > { %v3932_v3 = vadd.f32 %v5885_v22, %v3864_v43 }
 0x378   : > { %v2863_v14 = vpop.f32.mrf.mxu2 }
 0x379   : > { %v3293_v9 = vpop.f32.mrf.mxu3  ;;  %v3996_v15 = vmax.f32 %v3932_v3, 0.0  ;;  %v3005_v30 = vadd.f32 %v2863_v14, %v2574_v2  ;;  %v2434_v50 = vpop.f32.mrf.mxu1 }
 0x37a   : > { %v2575_v52 = vadd.f32 %v2434_v50, %v5474_v59 }
 0x37b   : > { %v4060_v26 = vpack.c.bf16 %v3996_v15, %v3996_v15  ;;  %v3435_v53 = vadd.f32 %v3293_v9, %v3005_v30  ;;  %v3725_v55 = vpop.f32.mrf.mxu0 }
 0x37d   : > { %4125 = vst.msk [vmem:[%s5899_s16 + $0x2c] sm:$0xf] %vm4113_vm2, %v4060_v26  ;;  %v3865_v51 = vadd.f32 %v3723_v11, %v3435_v53  ;;  %v4565_v26 = vld [vmem:[%s5001_s27 + $0x1ca] sm:$0xff]  ;;  %v4566_v53 = vld [vmem:[%s5001_s27 + $0x1d2] sm:$0xff] }
 0x37e   : > { %v2276_v54 = vpack.c.bf16 %v4566_v53, %v4565_v26  ;;  %v4762_v26 = vld [vmem:[%s5001_s27 + $0x201] sm:$0xff] }
 0x37f   : > { %v3933_v19 = vadd.f32 %v5885_v22, %v3865_v51  ;;  %v4663_v51 = vld [vmem:[%s5001_s27 + $0x1e8] sm:$0xff] }
 0x380   : > { %v2865_v56 = vpop.f32.mrf.mxu2 }
 0x381   : > { %v3295_v38 = vpop.f32.mrf.mxu3  ;;  %v3997_v35 = vmax.f32 %v3933_v19, 0.0  ;;  %v3006_v13 = vadd.f32 %v2865_v56, %v2575_v52  ;;  %v2437_v61 = vpop.f32.mrf.mxu1  ;;  %v4857_v19 = vld [vmem:[%s5001_s27 + $0x1ea] sm:$0xff] }
 0x382   : > { %v2576_v11 = vadd.f32 %v2437_v61, %v5481_v36  ;;  %v4760_v36 = vld [vmem:[%s5001_s27 + $0x1e9] sm:$0xff] }
 0x383   : > { %v4061_v49 = vpack.c.bf16 %v3997_v35, %v3997_v35  ;;  %v3436_v25 = vadd.f32 %v3295_v38, %v3006_v13  ;;  %v3728_v62 = vpop.f32.mrf.mxu0  ;;  %v3137_v61 = vpack.c.bf16 %v4760_v36, %v4759_v39 }
 0x384   : > { %4613 = vmatmul.msk.bf16.gmra.mxu1 %vm367_vm1, %v3565_v29 }
 0x385   : > { %4126 = vst.msk [vmem:[%s5899_s16 + $0x30] sm:$0xf] %vm4113_vm2, %v4061_v49  ;;  %v3866_v31 = vadd.f32 %v3725_v55, %v3436_v25  ;;  %4710 = vmatmul.msk.bf16.gmra.mxu2 %vm367_vm1, %v2706_v23  ;;  %v4662_v55 = vld [vmem:[%s5001_s27 + $0x1e0] sm:$0xff]  ;;  %v3567_v23 = vpack.c.bf16 %v4857_v19, %v4856_v63 }
 0x386   : > { %4807 = vmatmul.msk.bf16.gmra.mxu3 %vm367_vm1, %v3136_v12  ;;  %4904 = vmatmul.msk.bf16.gmra.mxu0 %vm367_vm1, %v3566_v37  ;;  %v2707_v13 = vpack.c.bf16 %v4663_v51, %v4662_v55  ;;  %v4858_v55 = vld [vmem:[%s5001_s27 + $0x1fa] sm:$0xff]  ;;  %v4859_v51 = vld [vmem:[%s5001_s27 + $0x202] sm:$0xff] }
 0x387   : > { %v3934_v59 = vadd.f32 %v5885_v22, %v3866_v31 }
 0x388   : > { %v2868_v29 = vpop.f32.mrf.mxu2 }
 0x389   : > { %v3298_v43 = vpop.f32.mrf.mxu3  ;;  %v3998_v3 = vmax.f32 %v3934_v59, 0.0  ;;  %v3007_v2 = vadd.f32 %v2868_v29, %v2576_v11  ;;  %v2439_v14 = vpop.f32.mrf.mxu1 }
 0x38a   : > { %v2577_v40 = vadd.f32 %v2439_v14, %v5492_v17 }
 0x38b   : > { %v4062_v9 = vpack.c.bf16 %v3998_v3, %v3998_v3  ;;  %v3437_v15 = vadd.f32 %v3298_v43, %v3007_v2  ;;  %v3730_v30 = vpop.f32.mrf.mxu0 }
 0x38d   : > { %4127 = vst.msk [vmem:[%s5899_s16 + $0x34] sm:$0xf] %vm4113_vm2, %v4062_v9  ;;  %v3867_v50 = vadd.f32 %v3728_v62, %v3437_v15  ;;  %v4664_v15 = vld [vmem:[%s5001_s27 + $0x1f8] sm:$0xff] }
 0x38f   : > { %v3935_v4 = vadd.f32 %v5885_v22, %v3867_v50  ;;  %v4761_v50 = vld [vmem:[%s5001_s27 + $0x1f9] sm:$0xff] }
 0x390   : > { %v2870_v52 = vpop.f32.mrf.mxu2 }
 0x391   : > { %v3300_v21 = vpop.f32.mrf.mxu3  ;;  %v3999_v56 = vmax.f32 %v3935_v4, 0.0  ;;  %v3008_v38 = vadd.f32 %v2870_v52, %v2577_v40  ;;  %v2442_v35 = vpop.f32.mrf.mxu1  ;;  %v3138_v52 = vpack.c.bf16 %v4762_v26, %v4761_v50 }
 0x392   : > { %v2578_v62 = vadd.f32 %v2442_v35, %v5497_v32 }
 0x393   : > { %v4063_v12 = vpack.c.bf16 %v3999_v56, %v3999_v56  ;;  %v3438_v37 = vadd.f32 %v3300_v21, %v3008_v38  ;;  %v3733_v49 = vpop.f32.mrf.mxu0  ;;  %v3568_v21 = vpack.c.bf16 %v4859_v51, %v4858_v55 }
 0x394   : > { %4614 = vmatmul.msk.bf16.gmra.mxu1 %vm367_vm1, %v2276_v54 }
 0x395   : > { %4128 = vst.msk [vmem:[%s5899_s16 + $0x38] sm:$0xf] %vm4113_vm2, %v4063_v12  ;;  %v3868_v17 = vadd.f32 %v3730_v30, %v3438_v37  ;;  %4711 = vmatmul.msk.bf16.gmra.mxu2 %vm367_vm1, %v2707_v13  ;;  %v4665_v30 = vld [vmem:[%s5001_s27 + $0x200] sm:$0xff] }
 0x396   : > { %4808 = vmatmul.msk.bf16.gmra.mxu3 %vm367_vm1, %v3137_v61  ;;  %4905 = vmatmul.msk.bf16.gmra.mxu0 %vm367_vm1, %v3567_v23  ;;  %v2708_v19 = vpack.c.bf16 %v4665_v30, %v4664_v15 }
 0x397   : > { %v3936_v25 = vadd.f32 %v5885_v22, %v3868_v17 }
 0x398   : > { %v2873_v31 = vpop.f32.mrf.mxu2 }
 0x399   : > { %v3303_v59 = vpop.f32.mrf.mxu3  ;;  %v4000_v11 = vmax.f32 %v3936_v25, 0.0  ;;  %v3009_v29 = vadd.f32 %v2873_v31, %v2578_v62  ;;  %v2444_v43 = vpop.f32.mrf.mxu1 }
 0x39a   : > { %v2579_v32 = vadd.f32 %v2444_v43, %v5508_v8  ;;  %v4764_v43 = vld [vmem:[%s5001_s27 + $0x219] sm:$0xff] }
 0x39b   : > { %v4064_v3 = vpack.c.bf16 %v4000_v11, %v4000_v11  ;;  %v3439_v2 = vadd.f32 %v3303_v59, %v3009_v29  ;;  %v3735_v14 = vpop.f32.mrf.mxu0  ;;  %v4666_v59 = vld [vmem:[%s5001_s27 + $0x210] sm:$0xff]  ;;  %v4667_v11 = vld [vmem:[%s5001_s27 + $0x218] sm:$0xff] }
 0x39c   : > { %v4763_v29 = vld [vmem:[%s5001_s27 + $0x211] sm:$0xff] }
 0x39d   : > { %4129 = vst.msk [vmem:[%s5899_s16 + $0x3c] sm:$0xf] %vm4113_vm2, %v4064_v3  ;;  %v3869_v9 = vadd.f32 %v3733_v49, %v3439_v2  ;;  %v4860_v2 = vld [vmem:[%s5001_s27 + $0x212] sm:$0xff] }
 0x39f   : > { %v3937_v53 = vadd.f32 %v5885_v22, %v3869_v9 }
 0x3a0   : > { %v2875_v39 = vpop.f32.mrf.mxu2 }
 0x3a1   : > { %v3305_v36 = vpop.f32.mrf.mxu3  ;;  %v4001_v4 = vmax.f32 %v3937_v53, 0.0  ;;  %v3010_v40 = vadd.f32 %v2875_v39, %v2579_v32  ;;  %v2447_v63 = vpop.f32.mrf.mxu1  ;;  %v2709_v53 = vpack.c.bf16 %v4667_v11, %v4666_v59  ;;  %v3139_v32 = vpack.c.bf16 %v4764_v43, %v4763_v29 }
 0x3a2   : > { %v2580_v13 = vadd.f32 %v2447_v63, %v5513_v46 }
 0x3a3   : > { %v4065_v54 = vpack.c.bf16 %v4001_v4, %v4001_v4  ;;  %v3440_v56 = vadd.f32 %v3305_v36, %v3010_v40  ;;  %v3738_v38 = vpop.f32.mrf.mxu0 }
 0x3a4   : > { %4615 = vmatmul.msk.bf16.gmra.mxu1 %vm367_vm1, %v3567_v23 }
 0x3a5   : > { %4130 = vst.msk [vmem:[%s5899_s16 + $0x40] sm:$0xf] %vm4113_vm2, %v4065_v54  ;;  %v3870_v35 = vadd.f32 %v3735_v14, %v3440_v56  ;;  %4712 = vmatmul.msk.bf16.gmra.mxu2 %vm367_vm1, %v2708_v19  ;;  %v4861_v14 = vld [vmem:[%s5001_s27 + $0x21a] sm:$0xff] }
 0x3a6   : > { %4809 = vmatmul.msk.bf16.gmra.mxu3 %vm367_vm1, %v3138_v52  ;;  %4906 = vmatmul.msk.bf16.gmra.mxu0 %vm367_vm1, %v3568_v21  ;;  %v3569_v55 = vpack.c.bf16 %v4861_v14, %v4860_v2 }
 0x3a7   : > { %v3938_v8 = vadd.f32 %v5885_v22, %v3870_v35 }
 0x3a8   : > { %v2878_v61 = vpop.f32.mrf.mxu2 }
 0x3a9   : > { %v3308_v23 = vpop.f32.mrf.mxu3  ;;  %v4002_v12 = vmax.f32 %v3938_v8, 0.0  ;;  %v3011_v37 = vadd.f32 %v2878_v61, %v2580_v13  ;;  %v2449_v49 = vpop.f32.mrf.mxu1  ;;  %v4668_v13 = vld [vmem:[%s5001_s27 + $0x228] sm:$0xff]  ;;  %v4669_v61 = vld [vmem:[%s5001_s27 + $0x230] sm:$0xff] }
 0x3aa   : > { %v2581_v46 = vadd.f32 %v2449_v49, %v5524_v24  ;;  %v4862_v49 = vld [vmem:[%s5001_s27 + $0x22a] sm:$0xff]  ;;  %v2710_v29 = vpack.c.bf16 %v4669_v61, %v4668_v13 }
 0x3ab   : > { %v4066_v17 = vpack.c.bf16 %v4002_v12, %v4002_v12  ;;  %v3441_v25 = vadd.f32 %v3308_v23, %v3011_v37  ;;  %v3740_v62 = vpop.f32.mrf.mxu0  ;;  %v4765_v23 = vld [vmem:[%s5001_s27 + $0x229] sm:$0xff]  ;;  %v4766_v12 = vld [vmem:[%s5001_s27 + $0x231] sm:$0xff] }
 0x3ac   : > { %v3140_v43 = vpack.c.bf16 %v4766_v12, %v4765_v23 }
 0x3ad   : > { %4131 = vst.msk [vmem:[%s5899_s16 + $0x44] sm:$0xf] %vm4113_vm2, %v4066_v17  ;;  %v3871_v31 = vadd.f32 %v3738_v38, %v3441_v25  ;;  %v4863_v17 = vld [vmem:[%s5001_s27 + $0x232] sm:$0xff] }
 0x3af   : > { %v3939_v3 = vadd.f32 %v5885_v22, %v3871_v31 }
 0x3b0   : > { %v2880_v9 = vpop.f32.mrf.mxu2 }
 0x3b1   : > { %v3310_v15 = vpop.f32.mrf.mxu3  ;;  %v4003_v30 = vmax.f32 %v3939_v3, 0.0  ;;  %v3012_v50 = vadd.f32 %v2880_v9, %v2581_v46  ;;  %v2452_v26 = vpop.f32.mrf.mxu1  ;;  %v3570_v3 = vpack.c.bf16 %v4863_v17, %v4862_v49 }
 0x3b2   : > { %v2582_v40 = vadd.f32 %v2452_v26, %v5529_v58 }
 0x3b3   : > { %v4067_v51 = vpack.c.bf16 %v4003_v30, %v4003_v30  ;;  %v3442_v39 = vadd.f32 %v3310_v15, %v3012_v50  ;;  %v3743_v36 = vpop.f32.mrf.mxu0 }
 0x3b4   : > { %4616 = vmatmul.msk.bf16.gmra.mxu1 %vm367_vm1, %v3568_v21 }
 0x3b5   : > { %4132 = vst.msk [vmem:[%s5899_s16 + $0x48] sm:$0xf] %vm4113_vm2, %v4067_v51  ;;  %v3872_v4 = vadd.f32 %v3740_v62, %v3442_v39  ;;  %4713 = vmatmul.msk.bf16.gmra.mxu2 %vm367_vm1, %v2709_v53 }
 0x3b6   : > { %4810 = vmatmul.msk.bf16.gmra.mxu3 %vm367_vm1, %v3139_v32  ;;  %4907 = vmatmul.msk.bf16.gmra.mxu0 %vm367_vm1, %v3569_v55 }
 0x3b7   : > { %v3940_v24 = vadd.f32 %v5885_v22, %v3872_v4  ;;  %v4670_v4 = vld [vmem:[%s5001_s27 + $0x240] sm:$0xff] }
 0x3b8   : > { %v2883_v63 = vpop.f32.mrf.mxu2 }
 0x3b9   : > { %v3313_v19 = vpop.f32.mrf.mxu3  ;;  %v4004_v52 = vmax.f32 %v3940_v24, 0.0  ;;  %v3013_v21 = vadd.f32 %v2883_v63, %v2582_v40  ;;  %v2454_v54 = vpop.f32.mrf.mxu1  ;;  %v4671_v24 = vld [vmem:[%s5001_s27 + $0x248] sm:$0xff] }
 0x3ba   : > { %v2583_v58 = vadd.f32 %v2454_v54, %v5540_v41  ;;  %v4767_v40 = vld [vmem:[%s5001_s27 + $0x241] sm:$0xff]  ;;  %v4768_v63 = vld [vmem:[%s5001_s27 + $0x249] sm:$0xff]  ;;  %v2711_v13 = vpack.c.bf16 %v4671_v24, %v4670_v4 }
 0x3bb   : > { %v4068_v56 = vpack.c.bf16 %v4004_v52, %v4004_v52  ;;  %v3443_v38 = vadd.f32 %v3313_v19, %v3013_v21  ;;  %v3745_v35 = vpop.f32.mrf.mxu0  ;;  %v4864_v52 = vld [vmem:[%s5001_s27 + $0x242] sm:$0xff]  ;;  %v4865_v21 = vld [vmem:[%s5001_s27 + $0x24a] sm:$0xff]  ;;  %v3141_v61 = vpack.c.bf16 %v4768_v63, %v4767_v40 }
 0x3bc   : > { %v3571_v23 = vpack.c.bf16 %v4865_v21, %v4864_v52 }
 0x3bd   : > { %4133 = vst.msk [vmem:[%s5899_s16 + $0x4c] sm:$0xf] %vm4113_vm2, %v4068_v56  ;;  %v3873_v8 = vadd.f32 %v3743_v36, %v3443_v38 }
 0x3bf   : > { %v3941_v37 = vadd.f32 %v5885_v22, %v3873_v8 }
 0x3c0   : > { %v2885_v25 = vpop.f32.mrf.mxu2 }
 0x3c1   : > { %v3315_v62 = vpop.f32.mrf.mxu3  ;;  %v4005_v31 = vmax.f32 %v3941_v37, 0.0  ;;  %v3014_v59 = vadd.f32 %v2885_v25, %v2583_v58  ;;  %v2457_v11 = vpop.f32.mrf.mxu1 }
 0x3c2   : > { %v2584_v15 = vadd.f32 %v2457_v11, %v5545_v10 }
 0x3c3   : > { %v4069_v46 = vpack.c.bf16 %v4005_v31, %v4005_v31  ;;  %v3444_v2 = vadd.f32 %v3315_v62, %v3014_v59  ;;  %v3748_v14 = vpop.f32.mrf.mxu0 }
 0x3c4   : > { %4617 = vmatmul.msk.bf16.gmra.mxu1 %vm367_vm1, %v3569_v55 }
 0x3c5   : > { %4134 = vst.msk [vmem:[%s5899_s16 + $0x50] sm:$0xf] %vm4113_vm2, %v4069_v46  ;;  %v3874_v9 = vadd.f32 %v3745_v35, %v3444_v2  ;;  %4714 = vmatmul.msk.bf16.gmra.mxu2 %vm367_vm1, %v2710_v29  ;;  %v4672_v2 = vld [vmem:[%s5001_s27 + $0x258] sm:$0xff] }
 0x3c6   : > { %4811 = vmatmul.msk.bf16.gmra.mxu3 %vm367_vm1, %v3140_v43  ;;  %4908 = vmatmul.msk.bf16.gmra.mxu0 %vm367_vm1, %v3570_v3 }
 0x3c7   : > { %v3942_v41 = vadd.f32 %v5885_v22, %v3874_v9  ;;  %v4769_v9 = vld [vmem:[%s5001_s27 + $0x259] sm:$0xff] }
 0x3c8   : > { %v2888_v30 = vpop.f32.mrf.mxu2 }
 0x3c9   : > { %v3318_v50 = vpop.f32.mrf.mxu3  ;;  %v4006_v26 = vmax.f32 %v3942_v41, 0.0  ;;  %v3015_v53 = vadd.f32 %v2888_v30, %v2584_v15  ;;  %v2459_v32 = vpop.f32.mrf.mxu1  ;;  %v4770_v41 = vld [vmem:[%s5001_s27 + $0x261] sm:$0xff] }
 0x3ca   : > { %v2585_v10 = vadd.f32 %v2459_v32, %v5556_v60  ;;  %v4866_v30 = vld [vmem:[%s5001_s27 + $0x25a] sm:$0xff] }
 0x3cb   : > { %v4070_v55 = vpack.c.bf16 %v4006_v26, %v4006_v26  ;;  %v3445_v51 = vadd.f32 %v3318_v50, %v3015_v53  ;;  %v3750_v39 = vpop.f32.mrf.mxu0  ;;  %v4867_v50 = vld [vmem:[%s5001_s27 + $0x262] sm:$0xff] }
 0x3cc   : > { %v3572_v4 = vpack.c.bf16 %v4867_v50, %v4866_v30 }
 0x3cd   : > { %4135 = vst.msk [vmem:[%s5899_s16 + $0x54] sm:$0xf] %vm4113_vm2, %v4070_v55  ;;  %v3875_v36 = vadd.f32 %v3748_v14, %v3445_v51  ;;  %v4673_v14 = vld [vmem:[%s5001_s27 + $0x260] sm:$0xff] }
 0x3cf   : > { %v3943_v19 = vadd.f32 %v5885_v22, %v3875_v36  ;;  %v3142_v36 = vpack.c.bf16 %v4770_v41, %v4769_v9 }
 0x3d0   : > { %v2890_v54 = vpop.f32.mrf.mxu2 }
 0x3d1   : > { %v3320_v56 = vpop.f32.mrf.mxu3  ;;  %v4007_v38 = vmax.f32 %v3943_v19, 0.0  ;;  %v3016_v35 = vadd.f32 %v2890_v54, %v2585_v10  ;;  %v2462_v8 = vpop.f32.mrf.mxu1 }
 0x3d2   : > { %v2586_v17 = vadd.f32 %v2462_v8, %v5561_v20 }
 0x3d3   : > { %v4071_v12 = vpack.c.bf16 %v4007_v38, %v4007_v38  ;;  %v3446_v37 = vadd.f32 %v3320_v56, %v3016_v35  ;;  %v3753_v58 = vpop.f32.mrf.mxu0 }
 0x3d4   : > { %4618 = vmatmul.msk.bf16.gmra.mxu1 %vm367_vm1, %v3570_v3 }
 0x3d5   : > { %4136 = vst.msk [vmem:[%s5899_s16 + $0x58] sm:$0xf] %vm4113_vm2, %v4071_v12  ;;  %v3876_v49 = vadd.f32 %v3750_v39, %v3446_v37  ;;  %4715 = vmatmul.msk.bf16.gmra.mxu2 %vm367_vm1, %v2711_v13  ;;  %v2712_v39 = vpack.c.bf16 %v4673_v14, %v4672_v2  ;;  %v4675_v12 = vld [vmem:[%s5001_s27 + $0x278] sm:$0xff] }
 0x3d6   : > { %4812 = vmatmul.msk.bf16.gmra.mxu3 %vm367_vm1, %v3141_v61  ;;  %4909 = vmatmul.msk.bf16.gmra.mxu0 %vm367_vm1, %v3571_v23  ;;  %v4771_v37 = vld [vmem:[%s5001_s27 + $0x271] sm:$0xff] }
 0x3d7   : > { %v3944_v60 = vadd.f32 %v5885_v22, %v3876_v49 }
 0x3d8   : > { %v2893_v25 = vpop.f32.mrf.mxu2 }
 0x3d9   : > { %v3323_v62 = vpop.f32.mrf.mxu3  ;;  %v4008_v31 = vmax.f32 %v3944_v60, 0.0  ;;  %v3017_v59 = vadd.f32 %v2893_v25, %v2586_v17  ;;  %v2464_v11 = vpop.f32.mrf.mxu1  ;;  %v4868_v60 = vld [vmem:[%s5001_s27 + $0x272] sm:$0xff]  ;;  %v4869_v17 = vld [vmem:[%s5001_s27 + $0x27a] sm:$0xff] }
 0x3da   : > { %v2587_v20 = vadd.f32 %v2464_v11, %v5572_v28 }
 0x3db   : > { %v4072_v29 = vpack.c.bf16 %v4008_v31, %v4008_v31  ;;  %v3447_v43 = vadd.f32 %v3323_v62, %v3017_v59  ;;  %v3755_v3 = vpop.f32.mrf.mxu0 }
 0x3dd   : > { %4137 = vst.msk [vmem:[%s5899_s16 + $0x5c] sm:$0xf] %vm4113_vm2, %v4072_v29  ;;  %v3877_v46 = vadd.f32 %v3753_v58, %v3447_v43  ;;  %v4772_v58 = vld [vmem:[%s5001_s27 + $0x279] sm:$0xff] }
 0x3de   : > { %v3143_v43 = vpack.c.bf16 %v4772_v58, %v4771_v37 }
 0x3df   : > { %v3945_v15 = vadd.f32 %v5885_v22, %v3877_v46 }
 0x3e0   : > { %v2895_v26 = vpop.f32.mrf.mxu2 }
 0x3e1   : > { %v3325_v53 = vpop.f32.mrf.mxu3  ;;  %v4009_v32 = vmax.f32 %v3945_v15, 0.0  ;;  %v3018_v55 = vadd.f32 %v2895_v26, %v2587_v20  ;;  %v2467_v51 = vpop.f32.mrf.mxu1 }
 0x3e2   : > { %v2588_v10 = vadd.f32 %v2467_v51, %v5577_v0 }
 0x3e3   : > { %v4073_v24 = vpack.c.bf16 %v4009_v32, %v4009_v32  ;;  %v3448_v40 = vadd.f32 %v3325_v53, %v3018_v55  ;;  %v3758_v63 = vpop.f32.mrf.mxu0 }
 0x3e4   : > { %4619 = vmatmul.msk.bf16.gmra.mxu1 %vm367_vm1, %v3571_v23  ;;  %v4674_v23 = vld [vmem:[%s5001_s27 + $0x270] sm:$0xff] }
 0x3e5   : > { %4138 = vst.msk [vmem:[%s5899_s16 + $0x60] sm:$0xf] %vm4113_vm2, %v4073_v24  ;;  %v3878_v19 = vadd.f32 %v3755_v3, %v3448_v40  ;;  %4716 = vmatmul.msk.bf16.gmra.mxu2 %vm367_vm1, %v2712_v39  ;;  %v2713_v29 = vpack.c.bf16 %v4675_v12, %v4674_v23  ;;  %v3573_v3 = vpack.c.bf16 %v4869_v17, %v4868_v60  ;;  %v4676_v39 = vld [vmem:[%s5001_s27 + $0x288] sm:$0xff]  ;;  %v4774_v24 = vld [vmem:[%s5001_s27 + $0x291] sm:$0xff] }
 0x3e6   : > { %4813 = vmatmul.msk.bf16.gmra.mxu3 %vm367_vm1, %v3142_v36  ;;  %4910 = vmatmul.msk.bf16.gmra.mxu0 %vm367_vm1, %v3572_v4  ;;  %v4677_v36 = vld [vmem:[%s5001_s27 + $0x290] sm:$0xff] }
 0x3e7   : > { %v3946_v28 = vadd.f32 %v5885_v22, %v3878_v19  ;;  %v4871_v19 = vld [vmem:[%s5001_s27 + $0x292] sm:$0xff] }
 0x3e8   : > { %v2898_v52 = vpop.f32.mrf.mxu2 }
 0x3e9   : > { %v3328_v21 = vpop.f32.mrf.mxu3  ;;  %v4010_v54 = vmax.f32 %v3946_v28, 0.0  ;;  %v3019_v56 = vadd.f32 %v2898_v52, %v2588_v10  ;;  %v2469_v38 = vpop.f32.mrf.mxu1 }
 0x3ea   : > { %v2589_v0 = vadd.f32 %v2469_v38, %v5588_v1  ;;  %v6146_v1 = vld [vmem:[%s6389_s2] ss:$0 sm:$0xff] }
 0x3eb   : > { %v4074_v35 = vpack.c.bf16 %v4010_v54, %v4010_v54  ;;  %v3449_v8 = vadd.f32 %v3328_v21, %v3019_v56  ;;  %v3760_v13 = vpop.f32.mrf.mxu0  ;;  %v2714_v56 = vpack.c.bf16 %v4677_v36, %v4676_v39 }
 0x3ed   : > { %4139 = vst.msk [vmem:[%s5899_s16 + $0x64] sm:$0xf] %vm4113_vm2, %v4074_v35  ;;  %v3879_v61 = vadd.f32 %v3758_v63, %v3449_v8  ;;  %v4870_v63 = vld [vmem:[%s5001_s27 + $0x28a] sm:$0xff] }
 0x3ee   : > { %v3574_v35 = vpack.c.bf16 %v4871_v19, %v4870_v63 }
 0x3ef   : > { %v3947_v49 = vadd.f32 %v5885_v22, %v3879_v61 }
 0x3f0   : > { %v2900_v25 = vpop.f32.mrf.mxu2 }
 0x3f1   : > { %v3330_v62 = vpop.f32.mrf.mxu3  ;;  %v4011_v31 = vmax.f32 %v3947_v49, 0.0  ;;  %v3020_v59 = vadd.f32 %v2900_v25, %v2589_v0  ;;  %v2472_v11 = vpop.f32.mrf.mxu1 }
 0x3f2   : > { %v2590_v41 = vadd.f32 %v2472_v11, %v5593_v33  ;;  %v4679_v11 = vld [vmem:[%s5001_s27 + $0x2a8] sm:$0xff] }
 0x3f3   : > { %v4075_v46 = vpack.c.bf16 %v4011_v31, %v4011_v31  ;;  %v3450_v2 = vadd.f32 %v3330_v62, %v3020_v59  ;;  %v3763_v14 = vpop.f32.mrf.mxu0  ;;  %v4678_v59 = vld [vmem:[%s5001_s27 + $0x2a0] sm:$0xff] }
 0x3f4   : > { %4620 = vmatmul.msk.bf16.gmra.mxu1 %vm367_vm1, %v3572_v4  ;;  %v4773_v4 = vld [vmem:[%s5001_s27 + $0x289] sm:$0xff] }
 0x3f5   : > { %4140 = vst.msk [vmem:[%s5899_s16 + $0x68] sm:$0xf] %vm4113_vm2, %v4075_v46  ;;  %v3880_v22 = vadd.f32 %v3760_v13, %v3450_v2  ;;  %4717 = vmatmul.msk.bf16.gmra.mxu2 %vm367_vm1, %v2713_v29  ;;  %v3144_v38 = vpack.c.bf16 %v4774_v24, %v4773_v4  ;;  %v4775_v29 = vld [vmem:[%s5001_s27 + $0x2a1] sm:$0xff]  ;;  %v4873_v2 = vld [vmem:[%s5001_s27 + $0x2aa] sm:$0xff] }
 0x3f6   : > { %4814 = vmatmul.msk.bf16.gmra.mxu3 %vm367_vm1, %v3143_v43  ;;  %4911 = vmatmul.msk.bf16.gmra.mxu0 %vm367_vm1, %v3573_v3  ;;  %v4776_v43 = vld [vmem:[%s5001_s27 + $0x2a9] sm:$0xff] }
 0x3f7   : > { %v3948_v9 = vadd.f32 %v6146_v1, %v3880_v22  ;;  %v4872_v46 = vld [vmem:[%s5001_s27 + $0x2a2] sm:$0xff] }
 0x3f8   : > { %v2903_v15 = vpop.f32.mrf.mxu2 }
 0x3f9   : > { %v3333_v20 = vpop.f32.mrf.mxu3  ;;  %v4012_v30 = vmax.f32 %v3948_v9, 0.0  ;;  %v3021_v50 = vadd.f32 %v2903_v15, %v2590_v41  ;;  %v2474_v26 = vpop.f32.mrf.mxu1 }
 0x3fa   : > { %v2591_v33 = vadd.f32 %v2474_v26, %v5604_v44 }
 0x3fb   : > { %v4076_v53 = vpack.c.bf16 %v4012_v30, %v4012_v30  ;;  %v3451_v32 = vadd.f32 %v3333_v20, %v3021_v50  ;;  %v3765_v55 = vpop.f32.mrf.mxu0  ;;  %v2715_v20 = vpack.c.bf16 %v4679_v11, %v4678_v59  ;;  %v3145_v30 = vpack.c.bf16 %v4776_v43, %v4775_v29 }
 0x3fc   : > { %v3575_v50 = vpack.c.bf16 %v4873_v2, %v4872_v46  ;;  %v4682_v2 = vld [vmem:[%s5001_s27 + $0x2d0] sm:$0xff] }
 0x3fd   : > { %4141 = vst.msk [vmem:[%s5899_s16 + $0x6c] sm:$0xf] %vm4113_vm2, %v4076_v53  ;;  %v3881_v51 = vadd.f32 %v3763_v14, %v3451_v32 }
 0x3ff   : > { %v3949_v40 = vadd.f32 %v6146_v1, %v3881_v51 }
 0x400   : > { %v2905_v28 = vpop.f32.mrf.mxu2 }
 0x401   : > { %v3335_v10 = vpop.f32.mrf.mxu3  ;;  %v4013_v52 = vmax.f32 %v3949_v40, 0.0  ;;  %v3022_v21 = vadd.f32 %v2905_v28, %v2591_v33  ;;  %v2477_v54 = vpop.f32.mrf.mxu1 }
 0x402   : > { %v2592_v12 = vadd.f32 %v2477_v54, %v5609_v45  ;;  %v4778_v54 = vld [vmem:[%s5001_s27 + $0x2c1] sm:$0xff] }
 0x403   : > { %v4077_v8 = vpack.c.bf16 %v4013_v52, %v4013_v52  ;;  %v3452_v13 = vadd.f32 %v3335_v10, %v3022_v21  ;;  %v3768_v61 = vpop.f32.mrf.mxu0  ;;  %v4680_v10 = vld [vmem:[%s5001_s27 + $0x2b8] sm:$0xff]  ;;  %v4681_v52 = vld [vmem:[%s5001_s27 + $0x2c0] sm:$0xff] }
 0x404   : > { %4621 = vmatmul.msk.bf16.gmra.mxu1 %vm367_vm1, %v3573_v3  ;;  %v4777_v21 = vld [vmem:[%s5001_s27 + $0x2b9] sm:$0xff] }
 0x405   : > { %4142 = vst.msk [vmem:[%s5899_s16 + $0x70] sm:$0xf] %vm4113_vm2, %v4077_v8  ;;  %v3882_v23 = vadd.f32 %v3765_v55, %v3452_v13  ;;  %4718 = vmatmul.msk.bf16.gmra.mxu2 %vm367_vm1, %v2714_v56 }
 0x406   : > { %4815 = vmatmul.msk.bf16.gmra.mxu3 %vm367_vm1, %v3144_v38  ;;  %4912 = vmatmul.msk.bf16.gmra.mxu0 %vm367_vm1, %v3574_v35  ;;  %v4874_v38 = vld [vmem:[%s5001_s27 + $0x2ba] sm:$0xff] }
 0x407   : > { %v3950_v44 = vadd.f32 %v6146_v1, %v3882_v23 }
 0x408   : > { %v2908_v37 = vpop.f32.mrf.mxu2 }
 0x409   : > { %v3338_v58 = vpop.f32.mrf.mxu3  ;;  %v4014_v49 = vmax.f32 %v3950_v44, 0.0  ;;  %v3023_v0 = vadd.f32 %v2908_v37, %v2592_v12  ;;  %v2479_v60 = vpop.f32.mrf.mxu1  ;;  %v2716_v12 = vpack.c.bf16 %v4681_v52, %v4680_v10  ;;  %v3146_v37 = vpack.c.bf16 %v4778_v54, %v4777_v21 }
 0x40a   : > { %v2593_v45 = vadd.f32 %v2479_v60, %v5620_v48 }
 0x40b   : > { %v4078_v17 = vpack.c.bf16 %v4014_v49, %v4014_v49  ;;  %v3453_v25 = vadd.f32 %v3338_v58, %v3023_v0  ;;  %v3770_v62 = vpop.f32.mrf.mxu0 }
 0x40d   : > { %4143 = vst.msk [vmem:[%s5899_s16 + $0x74] sm:$0xf] %vm4113_vm2, %v4078_v17  ;;  %v3883_v31 = vadd.f32 %v3768_v61, %v3453_v25 }
 0x40f   : > { %v3951_v3 = vadd.f32 %v6146_v1, %v3883_v31 }
 0x410   : > { %v2910_v14 = vpop.f32.mrf.mxu2 }
 0x411   : > { %v3340_v22 = vpop.f32.mrf.mxu3  ;;  %v4015_v9 = vmax.f32 %v3951_v3, 0.0  ;;  %v3024_v41 = vadd.f32 %v2910_v14, %v2593_v45  ;;  %v2482_v15 = vpop.f32.mrf.mxu1  ;;  %v4683_v14 = vld [vmem:[%s5001_s27 + $0x2d8] sm:$0xff] }
 0x412   : > { %v2594_v51 = vadd.f32 %v2482_v15, %v5625_v57  ;;  %v4876_v15 = vld [vmem:[%s5001_s27 + $0x2d2] sm:$0xff] }
 0x413   : > { %v4079_v26 = vpack.c.bf16 %v4015_v9, %v4015_v9  ;;  %v3454_v53 = vadd.f32 %v3340_v22, %v3024_v41  ;;  %v3773_v32 = vpop.f32.mrf.mxu0  ;;  %v4779_v22 = vld [vmem:[%s5001_s27 + $0x2d1] sm:$0xff]  ;;  %v4780_v9 = vld [vmem:[%s5001_s27 + $0x2d9] sm:$0xff] }
 0x414   : > { %4622 = vmatmul.msk.bf16.gmra.mxu1 %vm367_vm1, %v3574_v35  ;;  %v4875_v35 = vld [vmem:[%s5001_s27 + $0x2c2] sm:$0xff] }
 0x415   : > { %4144 = vst.msk [vmem:[%s5899_s16 + $0x78] sm:$0xf] %vm4113_vm2, %v4079_v26  ;;  %v3884_v55 = vadd.f32 %v3770_v62, %v3454_v53  ;;  %4719 = vmatmul.msk.bf16.gmra.mxu2 %vm367_vm1, %v2715_v20  ;;  %v3576_v58 = vpack.c.bf16 %v4875_v35, %v4874_v38  ;;  %v4877_v20 = vld [vmem:[%s5001_s27 + $0x2da] sm:$0xff]  ;;  %v4685_v38 = vld [vmem:[%s5001_s27 + $0x2f0] sm:$0xff] }
 0x416   : > { %4816 = vmatmul.msk.bf16.gmra.mxu3 %vm367_vm1, %v3145_v30  ;;  %4913 = vmatmul.msk.bf16.gmra.mxu0 %vm367_vm1, %v3575_v50  ;;  %v4781_v35 = vld [vmem:[%s5001_s27 + $0x2e9] sm:$0xff] }
 0x417   : > { %v3952_v48 = vadd.f32 %v6146_v1, %v3884_v55  ;;  %v2717_v55 = vpack.c.bf16 %v4683_v14, %v4682_v2 }
 0x418   : > { %v2913_v39 = vpop.f32.mrf.mxu2 }
 0x419   : > { %v3343_v36 = vpop.f32.mrf.mxu3  ;;  %v4016_v4 = vmax.f32 %v3952_v48, 0.0  ;;  %v3025_v24 = vadd.f32 %v2913_v39, %v2594_v51  ;;  %v2484_v40 = vpop.f32.mrf.mxu1  ;;  %v3147_v48 = vpack.c.bf16 %v4780_v9, %v4779_v22  ;;  %v3577_v51 = vpack.c.bf16 %v4877_v20, %v4876_v15  ;;  %v4686_v9 = vld [vmem:[%s5001_s27 + $0x300] sm:$0xff]  ;;  %v4784_v15 = vld [vmem:[%s5001_s27 + $0x309] sm:$0xff] }
 0x41a   : > { %v2595_v57 = vadd.f32 %v2484_v40, %v5636_v16 }
 0x41b   : > { %v4080_v33 = vpack.c.bf16 %v4016_v4, %v4016_v4  ;;  %v3455_v63 = vadd.f32 %v3343_v36, %v3025_v24  ;;  %v3775_v19 = vpop.f32.mrf.mxu0 }
 0x41d   : > { %4145 = vst.msk [vmem:[%s5899_s16 + $0x7c] sm:$0xf] %vm4113_vm2, %v4080_v33  ;;  %v3885_v28 = vadd.f32 %v3773_v32, %v3455_v63 }
 0x41f   : > { %v3953_v56 = vadd.f32 %v6146_v1, %v3885_v28 }
 0x420   : > { %v2915_v8 = vpop.f32.mrf.mxu2 }
 0x421   : > { %v3345_v13 = vpop.f32.mrf.mxu3  ;;  %v4017_v61 = vmax.f32 %v3953_v56, 0.0  ;;  %v3026_v23 = vadd.f32 %v2915_v8, %v2595_v57  ;;  %v2487_v44 = vpop.f32.mrf.mxu1  ;;  %v4684_v57 = vld [vmem:[%s5001_s27 + $0x2e8] sm:$0xff]  ;;  %v4782_v8 = vld [vmem:[%s5001_s27 + $0x2f1] sm:$0xff] }
 0x422   : > { %v2596_v25 = vadd.f32 %v2487_v44, %v5641_v5 }
 0x423   : > { %v4081_v49 = vpack.c.bf16 %v4017_v61, %v4017_v61  ;;  %v3456_v0 = vadd.f32 %v3345_v13, %v3026_v23  ;;  %v3778_v60 = vpop.f32.mrf.mxu0  ;;  %v4878_v61 = vld [vmem:[%s5001_s27 + $0x2ea] sm:$0xff]  ;;  %v4879_v23 = vld [vmem:[%s5001_s27 + $0x2f2] sm:$0xff] }
 0x424   : > { %4623 = vmatmul.msk.bf16.gmra.mxu1 %vm367_vm1, %v3575_v50 }
 0x425   : > { %4146 = vst.msk [vmem:[%s5899_s16 + $0x80] sm:$0xf] %vm4113_vm2, %v4081_v49  ;;  %v3886_v17 = vadd.f32 %v3775_v19, %v3456_v0  ;;  %4720 = vmatmul.msk.bf16.gmra.mxu2 %vm367_vm1, %v2716_v12  ;;  %v2718_v0 = vpack.c.bf16 %v4685_v38, %v4684_v57 }
 0x426   : > { %4817 = vmatmul.msk.bf16.gmra.mxu3 %vm367_vm1, %v3146_v37  ;;  %4914 = vmatmul.msk.bf16.gmra.mxu0 %vm367_vm1, %v3576_v58 }
 0x427   : > { %v3954_v16 = vadd.f32 %v6146_v1, %v3886_v17  ;;  %v3578_v17 = vpack.c.bf16 %v4879_v23, %v4878_v61  ;;  %v6468_v23 = vld [vmem:[#allocation9_spill] sm:$0xff] }
 0x428   : > { %v2918_v62 = vpop.f32.mrf.mxu2 }
 0x429   : > { %v3348_v31 = vpop.f32.mrf.mxu3  ;;  %v4018_v59 = vmax.f32 %v3954_v16, 0.0  ;;  %v3027_v11 = vadd.f32 %v2918_v62, %v2596_v25  ;;  %v2489_v29 = vpop.f32.mrf.mxu1 }
 0x42a   : > { %v2597_v5 = vadd.f32 %v2489_v29, %v5652_v34 }
 0x42b   : > { %v4082_v43 = vpack.c.bf16 %v4018_v59, %v4018_v59  ;;  %v3457_v3 = vadd.f32 %v3348_v31, %v3027_v11  ;;  %v3780_v45 = vpop.f32.mrf.mxu0 }
 0x42d   : > { %4147 = vst.msk [vmem:[%s5899_s16 + $0x84] sm:$0xf] %vm4113_vm2, %v4082_v43  ;;  %v3887_v46 = vadd.f32 %v3778_v60, %v3457_v3  ;;  %v3148_v60 = vpack.c.bf16 %v4782_v8, %v4781_v35  ;;  %v4688_v35 = vld [vmem:[%s5001_s27 + $0x318] sm:$0xff]  ;;  %v4689_v8 = vld [vmem:[%s5001_s27 + $0x320] sm:$0xff] }
 0x42f   : > { %v3955_v41 = vadd.f32 %v6146_v1, %v3887_v46 }
 0x430   : > { %v2920_v30 = vpop.f32.mrf.mxu2 }
 0x431   : > { %v3350_v50 = vpop.f32.mrf.mxu3  ;;  %v4019_v26 = vmax.f32 %v3955_v41, 0.0  ;;  %v3028_v53 = vadd.f32 %v2920_v30, %v2597_v5  ;;  %v2492_v32 = vpop.f32.mrf.mxu1  ;;  %v4687_v41 = vld [vmem:[%s5001_s27 + $0x308] sm:$0xff] }
 0x432   : > { %v2598_v40 = vadd.f32 %v2492_v32, %v5657_v18  ;;  %v4783_v5 = vld [vmem:[%s5001_s27 + $0x301] sm:$0xff] }
 0x433   : > { %v4083_v39 = vpack.c.bf16 %v4019_v26, %v4019_v26  ;;  %v3458_v36 = vadd.f32 %v3350_v50, %v3028_v53  ;;  %v3783_v4 = vpop.f32.mrf.mxu0  ;;  %v4880_v30 = vld [vmem:[%s5001_s27 + $0x302] sm:$0xff]  ;;  %v4881_v50 = vld [vmem:[%s5001_s27 + $0x30a] sm:$0xff] }
 0x434   : > { %4624 = vmatmul.msk.bf16.gmra.mxu1 %vm367_vm1, %v3576_v58 }
 0x435   : > { %4148 = vst.msk [vmem:[%s5899_s16 + $0x88] sm:$0xf] %vm4113_vm2, %v4083_v39  ;;  %v3888_v24 = vadd.f32 %v3780_v45, %v3458_v36  ;;  %4721 = vmatmul.msk.bf16.gmra.mxu2 %vm367_vm1, %v2717_v55  ;;  %v3149_v39 = vpack.c.bf16 %v4784_v15, %v4783_v5  ;;  %v3579_v36 = vpack.c.bf16 %v4881_v50, %v4880_v30  ;;  %v4787_v30 = vld [vmem:[%s5001_s27 + $0x331] sm:$0xff]  ;;  %v4788_v50 = vld [vmem:[%s5001_s27 + $0x339] sm:$0xff] }
 0x436   : > { %4818 = vmatmul.msk.bf16.gmra.mxu3 %vm367_vm1, %v3147_v48  ;;  %4915 = vmatmul.msk.bf16.gmra.mxu0 %vm367_vm1, %v3577_v51 }
 0x437   : > { %v3956_v34 = vadd.f32 %v6146_v1, %v3888_v24 }
 0x438   : > { %v2923_v33 = vpop.f32.mrf.mxu2 }
 0x439   : > { %v3353_v63 = vpop.f32.mrf.mxu3  ;;  %v4020_v19 = vmax.f32 %v3956_v34, 0.0  ;;  %v3029_v28 = vadd.f32 %v2923_v33, %v2598_v40  ;;  %v2494_v10 = vpop.f32.mrf.mxu1  ;;  %v6467_v33 = vld [vmem:[#allocation7_spill] sm:$0xff] }
 0x43a   : > { %v2599_v18 = vadd.f32 %v2494_v10, %v5668_v6 }
 0x43b   : > { %v4084_v52 = vpack.c.bf16 %v4020_v19, %v4020_v19  ;;  %v3459_v21 = vadd.f32 %v3353_v63, %v3029_v28  ;;  %v3785_v54 = vpop.f32.mrf.mxu0 }
 0x43d   : > { %4149 = vst.msk [vmem:[%s5899_s16 + $0x8c] sm:$0xf] %vm4113_vm2, %v4084_v52  ;;  %v3889_v56 = vadd.f32 %v3783_v4, %v3459_v21 }
 0x43f   : > { %v3957_v13 = vadd.f32 %v6146_v1, %v3889_v56 }
 0x440   : > { %v2925_v44 = vpop.f32.mrf.mxu2 }
 0x441   : > { %v3355_v12 = vpop.f32.mrf.mxu3  ;;  %v4021_v37 = vmax.f32 %v3957_v13, 0.0  ;;  %v3030_v58 = vadd.f32 %v2925_v44, %v2599_v18  ;;  %v2497_v49 = vpop.f32.mrf.mxu1  ;;  %v4785_v13 = vld [vmem:[%s5001_s27 + $0x319] sm:$0xff]  ;;  %v4786_v18 = vld [vmem:[%s5001_s27 + $0x321] sm:$0xff] }
 0x442   : > { %v2600_v59 = vadd.f32 %v2497_v49, %v5673_v27 }
 0x443   : > { %v4085_v16 = vpack.c.bf16 %v4021_v37, %v4021_v37  ;;  %v3460_v25 = vadd.f32 %v3355_v12, %v3030_v58  ;;  %v3788_v62 = vpop.f32.mrf.mxu0  ;;  %v4882_v12 = vld [vmem:[%s5001_s27 + $0x31a] sm:$0xff]  ;;  %v4883_v37 = vld [vmem:[%s5001_s27 + $0x322] sm:$0xff] }
 0x444   : > { %4625 = vmatmul.msk.bf16.gmra.mxu1 %vm367_vm1, %v3577_v51  ;;  %v2719_v51 = vpack.c.bf16 %v4687_v41, %v4686_v9 }
 0x445   : > { %4150 = vst.msk [vmem:[%s5899_s16 + $0x90] sm:$0xf] %vm4113_vm2, %v4085_v16  ;;  %v3890_v31 = vadd.f32 %v3785_v54, %v3460_v25  ;;  %4722 = vmatmul.msk.bf16.gmra.mxu2 %vm367_vm1, %v2718_v0  ;;  %v2720_v16 = vpack.c.bf16 %v4689_v8, %v4688_v35  ;;  %v3150_v25 = vpack.c.bf16 %v4786_v18, %v4785_v13 }
 0x446   : > { %4819 = vmatmul.msk.bf16.gmra.mxu3 %vm367_vm1, %v3148_v60  ;;  %4916 = vmatmul.msk.bf16.gmra.mxu0 %vm367_vm1, %v3578_v17 }
 0x447   : > { %v3958_v6 = vadd.f32 %v6146_v1, %v3890_v31 }
 0x448   : > { %v2928_v11 = vpop.f32.mrf.mxu2 }
 0x449   : > { %v3358_v29 = vpop.f32.mrf.mxu3  ;;  %v4022_v43 = vmax.f32 %v3958_v6, 0.0  ;;  %v3031_v3 = vadd.f32 %v2928_v11, %v2600_v59  ;;  %v2499_v45 = vpop.f32.mrf.mxu1 }
 0x44a   : > { %v2601_v27 = vadd.f32 %v2499_v45, %v5684_v7 }
 0x44b   : > { %v4086_v46 = vpack.c.bf16 %v4022_v43, %v4022_v43  ;;  %v3461_v2 = vadd.f32 %v3358_v29, %v3031_v3  ;;  %v3790_v14 = vpop.f32.mrf.mxu0  ;;  %v6469_v43 = vld [vmem:[#allocation11_spill] sm:$0xff] }
 0x44d   : > { %4151 = vst.msk [vmem:[%s5899_s16 + $0x94] sm:$0xf] %vm4113_vm2, %v4086_v46  ;;  %v3891_v22 = vadd.f32 %v3788_v62, %v3461_v2  ;;  %v3580_v62 = vpack.c.bf16 %v4883_v37, %v4882_v12  ;;  %v4789_v12 = vld [vmem:[%s5001_s27 + $0x349] sm:$0xff]  ;;  %v4790_v37 = vld [vmem:[%s5001_s27 + $0x351] sm:$0xff] }
 0x44f   : > { %v3959_v20 = vadd.f32 %v6146_v1, %v3891_v22 }
 0x450   : > { %v2930_v26 = vpop.f32.mrf.mxu2 }
 0x451   : > { %v3360_v53 = vpop.f32.mrf.mxu3  ;;  %v4023_v32 = vmax.f32 %v3959_v20, 0.0  ;;  %v3032_v55 = vadd.f32 %v2930_v26, %v2601_v27  ;;  %v2502_v48 = vpop.f32.mrf.mxu1  ;;  %v4690_v20 = vld [vmem:[%s5001_s27 + $0x330] sm:$0xff]  ;;  %v4691_v27 = vld [vmem:[%s5001_s27 + $0x338] sm:$0xff] }
 0x452   : > { %v2602_v63 = vadd.f32 %v2502_v48, %v6467_v33  ;;  %v4885_v48 = vld [vmem:[%s5001_s27 + $0x33a] sm:$0xff] }
 0x453   : > { %v4087_v4 = vpack.c.bf16 %v4023_v32, %v4023_v32  ;;  %v3462_v24 = vadd.f32 %v3360_v53, %v3032_v55  ;;  %v3793_v34 = vpop.f32.mrf.mxu0  ;;  %v6470_v53 = vld [vmem:[#allocation13_spill] sm:$0xff] }
 0x454   : > { %4626 = vmatmul.msk.bf16.gmra.mxu1 %vm367_vm1, %v3578_v17  ;;  %v4884_v55 = vld [vmem:[%s5001_s27 + $0x332] sm:$0xff] }
 0x455   : > { %4152 = vst.msk [vmem:[%s5899_s16 + $0x98] sm:$0xf] %vm4113_vm2, %v4087_v4  ;;  %v3892_v40 = vadd.f32 %v3790_v14, %v3462_v24  ;;  %4723 = vmatmul.msk.bf16.gmra.mxu2 %vm367_vm1, %v2719_v51 }
 0x456   : > { %4820 = vmatmul.msk.bf16.gmra.mxu3 %vm367_vm1, %v3149_v39  ;;  %4917 = vmatmul.msk.bf16.gmra.mxu0 %vm367_vm1, %v3579_v36 }
 0x457   : > { %v3960_v7 = vadd.f32 %v6146_v1, %v3892_v40  ;;  %v3151_v40 = vpack.c.bf16 %v4788_v50, %v4787_v30 }
 0x458   : > { %v2933_v19 = vpop.f32.mrf.mxu2 }
 0x459   : > { %v3363_v28 = vpop.f32.mrf.mxu3  ;;  %v4024_v10 = vmax.f32 %v3960_v7, 0.0  ;;  %v3033_v52 = vadd.f32 %v2933_v19, %v2602_v63  ;;  %v2504_v21 = vpop.f32.mrf.mxu1  ;;  %v3581_v7 = vpack.c.bf16 %v4885_v48, %v4884_v55 }
 0x45a   : > { %v2603_v44 = vadd.f32 %v2504_v21, %v6468_v23  ;;  %v4692_v23 = vld [vmem:[%s5001_s27 + $0x348] sm:$0xff] }
 0x45b   : > { %v4088_v54 = vpack.c.bf16 %v4024_v10, %v4024_v10  ;;  %v3463_v56 = vadd.f32 %v3363_v28, %v3033_v52  ;;  %v3795_v57 = vpop.f32.mrf.mxu0  ;;  %v6471_v52 = vld [vmem:[#allocation15_spill] sm:$0xff] }
 0x45d   : > { %4153 = vst.msk [vmem:[%s5899_s16 + $0x9c] sm:$0xf] %vm4113_vm2, %v4088_v54  ;;  %v3893_v38 = vadd.f32 %v3793_v34, %v3463_v56  ;;  %v2721_v34 = vpack.c.bf16 %v4691_v27, %v4690_v20 }
 0x45f   : > { %v3961_v61 = vadd.f32 %v6146_v1, %v3893_v38 }
 0x460   : > { %v2935_v58 = vpop.f32.mrf.mxu2 }
 0x461   : > { %v3365_v49 = vpop.f32.mrf.mxu3  ;;  %v4025_v0 = vmax.f32 %v3961_v61, 0.0  ;;  %v3034_v60 = vadd.f32 %v2935_v58, %v2603_v44  ;;  %v2507_v17 = vpop.f32.mrf.mxu1  ;;  %v4693_v44 = vld [vmem:[%s5001_s27 + $0x350] sm:$0xff] }
 0x462   : > { %v2604_v3 = vadd.f32 %v2507_v17, %v6469_v43  ;;  %v4887_v17 = vld [vmem:[%s5001_s27 + $0x352] sm:$0xff] }
 0x463   : > { %v4089_v31 = vpack.c.bf16 %v4025_v0, %v4025_v0  ;;  %v3464_v6 = vadd.f32 %v3365_v49, %v3034_v60  ;;  %v3798_v59 = vpop.f32.mrf.mxu0  ;;  %v6472_v49 = vld [vmem:[#allocation17_spill] sm:$0xff]  ;;  %v4886_v60 = vld [vmem:[%s5001_s27 + $0x34a] sm:$0xff] }
 0x464   : > { %4627 = vmatmul.msk.bf16.gmra.mxu1 %vm367_vm1, %v3579_v36 }
 0x465   : > { %4154 = vst.msk [vmem:[%s5899_s16 + $0xa0] sm:$0xf] %vm4113_vm2, %v4089_v31  ;;  %v3894_v11 = vadd.f32 %v3795_v57, %v3464_v6  ;;  %4724 = vmatmul.msk.bf16.gmra.mxu2 %vm367_vm1, %v2720_v16 }
 0x466   : > { %4821 = vmatmul.msk.bf16.gmra.mxu3 %vm367_vm1, %v3150_v25  ;;  %4918 = vmatmul.msk.bf16.gmra.mxu0 %vm367_vm1, %v3580_v62 }
 0x467   : > { %v3962_v29 = vadd.f32 %v6146_v1, %v3894_v11  ;;  %v3152_v11 = vpack.c.bf16 %v4790_v37, %v4789_v12 }
 0x468   : > { %v2938_v45 = vpop.f32.mrf.mxu2 }
 0x469   : > { %v3368_v46 = vpop.f32.mrf.mxu3  ;;  %v4026_v2 = vmax.f32 %v3962_v29, 0.0  ;;  %v3035_v14 = vadd.f32 %v2938_v45, %v2604_v3  ;;  %v2509_v22 = vpop.f32.mrf.mxu1  ;;  %v3582_v29 = vpack.c.bf16 %v4887_v17, %v4886_v60 }
 0x46a   : > { %v2605_v32 = vadd.f32 %v2509_v22, %v6470_v53 }
 0x46b   : > { %v4090_v9 = vpack.c.bf16 %v4026_v2, %v4026_v2  ;;  %v3465_v41 = vadd.f32 %v3368_v46, %v3035_v14  ;;  %v3800_v5 = vpop.f32.mrf.mxu0  ;;  %v6473_v14 = vld [vmem:[#allocation19_spill] sm:$0xff] }
 0x46d   : > { %4155 = vst.msk [vmem:[%s5899_s16 + $0xa4] sm:$0xf] %vm4113_vm2, %v4090_v9  ;;  %v3895_v15 = vadd.f32 %v3798_v59, %v3465_v41  ;;  %v2722_v59 = vpack.c.bf16 %v4693_v44, %v4692_v23 }
 0x46f   : > { %v3963_v26 = vadd.f32 %v6146_v1, %v3895_v15 }
 0x470   : > { %v2940_v51 = vpop.f32.mrf.mxu2 }
 0x471   : > { %v3370_v39 = vpop.f32.mrf.mxu3  ;;  %v4027_v36 = vmax.f32 %v3963_v26, 0.0  ;;  %v3036_v4 = vadd.f32 %v2940_v51, %v2605_v32  ;;  %v2512_v24 = vpop.f32.mrf.mxu1  ;;  %v6474_v32 = vld [vmem:[#allocation21_spill] sm:$0xff] }
 0x472   : > { %v2606_v21 = vadd.f32 %v2512_v24, %v6471_v52 }
 0x473   : > { %v4091_v33 = vpack.c.bf16 %v4027_v36, %v4027_v36  ;;  %v3466_v63 = vadd.f32 %v3370_v39, %v3036_v4  ;;  %v3803_v19 = vpop.f32.mrf.mxu0 }
 0x474   : > { %4628 = vmatmul.msk.bf16.gmra.mxu1 %vm367_vm1, %v3580_v62 }
 0x475   : > { %4156 = vst.msk [vmem:[%s5899_s16 + $0xa8] sm:$0xf] %vm4113_vm2, %v4091_v33  ;;  %v3896_v28 = vadd.f32 %v3800_v5, %v3466_v63  ;;  %4725 = vmatmul.msk.bf16.gmra.mxu2 %vm367_vm1, %v2721_v34  ;;  %v6475_v63 = vld [vmem:[#allocation23_spill] sm:$0xff] }
 0x476   : > { %4822 = vmatmul.msk.bf16.gmra.mxu3 %vm367_vm1, %v3151_v40  ;;  %4919 = vmatmul.msk.bf16.gmra.mxu0 %vm367_vm1, %v3581_v7 }
 0x477   : > { %v3964_v10 = vadd.f32 %v6146_v1, %v3896_v28 }
 0x478   : > { %v2943_v54 = vpop.f32.mrf.mxu2 }
 0x479   : > { %v3373_v56 = vpop.f32.mrf.mxu3  ;;  %v4028_v57 = vmax.f32 %v3964_v10, 0.0  ;;  %v3037_v38 = vadd.f32 %v2943_v54, %v2606_v21  ;;  %v2514_v35 = vpop.f32.mrf.mxu1 }
 0x47a   : > { %v2607_v0 = vadd.f32 %v2514_v35, %v6472_v49 }
 0x47b   : > { %v4092_v8 = vpack.c.bf16 %v4028_v57, %v4028_v57  ;;  %v3467_v13 = vadd.f32 %v3373_v56, %v3037_v38  ;;  %v3805_v18 = vpop.f32.mrf.mxu0 }
 0x47d   : > { %4157 = vst.msk [vmem:[%s5899_s16 + $0xac] sm:$0xf] %vm4113_vm2, %v4092_v8  ;;  %v3897_v61 = vadd.f32 %v3803_v19, %v3467_v13  ;;  %v6476_v13 = vld [vmem:[#allocation25_spill] sm:$0xff] }
 0x47f   : > { %v3965_v58 = vadd.f32 %v6146_v1, %v3897_v61 }
 0x480   : > { %v2945_v16 = vpop.f32.mrf.mxu2 }
 0x481   : > { %v3375_v25 = vpop.f32.mrf.mxu3  ;;  %v4029_v62 = vmax.f32 %v3965_v58, 0.0  ;;  %v3038_v31 = vadd.f32 %v2945_v16, %v2607_v0  ;;  %v2517_v6 = vpop.f32.mrf.mxu1  ;;  %v6477_v16 = vld [vmem:[#allocation27_spill] sm:$0xff] }
 0x482   : > { %v2608_v22 = vadd.f32 %v2517_v6, %v6473_v14 }
 0x483   : > { %v4093_v43 = vpack.c.bf16 %v4029_v62, %v4029_v62  ;;  %v3468_v3 = vadd.f32 %v3375_v25, %v3038_v31  ;;  %v3808_v45 = vpop.f32.mrf.mxu0 }
 0x484   : > { %4629 = vmatmul.msk.bf16.gmra.mxu1 %vm367_vm1, %v3581_v7 }
 0x485   : > { %4158 = vst.msk [vmem:[%s5899_s16 + $0xb0] sm:$0xf] %vm4113_vm2, %v4093_v43  ;;  %v3898_v46 = vadd.f32 %v3805_v18, %v3468_v3  ;;  %4726 = vmatmul.msk.bf16.gmra.mxu2 %vm367_vm1, %v2722_v59 }
 0x486   : > { %4823 = vmatmul.msk.bf16.gmra.mxu3 %vm367_vm1, %v3152_v11  ;;  %4920 = vmatmul.msk.bf16.gmra.mxu0 %vm367_vm1, %v3582_v29 }
 0x487   : > { %v3966_v2 = vadd.f32 %v6146_v1, %v3898_v46 }
 0x488   : > { %v2948_v9 = vpop.f32.mrf.mxu2 }
 0x489   : > { %v3378_v41 = vpop.f32.mrf.mxu3  ;;  %v4030_v5 = vmax.f32 %v3966_v2, 0.0  ;;  %v3039_v15 = vadd.f32 %v2948_v9, %v2608_v22  ;;  %v2519_v20 = vpop.f32.mrf.mxu1  ;;  %v6478_v2 = vld [vmem:[#allocation2_spill] sm:$0xff] }
 0x48a   : > { %v2609_v55 = vadd.f32 %v2519_v20, %v6474_v32 }
 0x48b   : > { %v4094_v27 = vpack.c.bf16 %v4030_v5, %v4030_v5  ;;  %v3469_v30 = vadd.f32 %v3378_v41, %v3039_v15  ;;  %v3810_v50 = vpop.f32.mrf.mxu0 }
 0x48d   : > { %4159 = vst.msk [vmem:[%s5899_s16 + $0xb4] sm:$0xf] %vm4113_vm2, %v4094_v27  ;;  %v3899_v26 = vadd.f32 %v3808_v45, %v3469_v30 }
 0x48f   : > { %v3967_v53 = vadd.f32 %v6146_v1, %v3899_v26 }
 0x490   : > { %v2950_v48 = vpop.f32.mrf.mxu2 }
 0x491   : > { %v3380_v51 = vpop.f32.mrf.mxu3  ;;  %v4031_v39 = vmax.f32 %v3967_v53, 0.0  ;;  %v3040_v36 = vadd.f32 %v2950_v48, %v2609_v55  ;;  %v2522_v4 = vpop.f32.mrf.mxu1  ;;  %v6479_v53 = vld [vmem:[#allocation3_spill] sm:$0xff] }
 0x492   : > { %v2610_v19 = vadd.f32 %v2522_v4, %v6475_v63 }
 0x493   : > { %v4095_v24 = vpack.c.bf16 %v4031_v39, %v4031_v39  ;;  %v3470_v34 = vadd.f32 %v3380_v51, %v3040_v36  ;;  %v3813_v40 = vpop.f32.mrf.mxu0 }
 0x495   : > { %4160 = vst.msk [vmem:[%s5899_s16 + $0xb8] sm:$0xf] %vm4113_vm2, %v4095_v24  ;;  %v3900_v7 = vadd.f32 %v3810_v50, %v3470_v34 }
 0x497   : > { %v3968_v33 = vadd.f32 %v6146_v1, %v3900_v7 }
 0x498   : > { %v2953_v28 = vpop.f32.mrf.mxu2 }
 0x499   : > { %v3383_v10 = vpop.f32.mrf.mxu3  ;;  %v4032_v52 = vmax.f32 %v3968_v33, 0.0  ;;  %v3041_v21 = vadd.f32 %v2953_v28, %v2610_v19  ;;  %v2524_v54 = vpop.f32.mrf.mxu1  ;;  %v6480_v33 = vld [vmem:[#allocation4_spill] sm:$0xff] }
 0x49a   : > { %v2611_v18 = vadd.f32 %v2524_v54, %v6476_v13 }
 0x49b   : > { %v4096_v56 = vpack.c.bf16 %v4032_v52, %v4032_v52  ;;  %v3471_v57 = vadd.f32 %v3383_v10, %v3041_v21  ;;  %v3815_v38 = vpop.f32.mrf.mxu0 }
 0x49d   : > { %4161 = vst.msk [vmem:[%s5899_s16 + $0xbc] sm:$0xf] %vm4113_vm2, %v4096_v56  ;;  %v3901_v35 = vadd.f32 %v3813_v40, %v3471_v57 }
 0x49f   : > { %v3969_v8 = vadd.f32 %v6146_v1, %v3901_v35 }
 0x4a0   : > { %v2955_v61 = vpop.f32.mrf.mxu2 }
 0x4a1   : > { %v3385_v23 = vpop.f32.mrf.mxu3  ;;  %v4033_v44 = vmax.f32 %v3969_v8, 0.0  ;;  %v3042_v12 = vadd.f32 %v2955_v61, %v2611_v18  ;;  %v2527_v37 = vpop.f32.mrf.mxu1  ;;  %v6481_v8 = vld [vmem:[#allocation5_spill] sm:$0xff] }
 0x4a2   : > { %v2612_v25 = vadd.f32 %v2527_v37, %v6477_v16 }
 0x4a3   : > { %v4097_v58 = vpack.c.bf16 %v4033_v44, %v4033_v44  ;;  %v3472_v49 = vadd.f32 %v3385_v23, %v3042_v12  ;;  %v3818_v0 = vpop.f32.mrf.mxu0 }
 0x4a5   : > { %4162 = vst.msk [vmem:[%s5899_s16 + $0xc0] sm:$0xf] %vm4113_vm2, %v4097_v58  ;;  %v3902_v60 = vadd.f32 %v3815_v38, %v3472_v49 }
 0x4a7   : > { %v3970_v17 = vadd.f32 %v6146_v1, %v3902_v60 }
 0x4a8   : > { %v2958_v62 = vpop.f32.mrf.mxu2 }
 0x4a9   : > { %v3388_v31 = vpop.f32.mrf.mxu3  ;;  %v4034_v6 = vmax.f32 %v3970_v17, 0.0  ;;  %v3043_v59 = vadd.f32 %v2958_v62, %v2612_v25  ;;  %v2529_v11 = vpop.f32.mrf.mxu1  ;;  %v6482_v17 = vld [vmem:[#allocation6_spill] sm:$0xff] }
 0x4aa   : > { %v2613_v14 = vadd.f32 %v2529_v11, %v6478_v2 }
 0x4ab   : > { %v4098_v29 = vpack.c.bf16 %v4034_v6, %v4034_v6  ;;  %v3473_v43 = vadd.f32 %v3388_v31, %v3043_v59  ;;  %v3820_v3 = vpop.f32.mrf.mxu0 }
 0x4ad   : > { %4163 = vst.msk [vmem:[%s5899_s16 + $0xc4] sm:$0xf] %vm4113_vm2, %v4098_v29  ;;  %v3903_v45 = vadd.f32 %v3818_v0, %v3473_v43 }
 0x4af   : > { %v3971_v46 = vadd.f32 %v6146_v1, %v3903_v45 }
 0x4b0   : > { %v2960_v22 = vpop.f32.mrf.mxu2 }
 0x4b1   : > { %v3390_v9 = vpop.f32.mrf.mxu3  ;;  %v4035_v41 = vmax.f32 %v3971_v46, 0.0  ;;  %v3044_v5 = vadd.f32 %v2960_v22, %v2613_v14  ;;  %v2532_v15 = vpop.f32.mrf.mxu1  ;;  %v6483_v46 = vld [vmem:[#allocation8_spill] sm:$0xff] }
 0x4b2   : > { %v2614_v32 = vadd.f32 %v2532_v15, %v6479_v53 }
 0x4b3   : > { %v4099_v20 = vpack.c.bf16 %v4035_v41, %v4035_v41  ;;  %v3474_v27 = vadd.f32 %v3390_v9, %v3044_v5  ;;  %v3823_v30 = vpop.f32.mrf.mxu0 }
 0x4b5   : > { %4164 = vst.msk [vmem:[%s5899_s16 + $0xc8] sm:$0xf] %vm4113_vm2, %v4099_v20  ;;  %v3904_v50 = vadd.f32 %v3820_v3, %v3474_v27 }
 0x4b7   : > { %v3972_v26 = vadd.f32 %v6146_v1, %v3904_v50 }
 0x4b8   : > { %v2963_v55 = vpop.f32.mrf.mxu2 }
 0x4b9   : > { %v3393_v48 = vpop.f32.mrf.mxu3  ;;  %v4036_v51 = vmax.f32 %v3972_v26, 0.0  ;;  %v3045_v39 = vadd.f32 %v2963_v55, %v2614_v32  ;;  %v2534_v36 = vpop.f32.mrf.mxu1  ;;  %v6484_v26 = vld [vmem:[#allocation10_spill] sm:$0xff] }
 0x4ba   : > { %v2615_v63 = vadd.f32 %v2534_v36, %v6480_v33 }
 0x4bb   : > { %v4100_v4 = vpack.c.bf16 %v4036_v51, %v4036_v51  ;;  %v3475_v24 = vadd.f32 %v3393_v48, %v3045_v39  ;;  %v3825_v34 = vpop.f32.mrf.mxu0 }
 0x4bd   : > { %4165 = vst.msk [vmem:[%s5899_s16 + $0xcc] sm:$0xf] %vm4113_vm2, %v4100_v4  ;;  %v3905_v40 = vadd.f32 %v3823_v30, %v3475_v24 }
 0x4bf   : > { %v3973_v7 = vadd.f32 %v6146_v1, %v3905_v40 }
 0x4c0   : > { %v2965_v19 = vpop.f32.mrf.mxu2 }
 0x4c1   : > { %v3395_v28 = vpop.f32.mrf.mxu3  ;;  %v4037_v10 = vmax.f32 %v3973_v7, 0.0  ;;  %v3046_v52 = vadd.f32 %v2965_v19, %v2615_v63  ;;  %v2537_v21 = vpop.f32.mrf.mxu1  ;;  %v6485_v7 = vld [vmem:[#allocation12_spill] sm:$0xff] }
 0x4c2   : > { %v2616_v13 = vadd.f32 %v2537_v21, %v6481_v8 }
 0x4c3   : > { %v4101_v54 = vpack.c.bf16 %v4037_v10, %v4037_v10  ;;  %v3476_v56 = vadd.f32 %v3395_v28, %v3046_v52  ;;  %v3828_v57 = vpop.f32.mrf.mxu0 }
 0x4c5   : > { %4166 = vst.msk [vmem:[%s5899_s16 + $0xd0] sm:$0xf] %vm4113_vm2, %v4101_v54  ;;  %v3906_v38 = vadd.f32 %v3825_v34, %v3476_v56 }
 0x4c7   : > { %v3974_v35 = vadd.f32 %v6146_v1, %v3906_v38 }
 0x4c8   : > { %v2968_v18 = vpop.f32.mrf.mxu2 }
 0x4c9   : > { %v3398_v61 = vpop.f32.mrf.mxu3  ;;  %v4038_v23 = vmax.f32 %v3974_v35, 0.0  ;;  %v3047_v44 = vadd.f32 %v2968_v18, %v2616_v13  ;;  %v2539_v12 = vpop.f32.mrf.mxu1  ;;  %v6486_v35 = vld [vmem:[#allocation14_spill] sm:$0xff] }
 0x4ca   : > { %v2617_v16 = vadd.f32 %v2539_v12, %v6482_v17 }
 0x4cb   : > { %v4102_v37 = vpack.c.bf16 %v4038_v23, %v4038_v23  ;;  %v3477_v58 = vadd.f32 %v3398_v61, %v3047_v44  ;;  %v3830_v49 = vpop.f32.mrf.mxu0 }
 0x4cd   : > { %4167 = vst.msk [vmem:[%s5899_s16 + $0xd4] sm:$0xf] %vm4113_vm2, %v4102_v37  ;;  %v3907_v0 = vadd.f32 %v3828_v57, %v3477_v58 }
 0x4cf   : > { %v3975_v60 = vadd.f32 %v6146_v1, %v3907_v0 }
 0x4d0   : > { %v2970_v25 = vpop.f32.mrf.mxu2 }
 0x4d1   : > { %v3400_v62 = vpop.f32.mrf.mxu3  ;;  %v4039_v31 = vmax.f32 %v3975_v60, 0.0  ;;  %v3048_v6 = vadd.f32 %v2970_v25, %v2617_v16  ;;  %v2542_v59 = vpop.f32.mrf.mxu1  ;;  %v6487_v60 = vld [vmem:[#allocation16_spill] sm:$0xff] }
 0x4d2   : > { %v2618_v2 = vadd.f32 %v2542_v59, %v6483_v46 }
 0x4d3   : > { %v4103_v11 = vpack.c.bf16 %v4039_v31, %v4039_v31  ;;  %v3478_v29 = vadd.f32 %v3400_v62, %v3048_v6  ;;  %v3833_v43 = vpop.f32.mrf.mxu0 }
 0x4d5   : > { %4168 = vst.msk [vmem:[%s5899_s16 + $0xd8] sm:$0xf] %vm4113_vm2, %v4103_v11  ;;  %v3908_v3 = vadd.f32 %v3830_v49, %v3478_v29 }
 0x4d7   : > { %v3976_v45 = vadd.f32 %v6146_v1, %v3908_v3 }
 0x4d8   : > { %v2973_v14 = vpop.f32.mrf.mxu2 }
 0x4d9   : > { %v3403_v22 = vpop.f32.mrf.mxu3  ;;  %v4040_v9 = vmax.f32 %v3976_v45, 0.0  ;;  %v3049_v41 = vadd.f32 %v2973_v14, %v2618_v2  ;;  %v2544_v5 = vpop.f32.mrf.mxu1  ;;  %v6488_v45 = vld [vmem:[#allocation18_spill] sm:$0xff] }
 0x4da   : > { %v2619_v53 = vadd.f32 %v2544_v5, %v6484_v26 }
 0x4db   : > { %v4104_v15 = vpack.c.bf16 %v4040_v9, %v4040_v9  ;;  %v3479_v20 = vadd.f32 %v3403_v22, %v3049_v41  ;;  %v3835_v27 = vpop.f32.mrf.mxu0 }
 0x4dd   : > { %4169 = vst.msk [vmem:[%s5899_s16 + $0xdc] sm:$0xf] %vm4113_vm2, %v4104_v15  ;;  %v3909_v30 = vadd.f32 %v3833_v43, %v3479_v20  ;;  %v4938_v43 = vld [vmem:[%s6389_s2] ss:$0 sm:$0xff] }
 0x4df   : > { %v3977_v50 = vadd.f32 %v6146_v1, %v3909_v30 }
 0x4e0   : > { %v2975_v32 = vpop.f32.mrf.mxu2 }
 0x4e1   : > { %v3405_v55 = vpop.f32.mrf.mxu3  ;;  %v4041_v48 = vmax.f32 %v3977_v50, 0.0  ;;  %v3050_v51 = vadd.f32 %v2975_v32, %v2619_v53  ;;  %v2547_v39 = vpop.f32.mrf.mxu1 }
 0x4e2   : > { %v2620_v33 = vadd.f32 %v2547_v39, %v6485_v7 }
 0x4e3   : > { %v4105_v36 = vpack.c.bf16 %v4041_v48, %v4041_v48  ;;  %v3480_v4 = vadd.f32 %v3405_v55, %v3050_v51  ;;  %v3838_v24 = vpop.f32.mrf.mxu0 }
 0x4e5   : > { %4170 = vst.msk [vmem:[%s5899_s16 + $0xe0] sm:$0xf] %vm4113_vm2, %v4105_v36  ;;  %v3910_v34 = vadd.f32 %v3835_v27, %v3480_v4 }
 0x4e7   : > { %v3978_v40 = vadd.f32 %v6146_v1, %v3910_v34 }
 0x4e8   : > { %v2978_v63 = vpop.f32.mrf.mxu2 }
 0x4e9   : > { %v3408_v19 = vpop.f32.mrf.mxu3  ;;  %v4042_v28 = vmax.f32 %v3978_v40, 0.0  ;;  %v3051_v10 = vadd.f32 %v2978_v63, %v2620_v33  ;;  %v2549_v52 = vpop.f32.mrf.mxu1 }
 0x4ea   : > { %v2621_v8 = vadd.f32 %v2549_v52, %v6486_v35 }
 0x4eb   : > { %v4106_v21 = vpack.c.bf16 %v4042_v28, %v4042_v28  ;;  %v3481_v54 = vadd.f32 %v3408_v19, %v3051_v10  ;;  %v3840_v56 = vpop.f32.mrf.mxu0 }
 0x4ed   : > { %4171 = vst.msk [vmem:[%s5899_s16 + $0xe4] sm:$0xf] %vm4113_vm2, %v4106_v21  ;;  %v3911_v57 = vadd.f32 %v3838_v24, %v3481_v54 }
 0x4ef   : > { %v3979_v38 = vadd.f32 %v6146_v1, %v3911_v57 }
 0x4f0   : > { %v2980_v13 = vpop.f32.mrf.mxu2 }
 0x4f1   : > { %v3410_v18 = vpop.f32.mrf.mxu3  ;;  %v4043_v61 = vmax.f32 %v3979_v38, 0.0  ;;  %v3052_v23 = vadd.f32 %v2980_v13, %v2621_v8  ;;  %v2552_v44 = vpop.f32.mrf.mxu1 }
 0x4f2   : > { %v2622_v17 = vadd.f32 %v2552_v44, %v6487_v60 }
 0x4f3   : > { %v4107_v12 = vpack.c.bf16 %v4043_v61, %v4043_v61  ;;  %v3482_v37 = vadd.f32 %v3410_v18, %v3052_v23  ;;  %v3843_v49 = vpop.f32.mrf.mxu0 }
 0x4f5   : > { %4172 = vst.msk [vmem:[%s5899_s16 + $0xe8] sm:$0xf] %vm4113_vm2, %v4107_v12  ;;  %v3912_v58 = vadd.f32 %v3840_v56, %v3482_v37 }
 0x4f7   : > { %v3980_v0 = vadd.f32 %v6146_v1, %v3912_v58 }
 0x4f8   : > { %v2983_v16 = vpop.f32.mrf.mxu2 }
 0x4f9   : > { %v3413_v25 = vpop.f32.mrf.mxu3  ;;  %v4044_v62 = vmax.f32 %v3980_v0, 0.0  ;;  %v3053_v31 = vadd.f32 %v2983_v16, %v2622_v17  ;;  %v2554_v6 = vpop.f32.mrf.mxu1 }
 0x4fa   : > { %v2623_v1 = vadd.f32 %v2554_v6, %v6488_v45 }
 0x4fb   : > { %v4108_v59 = vpack.c.bf16 %v4044_v62, %v4044_v62  ;;  %v3483_v11 = vadd.f32 %v3413_v25, %v3053_v31  ;;  %v3845_v46 = vpop.f32.mrf.mxu0 }
 0x4fd   : > { %4173 = vst.msk [vmem:[%s5899_s16 + $0xec] sm:$0xf] %vm4113_vm2, %v4108_v59  ;;  %v3913_v29 = vadd.f32 %v3843_v49, %v3483_v11 }
 0x4ff   : > { %v3981_v3 = vadd.f32 %v4938_v43, %v3913_v29 }
 0x500   : > { %v2985_v2 = vpop.f32.mrf.mxu2 }
 0x501   : > { %v3415_v14 = vpop.f32.mrf.mxu3  ;;  %v4045_v22 = vmax.f32 %v3981_v3, 0.0  ;;  %v3054_v9 = vadd.f32 %v2985_v2, %v2623_v1  ;;  %v2557_v41 = vpop.f32.mrf.mxu1 }
 0x502   : > { %v2624_v30 = vadd.f32 %v2557_v41, %v5867_v42 }
 0x503   : > { %v4109_v5 = vpack.c.bf16 %v4045_v22, %v4045_v22  ;;  %v3484_v15 = vadd.f32 %v3415_v14, %v3054_v9  ;;  %v3848_v55 = vpop.f32.mrf.mxu0 }
 0x505   : > { %4174 = vst.msk [vmem:[%s5899_s16 + $0xf0] sm:$0xf] %vm4113_vm2, %v4109_v5  ;;  %v3914_v20 = vadd.f32 %v3845_v46, %v3484_v15 }
 0x507   : > { %v3982_v27 = vadd.f32 %v4938_v43, %v3914_v20 }
 0x508   : > { %v2988_v50 = vpop.f32.mrf.mxu2 }
 0x509   : > { %v3418_v26 = vpop.f32.mrf.mxu3  ;;  %v4046_v53 = vmax.f32 %v3982_v27, 0.0  ;;  %v3055_v32 = vadd.f32 %v2988_v50, %v2624_v30  ;;  %v2559_v39 = vpop.f32.mrf.mxu1 }
 0x50a   : > { %v2625_v24 = vadd.f32 %v2559_v39, %v5878_v47 }
 0x50b   : > { %v4110_v48 = vpack.c.bf16 %v4046_v53, %v4046_v53  ;;  %v3485_v51 = vadd.f32 %v3418_v26, %v3055_v32  ;;  %v3850_v19 = vpop.f32.mrf.mxu0 }
 0x50d   : > { %4175 = vst.msk [vmem:[%s5899_s16 + $0xf4] sm:$0xf] %vm4113_vm2, %v4110_v48  ;;  %v3915_v36 = vadd.f32 %v3848_v55, %v3485_v51 }
 0x50f   : > { %v3983_v4 = vadd.f32 %v4938_v43, %v3915_v36 }
 0x510   : > { %v2990_v34 = vpop.f32.mrf.mxu2 }
 0x511   : > { %v4047_v40 = vmax.f32 %v3983_v4, 0.0  ;;  %v3056_v7 = vadd.f32 %v2990_v34, %v2625_v24  ;;  %v3420_v42 = vpop.f32.mrf.mxu3 }
 0x513   : > { %v4111_v33 = vpack.c.bf16 %v4047_v40, %v4047_v40  ;;  %v3486_v63 = vadd.f32 %v3420_v42, %v3056_v7 }
 0x515   : > { %4176 = vst.msk [vmem:[%s5899_s16 + $0xf8] sm:$0xf] %vm4113_vm2, %v4111_v33  ;;  %v3916_v28 = vadd.f32 %v3850_v19, %v3486_v63 }
 0x517   : > { %v3984_v10 = vadd.f32 %v4938_v43, %v3916_v28 }
 0x519   : > { %v4048_v52 = vmax.f32 %v3984_v10, 0.0 }
 0x51b   : > { %v4112_v21 = vpack.c.bf16 %v4048_v52, %v4048_v52 }
 0x51d   : > { %4177 = vst.msk [vmem:[%s5899_s16 + $0xfc] sm:$0xf] %vm4113_vm2, %v4112_v21 }
 0x51e PF: > { %s13_s12 = sadd.s32 1, %s4945_s12  }
 0x51f   : > { %p10_p4 = scmp.ge.s32.totalorder %s13_s12, 4  }
 0x521   :  { %12 = sbr.rel (!%p10_p4) target bundleno = 1 (0x1), region = 72 }

</bundles_post_ra>
